<compile_context>
chip_gen: v6e
topology: v6e:2x2x1
jax: 0.10.0
libtpu: 0.0.40
codegen_flags: <defaults>
</compile_context>

<pallas_src>
import functools

import jax
import jax.numpy as jnp
from jax import lax
from jax.experimental import pallas as pl
from jax.experimental.pallas import tpu as pltpu


# ----------------------------------------------------------------------------
# In-kernel helpers
# ----------------------------------------------------------------------------
def _layer_norm(x, g, b, eps=1e-5):
    mu = jnp.mean(x, axis=-1, keepdims=True)
    var = jnp.mean(jnp.square(x - mu), axis=-1, keepdims=True)
    return (x - mu) * lax.rsqrt(var + eps) * g + b


# ----------------------------------------------------------------------------
# Fused kernel: all layers + final head in one pallas_call
# ----------------------------------------------------------------------------
def fused_transformer_kernel(tokens_ref, valid_ref,
                             ln1_g_ref, ln1_b_ref,
                             wq_ref, bq_ref, wk_ref, bk_ref, wv_ref, bv_ref,
                             wo_ref, bo_ref,
                             ln2_g_ref, ln2_b_ref, w1_ref, b1_ref, w2_ref, b2_ref,
                             hln_g_ref, hln_b_ref, hw_ref, hb_ref,
                             out_ref, *, num_heads, num_layers, q_pos):
    """tokens_ref: (B, S, H) f32, valid_ref: (B, S) f32, out_ref: (B, A_pad) f32.

    Stacked weights: wq/wk/wv (L, nh, H, dh) bf16 (scale folded into wq/bq),
    wo (L, nh, dh, H) bf16, w1 (L, H, F) bf16, w2 (L, F, H) bf16; biases / LN f32.
    """
    B, S, H = tokens_ref.shape
    nh = num_heads
    dh = H // nh
    f32 = jnp.float32
    bf16 = jnp.bfloat16

    x = tokens_ref[...]                  # (B, S, H) f32
    valid = valid_ref[...]               # (B, S)   f32 (1 = real token, 0 = pad)

    # ---- additive causal + padding mask, built in-kernel -----------------
    row = lax.broadcasted_iota(jnp.int32, (S, S), 0)
    col = lax.broadcasted_iota(jnp.int32, (S, S), 1)
    causal_f = (col <= row).astype(f32)                     # (S, S)
    diag_f = (col == row).astype(f32)                       # keep diagonal open
    allow = causal_f[None, :, :] * valid[:, None, :]        # (B, S, S)
    allow = jnp.maximum(allow, diag_f[None, :, :])
    add_mask = jnp.where(allow > 0.0, 0.0, -1e9).astype(f32)

    x_flat = x.reshape(B * S, H)         # batch folded into M (cheap, tile-aligned)

    for l in range(num_layers):          # static unrolled; weights stay in VMEM
        # ---- multi-head self attention -----------------------------------
        xn = _layer_norm(x_flat, ln1_g_ref[l], ln1_b_ref[l])
        xn_b = xn.astype(bf16)
        attn = jnp.zeros((B * S, H), f32)
        for h in range(nh):              # weights pre-split per head host-side
            qh = jnp.dot(xn_b, wq_ref[l, h], preferred_element_type=f32) + bq_ref[l, h]
            kh = jnp.dot(xn_b, wk_ref[l, h], preferred_element_type=f32) + bk_ref[l, h]
            vh = jnp.dot(xn_b, wv_ref[l, h], preferred_element_type=f32) + bv_ref[l, h]
            q3 = qh.reshape(B, S, dh).astype(bf16)
            k3 = kh.reshape(B, S, dh).astype(bf16)
            v3 = vh.reshape(B, S, dh).astype(bf16)
            s3 = jnp.einsum('bqd,bkd->bqk', q3, k3,
                            preferred_element_type=f32)      # (B, S, S)
            s3 = s3 + add_mask
            m = jnp.max(s3, axis=-1, keepdims=True)
            p = jnp.exp(s3 - m)
            denom = jnp.sum(p, axis=-1, keepdims=True)
            p = p * pl.reciprocal(denom, approx=True)
            o3 = jnp.einsum('bqk,bkd->bqd', p.astype(bf16), v3,
                            preferred_element_type=f32)      # (B, S, dh)
            # accumulate W_o per head instead of concatenating head outputs
            attn = attn + jnp.dot(o3.reshape(B * S, dh).astype(bf16),
                                  wo_ref[l, h], preferred_element_type=f32)
        x_flat = x_flat + attn + bo_ref[l]

        # ---- MLP -----------------------------------------------------------
        xn2 = _layer_norm(x_flat, ln2_g_ref[l], ln2_b_ref[l])
        h1 = jnp.dot(xn2.astype(bf16), w1_ref[l], preferred_element_type=f32) + b1_ref[l]
        h1 = jax.nn.gelu(h1)
        h2 = jnp.dot(h1.astype(bf16), w2_ref[l], preferred_element_type=f32) + b2_ref[l]
        x_flat = x_flat + h2

    # ---- final LN + action head, query token only ------------------------
    xq = x_flat.reshape(B, S, H)[:, q_pos, :]                # (B, H)
    xqn = _layer_norm(xq, hln_g_ref[...], hln_b_ref[...])
    out_ref[...] = jnp.dot(xqn.astype(bf16), hw_ref[...],
                           preferred_element_type=f32) + hb_ref[...]


# ----------------------------------------------------------------------------
# pallas_call wrapper
# ----------------------------------------------------------------------------
_PACKED_KEYS = ('ln1_g', 'ln1_b', 'wq', 'bq', 'wk', 'bk', 'wv', 'bv', 'wo', 'bo',
                'ln2_g', 'ln2_b', 'w1', 'b1', 'w2', 'b2',
                'head_ln_g', 'head_ln_b', 'head_w', 'head_b')


def _full_spec(arr):
    nd = arr.ndim
    return pl.BlockSpec(arr.shape, lambda i, _nd=nd: (0,) * _nd)


def run_fused(tokens, valid, packed, *, num_heads, num_layers, q_pos):
    B, S, H = tokens.shape
    a_pad = packed['head_w'].shape[1]
    inputs = [tokens, valid] + [packed[k] for k in _PACKED_KEYS]
    return pl.pallas_call(
        functools.partial(fused_transformer_kernel, num_heads=num_heads,
                          num_layers=num_layers, q_pos=q_pos),
        out_shape=jax.ShapeDtypeStruct((B, a_pad), jnp.float32),
        grid=(1,),
        in_specs=[_full_spec(a) for a in inputs],
        out_specs=pl.BlockSpec((B, a_pad), lambda i: (0, 0)),
        compiler_params=pltpu.CompilerParams(
            dimension_semantics=("arbitrary",)),
    )(*inputs)


# ----------------------------------------------------------------------------
# Model (parameters + glue)
# ----------------------------------------------------------------------------
class ADTransformerPallas:
    obs_dim: int
    act_dim: int

    def __init__(self, obs_dim, act_dim, hidden_size=64, num_heads=2,
                 num_layers=2, max_timestep=32, key=None):
        assert hidden_size % num_heads == 0, "hidden_size must be divisible by num_heads"
        self.obs_dim = obs_dim
        self.act_dim = act_dim
        self.hidden_size = hidden_size
        self.num_heads = num_heads
        self.num_layers = num_layers
        self.max_timestep = max_timestep

        H, F = hidden_size, 4 * hidden_size
        nh = num_heads
        dh = H // nh
        if key is None:
            key = jax.random.PRNGKey(0)
        keys = iter(jax.random.split(key, 8 + 6 * num_layers))

        def dense(shape, scale=0.02):
            return (scale * jax.random.normal(next(keys), shape)).astype(jnp.float32)

        zeros = lambda s: jnp.zeros(s, jnp.float32)
        ones = lambda s: jnp.ones(s, jnp.float32)

        self.params = {
            'obs_w': dense((obs_dim, H)), 'obs_b': zeros((1, H)),
            'act_emb': dense((act_dim, H)),
            'rew_w': dense((1, H)), 'rew_b': zeros((1, H)),
            'type_emb': dense((3, H)),
            'pos_emb': dense((max_timestep + 1, H)),
            'head_ln_g': ones((1, H)), 'head_ln_b': zeros((1, H)),
            'head_w': dense((H, act_dim)), 'head_b': zeros((1, act_dim)),
            'layers': [],
        }
        for _ in range(num_layers):
            self.params['layers'].append({
                'ln1_g': ones((1, H)), 'ln1_b': zeros((1, H)),
                'wq': dense((H, H)), 'bq': zeros((1, H)),
                'wk': dense((H, H)), 'bk': zeros((1, H)),
                'wv': dense((H, H)), 'bv': zeros((1, H)),
                'wo': dense((H, H)), 'bo': zeros((1, H)),
                'ln2_g': ones((1, H)), 'ln2_b': zeros((1, H)),
                'w1': dense((H, F)), 'b1': zeros((1, F)),
                'w2': dense((F, H)), 'b2': zeros((1, H)),
            })

        # ---- pack weights once for the fused kernel ------------------------
        bf16 = jnp.bfloat16
        scale = 1.0 / float(dh) ** 0.5

        def split_qkv(w):   # (H, H) -> (nh, H, dh)
            return w.reshape(H, nh, dh).transpose(1, 0, 2)

        def split_bias(b):  # (1, H) -> (nh, 1, dh)
            return b.reshape(nh, dh)[:, None, :]

        def split_wo(w):    # (H, H) -> (nh, dh, H)
            return w.reshape(nh, dh, H)

        L = self.params['layers']
        stack = lambda fn, k: jnp.stack([fn(ly[k]) for ly in L], axis=0)
        ident = lambda a: a

        a_pad = ((act_dim + 127) // 128) * 128
        head_w_p = jnp.zeros((H, a_pad), jnp.float32).at[:, :act_dim].set(self.params['head_w'])
        head_b_p = jnp.zeros((1, a_pad), jnp.float32).at[:, :act_dim].set(self.params['head_b'])

        self.packed = {
            'ln1_g': stack(ident, 'ln1_g'), 'ln1_b': stack(ident, 'ln1_b'),
            # fold 1/sqrt(dh) into W_q / b_q
            'wq': jnp.stack([split_qkv(ly['wq'] * scale) for ly in L]).astype(bf16),
            'bq': jnp.stack([split_bias(ly['bq'] * scale) for ly in L]),
            'wk': stack(split_qkv, 'wk').astype(bf16), 'bk': stack(split_bias, 'bk'),
            'wv': stack(split_qkv, 'wv').astype(bf16), 'bv': stack(split_bias, 'bv'),
            'wo': stack(split_wo, 'wo').astype(bf16), 'bo': stack(ident, 'bo'),
            'ln2_g': stack(ident, 'ln2_g'), 'ln2_b': stack(ident, 'ln2_b'),
            'w1': stack(ident, 'w1').astype(bf16), 'b1': stack(ident, 'b1'),
            'w2': stack(ident, 'w2').astype(bf16), 'b2': stack(ident, 'b2'),
            'head_ln_g': self.params['head_ln_g'], 'head_ln_b': self.params['head_ln_b'],
            'head_w': head_w_p.astype(bf16), 'head_b': head_b_p,
        }
        self._a_pad = a_pad

    # TODO(synk): ADTransformer.forward is abstract in the reference code; this is a
    # canonical AD decoder instantiation (current_action / current_reward are accepted
    # but not fed to the model, matching inference-time action prediction).
    def __call__(self, obs, actions, rewards, current_obs, current_action=None,
                 current_reward=None, attention_mask=None, step_ids=None,
                 current_step_id=None):
        p = self.params
        H = self.hidden_size
        B, T, _ = obs.shape

        if step_ids is None:
            step_ids = jnp.broadcast_to(jnp.arange(T, dtype=jnp.int32), (B, T))
        if current_step_id is None:
            current_step_id = jnp.full((B,), T, dtype=jnp.int32)
        if attention_mask is None:
            attention_mask = jnp.ones((B, T), jnp.float32)
        attention_mask = attention_mask.astype(jnp.float32)

        # --- embed tokens (glue) ------------------------------------------
        pos = p['pos_emb'][step_ids]                                  # (B, T, H)
        obs_tok = obs.astype(jnp.float32) @ p['obs_w'] + p['obs_b'] + p['type_emb'][0] + pos
        act_tok = p['act_emb'][actions] + p['type_emb'][1] + pos
        rew_tok = rewards.astype(jnp.float32)[..., None] @ p['rew_w'] + p['rew_b'] \
            + p['type_emb'][2] + pos
        tokens = jnp.stack([obs_tok, act_tok, rew_tok], axis=2).reshape(B, 3 * T, H)

        q_tok = current_obs.astype(jnp.float32) @ p['obs_w'] + p['obs_b'] \
            + p['type_emb'][0] + p['pos_emb'][current_step_id]        # (B, H)
        tokens = jnp.concatenate([tokens, q_tok[:, None, :]], axis=1)  # (B, S_real, H)

        s_real = 3 * T + 1
        s_pad = ((s_real + 7) // 8) * 8            # sublane-align the sequence
        q_pos = 3 * T                              # query token index (static)

        tokens = jnp.pad(tokens, ((0, 0), (0, s_pad - s_real), (0, 0))).astype(jnp.float32)

        # (B, S_pad) token validity: real history tokens gated by attention_mask,
        # query token always valid, padded tail invalid.
        tok_valid = jnp.repeat(attention_mask, 3, axis=1)              # (B, 3T)
        tok_valid = jnp.concatenate([tok_valid, jnp.ones((B, 1), jnp.float32)], axis=1)
        tok_valid = jnp.pad(tok_valid, ((0, 0), (0, s_pad - s_real)))

        # --- fused transformer + head (single Pallas kernel) ---------------
        logits_pad = run_fused(tokens, tok_valid, self.packed,
                               num_heads=self.num_heads,
                               num_layers=self.num_layers,
                               q_pos=q_pos)                            # (B, A_pad)
        return logits_pad[:, :self.act_dim]                           # (B, act_dim)


# ----------------------------------------------------------------------------
if __name__ == "__main__":
    B, T, OBS_DIM, ACT_DIM = 2, 4, 4, 3

    model = ADTransformerPallas(obs_dim=OBS_DIM, act_dim=ACT_DIM, hidden_size=64,
                                num_heads=2, num_layers=2, max_timestep=32,
                                key=jax.random.PRNGKey(0))

    key = jax.random.PRNGKey(0)
    k1, k2, k3, k4 = jax.random.split(key, 4)
    obs = jax.random.normal(k1, (B, T, OBS_DIM), jnp.float32)
    actions = jax.random.randint(k2, (B, T), 0, ACT_DIM, dtype=jnp.int32)
    rewards = jax.random.normal(k3, (B, T), jnp.float32)
    current_obs = jax.random.normal(k4, (B, OBS_DIM), jnp.float32)

    logits = model(obs, actions, rewards, current_obs)
    jax.block_until_ready(logits)

    assert logits.shape == (B, ACT_DIM), logits.shape
    assert bool(jnp.all(jnp.isfinite(logits)))
    print("KERNEL_OK")
</pallas_src>

<mosaic_0001>
module attributes {stable_mosaic.version = 11 : i64} {
  func.func @fused_transformer_kernel(%arg0: i32, %arg1: memref<2x16x64xf32, #tpu.memory_space<vmem>>, %arg2: memref<2x16xf32, #tpu.memory_space<vmem>>, %arg3: memref<2x1x64xf32, #tpu.memory_space<vmem>>, %arg4: memref<2x1x64xf32, #tpu.memory_space<vmem>>, %arg5: memref<2x2x64x32xbf16, #tpu.memory_space<vmem>>, %arg6: memref<2x2x1x32xf32, #tpu.memory_space<vmem>>, %arg7: memref<2x2x64x32xbf16, #tpu.memory_space<vmem>>, %arg8: memref<2x2x1x32xf32, #tpu.memory_space<vmem>>, %arg9: memref<2x2x64x32xbf16, #tpu.memory_space<vmem>>, %arg10: memref<2x2x1x32xf32, #tpu.memory_space<vmem>>, %arg11: memref<2x2x32x64xbf16, #tpu.memory_space<vmem>>, %arg12: memref<2x1x64xf32, #tpu.memory_space<vmem>>, %arg13: memref<2x1x64xf32, #tpu.memory_space<vmem>>, %arg14: memref<2x1x64xf32, #tpu.memory_space<vmem>>, %arg15: memref<2x64x256xbf16, #tpu.memory_space<vmem>>, %arg16: memref<2x1x256xf32, #tpu.memory_space<vmem>>, %arg17: memref<2x256x64xbf16, #tpu.memory_space<vmem>>, %arg18: memref<2x1x64xf32, #tpu.memory_space<vmem>>, %arg19: memref<1x64xf32, #tpu.memory_space<vmem>>, %arg20: memref<1x64xf32, #tpu.memory_space<vmem>>, %arg21: memref<64x128xbf16, #tpu.memory_space<vmem>>, %arg22: memref<1x128xf32, #tpu.memory_space<vmem>>, %arg23: memref<2x128xf32, #tpu.memory_space<vmem>>) attributes {dimension_semantics = [#tpu.dimension_semantics<arbitrary>], iteration_bounds = array<i64: 1>, scalar_prefetch = 0 : i64, scratch_operands = 0 : i64, tpu.core_type = #tpu.core_type<tc>, window_params = [{pipeline_mode = #tpu.pipeline_mode<synchronous>, transform_indices = @transform_0, window_bounds = array<i64: 2, 16, 64>}, {pipeline_mode = #tpu.pipeline_mode<synchronous>, transform_indices = @transform_1, window_bounds = array<i64: 2, 16>}, {pipeline_mode = #tpu.pipeline_mode<synchronous>, transform_indices = @transform_2, window_bounds = array<i64: 2, 1, 64>}, {pipeline_mode = #tpu.pipeline_mode<synchronous>, transform_indices = @transform_3, window_bounds = array<i64: 2, 1, 64>}, {pipeline_mode = #tpu.pipeline_mode<synchronous>, transform_indices = @transform_4, window_bounds = array<i64: 2, 2, 64, 32>}, {pipeline_mode = #tpu.pipeline_mode<synchronous>, transform_indices = @transform_5, window_bounds = array<i64: 2, 2, 1, 32>}, {pipeline_mode = #tpu.pipeline_mode<synchronous>, transform_indices = @transform_6, window_bounds = array<i64: 2, 2, 64, 32>}, {pipeline_mode = #tpu.pipeline_mode<synchronous>, transform_indices = @transform_7, window_bounds = array<i64: 2, 2, 1, 32>}, {pipeline_mode = #tpu.pipeline_mode<synchronous>, transform_indices = @transform_8, window_bounds = array<i64: 2, 2, 64, 32>}, {pipeline_mode = #tpu.pipeline_mode<synchronous>, transform_indices = @transform_9, window_bounds = array<i64: 2, 2, 1, 32>}, {pipeline_mode = #tpu.pipeline_mode<synchronous>, transform_indices = @transform_10, window_bounds = array<i64: 2, 2, 32, 64>}, {pipeline_mode = #tpu.pipeline_mode<synchronous>, transform_indices = @transform_11, window_bounds = array<i64: 2, 1, 64>}, {pipeline_mode = #tpu.pipeline_mode<synchronous>, transform_indices = @transform_12, window_bounds = array<i64: 2, 1, 64>}, {pipeline_mode = #tpu.pipeline_mode<synchronous>, transform_indices = @transform_13, window_bounds = array<i64: 2, 1, 64>}, {pipeline_mode = #tpu.pipeline_mode<synchronous>, transform_indices = @transform_14, window_bounds = array<i64: 2, 64, 256>}, {pipeline_mode = #tpu.pipeline_mode<synchronous>, transform_indices = @transform_15, window_bounds = array<i64: 2, 1, 256>}, {pipeline_mode = #tpu.pipeline_mode<synchronous>, transform_indices = @transform_16, window_bounds = array<i64: 2, 256, 64>}, {pipeline_mode = #tpu.pipeline_mode<synchronous>, transform_indices = @transform_17, window_bounds = array<i64: 2, 1, 64>}, {pipeline_mode = #tpu.pipeline_mode<synchronous>, transform_indices = @transform_18, window_bounds = array<i64: 1, 64>}, {pipeline_mode = #tpu.pipeline_mode<synchronous>, transform_indices = @transform_19, window_bounds = array<i64: 1, 64>}, {pipeline_mode = #tpu.pipeline_mode<synchronous>, transform_indices = @transform_20, window_bounds = array<i64: 64, 128>}, {pipeline_mode = #tpu.pipeline_mode<synchronous>, transform_indices = @transform_21, window_bounds = array<i64: 1, 128>}, {pipeline_mode = #tpu.pipeline_mode<synchronous>, transform_indices = @transform_22, window_bounds = array<i64: 2, 128>}]} {
    %c0 = arith.constant 0 : index
    %c0_0 = arith.constant 0 : index
    %c0_1 = arith.constant 0 : index
    %0 = vector.load %arg1[%c0, %c0_0, %c0_1] : memref<2x16x64xf32, #tpu.memory_space<vmem>>, vector<2x16x64xf32>
    %c0_2 = arith.constant 0 : index
    %c0_3 = arith.constant 0 : index
    %1 = vector.load %arg2[%c0_2, %c0_3] : memref<2x16xf32, #tpu.memory_space<vmem>>, vector<2x16xf32>
    %2 = tpu.iota {dimensions = array<i32: 0>} : vector<16x16xi32>
    %3 = tpu.iota {dimensions = array<i32: 1>} : vector<16x16xi32>
    %4 = arith.cmpi sle, %3, %2 : vector<16x16xi32>
    %5 = arith.extui %4 : vector<16x16xi1> to vector<16x16xi32>
    %6 = arith.sitofp %5 : vector<16x16xi32> to vector<16x16xf32>
    %7 = arith.cmpi eq, %3, %2 : vector<16x16xi32>
    %8 = arith.extui %7 : vector<16x16xi1> to vector<16x16xi32>
    %9 = arith.sitofp %8 : vector<16x16xi32> to vector<16x16xf32>
    %10 = vector.shape_cast %6 : vector<16x16xf32> to vector<1x16x16xf32>
    %11 = vector.shape_cast %1 : vector<2x16xf32> to vector<2x1x16xf32>
    %12 = vector.broadcast %10 : vector<1x16x16xf32> to vector<2x16x16xf32>
    %13 = vector.broadcast %11 : vector<2x1x16xf32> to vector<2x16x16xf32>
    %14 = arith.mulf %12, %13 : vector<2x16x16xf32>
    %15 = vector.shape_cast %9 : vector<16x16xf32> to vector<1x16x16xf32>
    %16 = vector.broadcast %15 : vector<1x16x16xf32> to vector<2x16x16xf32>
    %17 = arith.maximumf %14, %16 : vector<2x16x16xf32>
    %cst = arith.constant 0.000000e+00 : f32
    %18 = vector.broadcast %cst : f32 to vector<2x16x16xf32>
    %19 = arith.cmpf ogt, %17, %18 : vector<2x16x16xf32>
    %cst_4 = arith.constant 0.000000e+00 : f32
    %cst_5 = arith.constant -1.000000e+09 : f32
    %20 = vector.broadcast %cst_4 : f32 to vector<2x16x16xf32>
    %21 = vector.broadcast %cst_5 : f32 to vector<2x16x16xf32>
    %22 = arith.select %19, %20, %21 : vector<2x16x16xi1>, vector<2x16x16xf32>
    %23 = vector.shape_cast %0 : vector<2x16x64xf32> to vector<32x64xf32>
    %c0_6 = arith.constant 0 : index
    %c0_7 = arith.constant 0 : index
    %c0_8 = arith.constant 0 : index
    %24 = vector.load %arg3[%c0_6, %c0_7, %c0_8] : memref<2x1x64xf32, #tpu.memory_space<vmem>>, vector<1x1x64xf32>
    %25 = vector.shape_cast %24 : vector<1x1x64xf32> to vector<1x64xf32>
    %c0_9 = arith.constant 0 : index
    %c0_10 = arith.constant 0 : index
    %c0_11 = arith.constant 0 : index
    %26 = vector.load %arg4[%c0_9, %c0_10, %c0_11] : memref<2x1x64xf32, #tpu.memory_space<vmem>>, vector<1x1x64xf32>
    %27 = vector.shape_cast %26 : vector<1x1x64xf32> to vector<1x64xf32>
    %cst_12 = arith.constant dense<0.000000e+00> : vector<32xf32>
    %28 = vector.multi_reduction <add>, %23, %cst_12 [1] : vector<32x64xf32> to vector<32xf32>
    %29 = vector.shape_cast %28 : vector<32xf32> to vector<32x1xf32>
    %cst_13 = arith.constant 6.400000e+01 : f32
    %30 = vector.broadcast %cst_13 : f32 to vector<32x1xf32>
    %31 = arith.divf %29, %30 : vector<32x1xf32>
    %32 = vector.broadcast %31 : vector<32x1xf32> to vector<32x64xf32>
    %33 = arith.subf %23, %32 : vector<32x64xf32>
    %34 = arith.mulf %33, %33 : vector<32x64xf32>
    %cst_14 = arith.constant dense<0.000000e+00> : vector<32xf32>
    %35 = vector.multi_reduction <add>, %34, %cst_14 [1] : vector<32x64xf32> to vector<32xf32>
    %36 = vector.shape_cast %35 : vector<32xf32> to vector<32x1xf32>
    %cst_15 = arith.constant 6.400000e+01 : f32
    %37 = vector.broadcast %cst_15 : f32 to vector<32x1xf32>
    %38 = arith.divf %36, %37 : vector<32x1xf32>
    %39 = vector.broadcast %31 : vector<32x1xf32> to vector<32x64xf32>
    %40 = arith.subf %23, %39 : vector<32x64xf32>
    %cst_16 = arith.constant 9.99999974E-6 : f32
    %41 = vector.broadcast %cst_16 : f32 to vector<32x1xf32>
    %42 = arith.addf %38, %41 : vector<32x1xf32>
    %43 = math.rsqrt %42 : vector<32x1xf32>
    %44 = vector.broadcast %43 : vector<32x1xf32> to vector<32x64xf32>
    %45 = arith.mulf %40, %44 : vector<32x64xf32>
    %46 = vector.broadcast %25 : vector<1x64xf32> to vector<32x64xf32>
    %47 = arith.mulf %45, %46 : vector<32x64xf32>
    %48 = vector.broadcast %27 : vector<1x64xf32> to vector<32x64xf32>
    %49 = arith.addf %47, %48 : vector<32x64xf32>
    %50 = arith.truncf %49 : vector<32x64xf32> to vector<32x64xbf16>
    %cst_17 = arith.constant 0.000000e+00 : f32
    %51 = vector.broadcast %cst_17 : f32 to vector<32x64xf32>
    %c0_18 = arith.constant 0 : index
    %c0_19 = arith.constant 0 : index
    %c0_20 = arith.constant 0 : index
    %c0_21 = arith.constant 0 : index
    %52 = vector.load %arg5[%c0_18, %c0_19, %c0_20, %c0_21] : memref<2x2x64x32xbf16, #tpu.memory_space<vmem>>, vector<1x1x64x32xbf16>
    %53 = vector.shape_cast %52 : vector<1x1x64x32xbf16> to vector<64x32xbf16>
    %cst_22 = arith.constant dense<0.000000e+00> : vector<32x32xf32>
    %54 = tpu.matmul %50, %53, %cst_22 {dimension_numbers = #tpu.dot_dimension_numbers<[1], [0], [0], [1], [0, 0, 1, 1], [], []>} : vector<32x64xbf16>, vector<64x32xbf16>, vector<32x32xf32> -> vector<32x32xf32>
    %c0_23 = arith.constant 0 : index
    %c0_24 = arith.constant 0 : index
    %c0_25 = arith.constant 0 : index
    %c0_26 = arith.constant 0 : index
    %55 = vector.load %arg6[%c0_23, %c0_24, %c0_25, %c0_26] : memref<2x2x1x32xf32, #tpu.memory_space<vmem>>, vector<1x1x1x32xf32>
    %56 = vector.shape_cast %55 : vector<1x1x1x32xf32> to vector<1x32xf32>
    %57 = vector.broadcast %56 : vector<1x32xf32> to vector<32x32xf32>
    %58 = arith.addf %54, %57 : vector<32x32xf32>
    %c0_27 = arith.constant 0 : index
    %c0_28 = arith.constant 0 : index
    %c0_29 = arith.constant 0 : index
    %c0_30 = arith.constant 0 : index
    %59 = vector.load %arg7[%c0_27, %c0_28, %c0_29, %c0_30] : memref<2x2x64x32xbf16, #tpu.memory_space<vmem>>, vector<1x1x64x32xbf16>
    %60 = vector.shape_cast %59 : vector<1x1x64x32xbf16> to vector<64x32xbf16>
    %cst_31 = arith.constant dense<0.000000e+00> : vector<32x32xf32>
    %61 = tpu.matmul %50, %60, %cst_31 {dimension_numbers = #tpu.dot_dimension_numbers<[1], [0], [0], [1], [0, 0, 1, 1], [], []>} : vector<32x64xbf16>, vector<64x32xbf16>, vector<32x32xf32> -> vector<32x32xf32>
    %c0_32 = arith.constant 0 : index
    %c0_33 = arith.constant 0 : index
    %c0_34 = arith.constant 0 : index
    %c0_35 = arith.constant 0 : index
    %62 = vector.load %arg8[%c0_32, %c0_33, %c0_34, %c0_35] : memref<2x2x1x32xf32, #tpu.memory_space<vmem>>, vector<1x1x1x32xf32>
    %63 = vector.shape_cast %62 : vector<1x1x1x32xf32> to vector<1x32xf32>
    %64 = vector.broadcast %63 : vector<1x32xf32> to vector<32x32xf32>
    %65 = arith.addf %61, %64 : vector<32x32xf32>
    %c0_36 = arith.constant 0 : index
    %c0_37 = arith.constant 0 : index
    %c0_38 = arith.constant 0 : index
    %c0_39 = arith.constant 0 : index
    %66 = vector.load %arg9[%c0_36, %c0_37, %c0_38, %c0_39] : memref<2x2x64x32xbf16, #tpu.memory_space<vmem>>, vector<1x1x64x32xbf16>
    %67 = vector.shape_cast %66 : vector<1x1x64x32xbf16> to vector<64x32xbf16>
    %cst_40 = arith.constant dense<0.000000e+00> : vector<32x32xf32>
    %68 = tpu.matmul %50, %67, %cst_40 {dimension_numbers = #tpu.dot_dimension_numbers<[1], [0], [0], [1], [0, 0, 1, 1], [], []>} : vector<32x64xbf16>, vector<64x32xbf16>, vector<32x32xf32> -> vector<32x32xf32>
    %c0_41 = arith.constant 0 : index
    %c0_42 = arith.constant 0 : index
    %c0_43 = arith.constant 0 : index
    %c0_44 = arith.constant 0 : index
    %69 = vector.load %arg10[%c0_41, %c0_42, %c0_43, %c0_44] : memref<2x2x1x32xf32, #tpu.memory_space<vmem>>, vector<1x1x1x32xf32>
    %70 = vector.shape_cast %69 : vector<1x1x1x32xf32> to vector<1x32xf32>
    %71 = vector.broadcast %70 : vector<1x32xf32> to vector<32x32xf32>
    %72 = arith.addf %68, %71 : vector<32x32xf32>
    %73 = vector.shape_cast %58 : vector<32x32xf32> to vector<2x16x32xf32>
    %74 = arith.truncf %73 : vector<2x16x32xf32> to vector<2x16x32xbf16>
    %75 = vector.shape_cast %65 : vector<32x32xf32> to vector<2x16x32xf32>
    %76 = arith.truncf %75 : vector<2x16x32xf32> to vector<2x16x32xbf16>
    %77 = vector.shape_cast %72 : vector<32x32xf32> to vector<2x16x32xf32>
    %78 = arith.truncf %77 : vector<2x16x32xf32> to vector<2x16x32xbf16>
    "tpu.trace_start"() <{level = 10 : i32, message = "bqd,bkd->bqk"}> : () -> ()
    %cst_45 = arith.constant dense<0.000000e+00> : vector<2x16x16xf32>
    %79 = tpu.matmul %74, %76, %cst_45 {dimension_numbers = #tpu.dot_dimension_numbers<[2], [2], [1], [1], [0, 0, 0, 1, 1, 1], [0], [0]>} : vector<2x16x32xbf16>, vector<2x16x32xbf16>, vector<2x16x16xf32> -> vector<2x16x16xf32>
    "tpu.trace_stop"() : () -> ()
    %80 = arith.addf %79, %22 : vector<2x16x16xf32>
    %cst_46 = arith.constant dense<0xFF800000> : vector<2x16xf32>
    %81 = vector.multi_reduction <maximumf>, %80, %cst_46 [2] : vector<2x16x16xf32> to vector<2x16xf32>
    %82 = vector.shape_cast %81 : vector<2x16xf32> to vector<2x16x1xf32>
    %83 = vector.broadcast %82 : vector<2x16x1xf32> to vector<2x16x16xf32>
    %84 = arith.subf %80, %83 : vector<2x16x16xf32>
    %85 = math.exp %84 : vector<2x16x16xf32>
    %cst_47 = arith.constant dense<0.000000e+00> : vector<2x16xf32>
    %86 = vector.multi_reduction <add>, %85, %cst_47 [2] : vector<2x16x16xf32> to vector<2x16xf32>
    %87 = vector.shape_cast %86 : vector<2x16xf32> to vector<2x16x1xf32>
    %88 = tpu.reciprocal %87 {approx = true} : vector<2x16x1xf32> -> vector<2x16x1xf32>
    %89 = vector.broadcast %88 : vector<2x16x1xf32> to vector<2x16x16xf32>
    %90 = arith.mulf %85, %89 : vector<2x16x16xf32>
    %91 = arith.truncf %90 : vector<2x16x16xf32> to vector<2x16x16xbf16>
    "tpu.trace_start"() <{level = 10 : i32, message = "bqk,bkd->bqd"}> : () -> ()
    %cst_48 = arith.constant dense<0.000000e+00> : vector<2x16x32xf32>
    %92 = tpu.matmul %91, %78, %cst_48 {dimension_numbers = #tpu.dot_dimension_numbers<[2], [1], [1], [2], [0, 0, 0, 1, 1, 2], [0], [0]>} : vector<2x16x16xbf16>, vector<2x16x32xbf16>, vector<2x16x32xf32> -> vector<2x16x32xf32>
    "tpu.trace_stop"() : () -> ()
    %93 = vector.shape_cast %92 : vector<2x16x32xf32> to vector<32x32xf32>
    %94 = arith.truncf %93 : vector<32x32xf32> to vector<32x32xbf16>
    %c0_49 = arith.constant 0 : index
    %c0_50 = arith.constant 0 : index
    %c0_51 = arith.constant 0 : index
    %c0_52 = arith.constant 0 : index
    %95 = vector.load %arg11[%c0_49, %c0_50, %c0_51, %c0_52] : memref<2x2x32x64xbf16, #tpu.memory_space<vmem>>, vector<1x1x32x64xbf16>
    %96 = vector.shape_cast %95 : vector<1x1x32x64xbf16> to vector<32x64xbf16>
    %cst_53 = arith.constant dense<0.000000e+00> : vector<32x64xf32>
    %97 = tpu.matmul %94, %96, %cst_53 {dimension_numbers = #tpu.dot_dimension_numbers<[1], [0], [0], [1], [0, 0, 1, 1], [], []>} : vector<32x32xbf16>, vector<32x64xbf16>, vector<32x64xf32> -> vector<32x64xf32>
    %98 = arith.addf %51, %97 : vector<32x64xf32>
    %c0_54 = arith.constant 0 : index
    %c1 = arith.constant 1 : index
    %c0_55 = arith.constant 0 : index
    %c0_56 = arith.constant 0 : index
    %99 = vector.load %arg5[%c0_54, %c1, %c0_55, %c0_56] : memref<2x2x64x32xbf16, #tpu.memory_space<vmem>>, vector<1x1x64x32xbf16>
    %100 = vector.shape_cast %99 : vector<1x1x64x32xbf16> to vector<64x32xbf16>
    %cst_57 = arith.constant dense<0.000000e+00> : vector<32x32xf32>
    %101 = tpu.matmul %50, %100, %cst_57 {dimension_numbers = #tpu.dot_dimension_numbers<[1], [0], [0], [1], [0, 0, 1, 1], [], []>} : vector<32x64xbf16>, vector<64x32xbf16>, vector<32x32xf32> -> vector<32x32xf32>
    %c0_58 = arith.constant 0 : index
    %c1_59 = arith.constant 1 : index
    %c0_60 = arith.constant 0 : index
    %c0_61 = arith.constant 0 : index
    %102 = vector.load %arg6[%c0_58, %c1_59, %c0_60, %c0_61] : memref<2x2x1x32xf32, #tpu.memory_space<vmem>>, vector<1x1x1x32xf32>
    %103 = vector.shape_cast %102 : vector<1x1x1x32xf32> to vector<1x32xf32>
    %104 = vector.broadcast %103 : vector<1x32xf32> to vector<32x32xf32>
    %105 = arith.addf %101, %104 : vector<32x32xf32>
    %c0_62 = arith.constant 0 : index
    %c1_63 = arith.constant 1 : index
    %c0_64 = arith.constant 0 : index
    %c0_65 = arith.constant 0 : index
    %106 = vector.load %arg7[%c0_62, %c1_63, %c0_64, %c0_65] : memref<2x2x64x32xbf16, #tpu.memory_space<vmem>>, vector<1x1x64x32xbf16>
    %107 = vector.shape_cast %106 : vector<1x1x64x32xbf16> to vector<64x32xbf16>
    %cst_66 = arith.constant dense<0.000000e+00> : vector<32x32xf32>
    %108 = tpu.matmul %50, %107, %cst_66 {dimension_numbers = #tpu.dot_dimension_numbers<[1], [0], [0], [1], [0, 0, 1, 1], [], []>} : vector<32x64xbf16>, vector<64x32xbf16>, vector<32x32xf32> -> vector<32x32xf32>
    %c0_67 = arith.constant 0 : index
    %c1_68 = arith.constant 1 : index
    %c0_69 = arith.constant 0 : index
    %c0_70 = arith.constant 0 : index
    %109 = vector.load %arg8[%c0_67, %c1_68, %c0_69, %c0_70] : memref<2x2x1x32xf32, #tpu.memory_space<vmem>>, vector<1x1x1x32xf32>
    %110 = vector.shape_cast %109 : vector<1x1x1x32xf32> to vector<1x32xf32>
    %111 = vector.broadcast %110 : vector<1x32xf32> to vector<32x32xf32>
    %112 = arith.addf %108, %111 : vector<32x32xf32>
    %c0_71 = arith.constant 0 : index
    %c1_72 = arith.constant 1 : index
    %c0_73 = arith.constant 0 : index
    %c0_74 = arith.constant 0 : index
    %113 = vector.load %arg9[%c0_71, %c1_72, %c0_73, %c0_74] : memref<2x2x64x32xbf16, #tpu.memory_space<vmem>>, vector<1x1x64x32xbf16>
    %114 = vector.shape_cast %113 : vector<1x1x64x32xbf16> to vector<64x32xbf16>
    %cst_75 = arith.constant dense<0.000000e+00> : vector<32x32xf32>
    %115 = tpu.matmul %50, %114, %cst_75 {dimension_numbers = #tpu.dot_dimension_numbers<[1], [0], [0], [1], [0, 0, 1, 1], [], []>} : vector<32x64xbf16>, vector<64x32xbf16>, vector<32x32xf32> -> vector<32x32xf32>
    %c0_76 = arith.constant 0 : index
    %c1_77 = arith.constant 1 : index
    %c0_78 = arith.constant 0 : index
    %c0_79 = arith.constant 0 : index
    %116 = vector.load %arg10[%c0_76, %c1_77, %c0_78, %c0_79] : memref<2x2x1x32xf32, #tpu.memory_space<vmem>>, vector<1x1x1x32xf32>
    %117 = vector.shape_cast %116 : vector<1x1x1x32xf32> to vector<1x32xf32>
    %118 = vector.broadcast %117 : vector<1x32xf32> to vector<32x32xf32>
    %119 = arith.addf %115, %118 : vector<32x32xf32>
    %120 = vector.shape_cast %105 : vector<32x32xf32> to vector<2x16x32xf32>
    %121 = arith.truncf %120 : vector<2x16x32xf32> to vector<2x16x32xbf16>
    %122 = vector.shape_cast %112 : vector<32x32xf32> to vector<2x16x32xf32>
    %123 = arith.truncf %122 : vector<2x16x32xf32> to vector<2x16x32xbf16>
    %124 = vector.shape_cast %119 : vector<32x32xf32> to vector<2x16x32xf32>
    %125 = arith.truncf %124 : vector<2x16x32xf32> to vector<2x16x32xbf16>
    "tpu.trace_start"() <{level = 10 : i32, message = "bqd,bkd->bqk"}> : () -> ()
    %cst_80 = arith.constant dense<0.000000e+00> : vector<2x16x16xf32>
    %126 = tpu.matmul %121, %123, %cst_80 {dimension_numbers = #tpu.dot_dimension_numbers<[2], [2], [1], [1], [0, 0, 0, 1, 1, 1], [0], [0]>} : vector<2x16x32xbf16>, vector<2x16x32xbf16>, vector<2x16x16xf32> -> vector<2x16x16xf32>
    "tpu.trace_stop"() : () -> ()
    %127 = arith.addf %126, %22 : vector<2x16x16xf32>
    %cst_81 = arith.constant dense<0xFF800000> : vector<2x16xf32>
    %128 = vector.multi_reduction <maximumf>, %127, %cst_81 [2] : vector<2x16x16xf32> to vector<2x16xf32>
    %129 = vector.shape_cast %128 : vector<2x16xf32> to vector<2x16x1xf32>
    %130 = vector.broadcast %129 : vector<2x16x1xf32> to vector<2x16x16xf32>
    %131 = arith.subf %127, %130 : vector<2x16x16xf32>
    %132 = math.exp %131 : vector<2x16x16xf32>
    %cst_82 = arith.constant dense<0.000000e+00> : vector<2x16xf32>
    %133 = vector.multi_reduction <add>, %132, %cst_82 [2] : vector<2x16x16xf32> to vector<2x16xf32>
    %134 = vector.shape_cast %133 : vector<2x16xf32> to vector<2x16x1xf32>
    %135 = tpu.reciprocal %134 {approx = true} : vector<2x16x1xf32> -> vector<2x16x1xf32>
    %136 = vector.broadcast %135 : vector<2x16x1xf32> to vector<2x16x16xf32>
    %137 = arith.mulf %132, %136 : vector<2x16x16xf32>
    %138 = arith.truncf %137 : vector<2x16x16xf32> to vector<2x16x16xbf16>
    "tpu.trace_start"() <{level = 10 : i32, message = "bqk,bkd->bqd"}> : () -> ()
    %cst_83 = arith.constant dense<0.000000e+00> : vector<2x16x32xf32>
    %139 = tpu.matmul %138, %125, %cst_83 {dimension_numbers = #tpu.dot_dimension_numbers<[2], [1], [1], [2], [0, 0, 0, 1, 1, 2], [0], [0]>} : vector<2x16x16xbf16>, vector<2x16x32xbf16>, vector<2x16x32xf32> -> vector<2x16x32xf32>
    "tpu.trace_stop"() : () -> ()
    %140 = vector.shape_cast %139 : vector<2x16x32xf32> to vector<32x32xf32>
    %141 = arith.truncf %140 : vector<32x32xf32> to vector<32x32xbf16>
    %c0_84 = arith.constant 0 : index
    %c1_85 = arith.constant 1 : index
    %c0_86 = arith.constant 0 : index
    %c0_87 = arith.constant 0 : index
    %142 = vector.load %arg11[%c0_84, %c1_85, %c0_86, %c0_87] : memref<2x2x32x64xbf16, #tpu.memory_space<vmem>>, vector<1x1x32x64xbf16>
    %143 = vector.shape_cast %142 : vector<1x1x32x64xbf16> to vector<32x64xbf16>
    %cst_88 = arith.constant dense<0.000000e+00> : vector<32x64xf32>
    %144 = tpu.matmul %141, %143, %cst_88 {dimension_numbers = #tpu.dot_dimension_numbers<[1], [0], [0], [1], [0, 0, 1, 1], [], []>} : vector<32x32xbf16>, vector<32x64xbf16>, vector<32x64xf32> -> vector<32x64xf32>
    %145 = arith.addf %98, %144 : vector<32x64xf32>
    %146 = arith.addf %23, %145 : vector<32x64xf32>
    %c0_89 = arith.constant 0 : index
    %c0_90 = arith.constant 0 : index
    %c0_91 = arith.constant 0 : index
    %147 = vector.load %arg12[%c0_89, %c0_90, %c0_91] : memref<2x1x64xf32, #tpu.memory_space<vmem>>, vector<1x1x64xf32>
    %148 = vector.shape_cast %147 : vector<1x1x64xf32> to vector<1x64xf32>
    %149 = vector.broadcast %148 : vector<1x64xf32> to vector<32x64xf32>
    %150 = arith.addf %146, %149 : vector<32x64xf32>
    %c0_92 = arith.constant 0 : index
    %c0_93 = arith.constant 0 : index
    %c0_94 = arith.constant 0 : index
    %151 = vector.load %arg13[%c0_92, %c0_93, %c0_94] : memref<2x1x64xf32, #tpu.memory_space<vmem>>, vector<1x1x64xf32>
    %152 = vector.shape_cast %151 : vector<1x1x64xf32> to vector<1x64xf32>
    %c0_95 = arith.constant 0 : index
    %c0_96 = arith.constant 0 : index
    %c0_97 = arith.constant 0 : index
    %153 = vector.load %arg14[%c0_95, %c0_96, %c0_97] : memref<2x1x64xf32, #tpu.memory_space<vmem>>, vector<1x1x64xf32>
    %154 = vector.shape_cast %153 : vector<1x1x64xf32> to vector<1x64xf32>
    %cst_98 = arith.constant dense<0.000000e+00> : vector<32xf32>
    %155 = vector.multi_reduction <add>, %150, %cst_98 [1] : vector<32x64xf32> to vector<32xf32>
    %156 = vector.shape_cast %155 : vector<32xf32> to vector<32x1xf32>
    %cst_99 = arith.constant 6.400000e+01 : f32
    %157 = vector.broadcast %cst_99 : f32 to vector<32x1xf32>
    %158 = arith.divf %156, %157 : vector<32x1xf32>
    %159 = vector.broadcast %158 : vector<32x1xf32> to vector<32x64xf32>
    %160 = arith.subf %150, %159 : vector<32x64xf32>
    %161 = arith.mulf %160, %160 : vector<32x64xf32>
    %cst_100 = arith.constant dense<0.000000e+00> : vector<32xf32>
    %162 = vector.multi_reduction <add>, %161, %cst_100 [1] : vector<32x64xf32> to vector<32xf32>
    %163 = vector.shape_cast %162 : vector<32xf32> to vector<32x1xf32>
    %cst_101 = arith.constant 6.400000e+01 : f32
    %164 = vector.broadcast %cst_101 : f32 to vector<32x1xf32>
    %165 = arith.divf %163, %164 : vector<32x1xf32>
    %166 = vector.broadcast %158 : vector<32x1xf32> to vector<32x64xf32>
    %167 = arith.subf %150, %166 : vector<32x64xf32>
    %cst_102 = arith.constant 9.99999974E-6 : f32
    %168 = vector.broadcast %cst_102 : f32 to vector<32x1xf32>
    %169 = arith.addf %165, %168 : vector<32x1xf32>
    %170 = math.rsqrt %169 : vector<32x1xf32>
    %171 = vector.broadcast %170 : vector<32x1xf32> to vector<32x64xf32>
    %172 = arith.mulf %167, %171 : vector<32x64xf32>
    %173 = vector.broadcast %152 : vector<1x64xf32> to vector<32x64xf32>
    %174 = arith.mulf %172, %173 : vector<32x64xf32>
    %175 = vector.broadcast %154 : vector<1x64xf32> to vector<32x64xf32>
    %176 = arith.addf %174, %175 : vector<32x64xf32>
    %177 = arith.truncf %176 : vector<32x64xf32> to vector<32x64xbf16>
    %c0_103 = arith.constant 0 : index
    %c0_104 = arith.constant 0 : index
    %c0_105 = arith.constant 0 : index
    %178 = vector.load %arg15[%c0_103, %c0_104, %c0_105] : memref<2x64x256xbf16, #tpu.memory_space<vmem>>, vector<1x64x256xbf16>
    %179 = vector.shape_cast %178 : vector<1x64x256xbf16> to vector<64x256xbf16>
    %cst_106 = arith.constant dense<0.000000e+00> : vector<32x256xf32>
    %180 = tpu.matmul %177, %179, %cst_106 {dimension_numbers = #tpu.dot_dimension_numbers<[1], [0], [0], [1], [0, 0, 1, 1], [], []>} : vector<32x64xbf16>, vector<64x256xbf16>, vector<32x256xf32> -> vector<32x256xf32>
    %c0_107 = arith.constant 0 : index
    %c0_108 = arith.constant 0 : index
    %c0_109 = arith.constant 0 : index
    %181 = vector.load %arg16[%c0_107, %c0_108, %c0_109] : memref<2x1x256xf32, #tpu.memory_space<vmem>>, vector<1x1x256xf32>
    %182 = vector.shape_cast %181 : vector<1x1x256xf32> to vector<1x256xf32>
    %183 = vector.broadcast %182 : vector<1x256xf32> to vector<32x256xf32>
    %184 = arith.addf %180, %183 : vector<32x256xf32>
    %185 = arith.mulf %184, %184 : vector<32x256xf32>
    %186 = arith.mulf %184, %185 : vector<32x256xf32>
    %cst_110 = arith.constant 4.471500e-02 : f32
    %187 = vector.broadcast %cst_110 : f32 to vector<32x256xf32>
    %188 = arith.mulf %187, %186 : vector<32x256xf32>
    %189 = arith.addf %184, %188 : vector<32x256xf32>
    %cst_111 = arith.constant 0.797884583 : f32
    %190 = vector.broadcast %cst_111 : f32 to vector<32x256xf32>
    %191 = arith.mulf %190, %189 : vector<32x256xf32>
    %192 = math.tanh %191 : vector<32x256xf32>
    %cst_112 = arith.constant 1.000000e+00 : f32
    %193 = vector.broadcast %cst_112 : f32 to vector<32x256xf32>
    %194 = arith.addf %193, %192 : vector<32x256xf32>
    %cst_113 = arith.constant 5.000000e-01 : f32
    %195 = vector.broadcast %cst_113 : f32 to vector<32x256xf32>
    %196 = arith.mulf %195, %194 : vector<32x256xf32>
    %197 = arith.mulf %184, %196 : vector<32x256xf32>
    %198 = arith.truncf %197 : vector<32x256xf32> to vector<32x256xbf16>
    %c0_114 = arith.constant 0 : index
    %c0_115 = arith.constant 0 : index
    %c0_116 = arith.constant 0 : index
    %199 = vector.load %arg17[%c0_114, %c0_115, %c0_116] : memref<2x256x64xbf16, #tpu.memory_space<vmem>>, vector<1x256x64xbf16>
    %200 = vector.shape_cast %199 : vector<1x256x64xbf16> to vector<256x64xbf16>
    %cst_117 = arith.constant dense<0.000000e+00> : vector<32x64xf32>
    %201 = tpu.matmul %198, %200, %cst_117 {dimension_numbers = #tpu.dot_dimension_numbers<[1], [0], [0], [1], [0, 0, 1, 1], [], []>} : vector<32x256xbf16>, vector<256x64xbf16>, vector<32x64xf32> -> vector<32x64xf32>
    %c0_118 = arith.constant 0 : index
    %c0_119 = arith.constant 0 : index
    %c0_120 = arith.constant 0 : index
    %202 = vector.load %arg18[%c0_118, %c0_119, %c0_120] : memref<2x1x64xf32, #tpu.memory_space<vmem>>, vector<1x1x64xf32>
    %203 = vector.shape_cast %202 : vector<1x1x64xf32> to vector<1x64xf32>
    %204 = vector.broadcast %203 : vector<1x64xf32> to vector<32x64xf32>
    %205 = arith.addf %201, %204 : vector<32x64xf32>
    %206 = arith.addf %150, %205 : vector<32x64xf32>
    %c1_121 = arith.constant 1 : index
    %c0_122 = arith.constant 0 : index
    %c0_123 = arith.constant 0 : index
    %207 = vector.load %arg3[%c1_121, %c0_122, %c0_123] : memref<2x1x64xf32, #tpu.memory_space<vmem>>, vector<1x1x64xf32>
    %208 = vector.shape_cast %207 : vector<1x1x64xf32> to vector<1x64xf32>
    %c1_124 = arith.constant 1 : index
    %c0_125 = arith.constant 0 : index
    %c0_126 = arith.constant 0 : index
    %209 = vector.load %arg4[%c1_124, %c0_125, %c0_126] : memref<2x1x64xf32, #tpu.memory_space<vmem>>, vector<1x1x64xf32>
    %210 = vector.shape_cast %209 : vector<1x1x64xf32> to vector<1x64xf32>
    %cst_127 = arith.constant dense<0.000000e+00> : vector<32xf32>
    %211 = vector.multi_reduction <add>, %206, %cst_127 [1] : vector<32x64xf32> to vector<32xf32>
    %212 = vector.shape_cast %211 : vector<32xf32> to vector<32x1xf32>
    %cst_128 = arith.constant 6.400000e+01 : f32
    %213 = vector.broadcast %cst_128 : f32 to vector<32x1xf32>
    %214 = arith.divf %212, %213 : vector<32x1xf32>
    %215 = vector.broadcast %214 : vector<32x1xf32> to vector<32x64xf32>
    %216 = arith.subf %206, %215 : vector<32x64xf32>
    %217 = arith.mulf %216, %216 : vector<32x64xf32>
    %cst_129 = arith.constant dense<0.000000e+00> : vector<32xf32>
    %218 = vector.multi_reduction <add>, %217, %cst_129 [1] : vector<32x64xf32> to vector<32xf32>
    %219 = vector.shape_cast %218 : vector<32xf32> to vector<32x1xf32>
    %cst_130 = arith.constant 6.400000e+01 : f32
    %220 = vector.broadcast %cst_130 : f32 to vector<32x1xf32>
    %221 = arith.divf %219, %220 : vector<32x1xf32>
    %222 = vector.broadcast %214 : vector<32x1xf32> to vector<32x64xf32>
    %223 = arith.subf %206, %222 : vector<32x64xf32>
    %cst_131 = arith.constant 9.99999974E-6 : f32
    %224 = vector.broadcast %cst_131 : f32 to vector<32x1xf32>
    %225 = arith.addf %221, %224 : vector<32x1xf32>
    %226 = math.rsqrt %225 : vector<32x1xf32>
    %227 = vector.broadcast %226 : vector<32x1xf32> to vector<32x64xf32>
    %228 = arith.mulf %223, %227 : vector<32x64xf32>
    %229 = vector.broadcast %208 : vector<1x64xf32> to vector<32x64xf32>
    %230 = arith.mulf %228, %229 : vector<32x64xf32>
    %231 = vector.broadcast %210 : vector<1x64xf32> to vector<32x64xf32>
    %232 = arith.addf %230, %231 : vector<32x64xf32>
    %233 = arith.truncf %232 : vector<32x64xf32> to vector<32x64xbf16>
    %cst_132 = arith.constant 0.000000e+00 : f32
    %234 = vector.broadcast %cst_132 : f32 to vector<32x64xf32>
    %c1_133 = arith.constant 1 : index
    %c0_134 = arith.constant 0 : index
    %c0_135 = arith.constant 0 : index
    %c0_136 = arith.constant 0 : index
    %235 = vector.load %arg5[%c1_133, %c0_134, %c0_135, %c0_136] : memref<2x2x64x32xbf16, #tpu.memory_space<vmem>>, vector<1x1x64x32xbf16>
    %236 = vector.shape_cast %235 : vector<1x1x64x32xbf16> to vector<64x32xbf16>
    %cst_137 = arith.constant dense<0.000000e+00> : vector<32x32xf32>
    %237 = tpu.matmul %233, %236, %cst_137 {dimension_numbers = #tpu.dot_dimension_numbers<[1], [0], [0], [1], [0, 0, 1, 1], [], []>} : vector<32x64xbf16>, vector<64x32xbf16>, vector<32x32xf32> -> vector<32x32xf32>
    %c1_138 = arith.constant 1 : index
    %c0_139 = arith.constant 0 : index
    %c0_140 = arith.constant 0 : index
    %c0_141 = arith.constant 0 : index
    %238 = vector.load %arg6[%c1_138, %c0_139, %c0_140, %c0_141] : memref<2x2x1x32xf32, #tpu.memory_space<vmem>>, vector<1x1x1x32xf32>
    %239 = vector.shape_cast %238 : vector<1x1x1x32xf32> to vector<1x32xf32>
    %240 = vector.broadcast %239 : vector<1x32xf32> to vector<32x32xf32>
    %241 = arith.addf %237, %240 : vector<32x32xf32>
    %c1_142 = arith.constant 1 : index
    %c0_143 = arith.constant 0 : index
    %c0_144 = arith.constant 0 : index
    %c0_145 = arith.constant 0 : index
    %242 = vector.load %arg7[%c1_142, %c0_143, %c0_144, %c0_145] : memref<2x2x64x32xbf16, #tpu.memory_space<vmem>>, vector<1x1x64x32xbf16>
    %243 = vector.shape_cast %242 : vector<1x1x64x32xbf16> to vector<64x32xbf16>
    %cst_146 = arith.constant dense<0.000000e+00> : vector<32x32xf32>
    %244 = tpu.matmul %233, %243, %cst_146 {dimension_numbers = #tpu.dot_dimension_numbers<[1], [0], [0], [1], [0, 0, 1, 1], [], []>} : vector<32x64xbf16>, vector<64x32xbf16>, vector<32x32xf32> -> vector<32x32xf32>
    %c1_147 = arith.constant 1 : index
    %c0_148 = arith.constant 0 : index
    %c0_149 = arith.constant 0 : index
    %c0_150 = arith.constant 0 : index
    %245 = vector.load %arg8[%c1_147, %c0_148, %c0_149, %c0_150] : memref<2x2x1x32xf32, #tpu.memory_space<vmem>>, vector<1x1x1x32xf32>
    %246 = vector.shape_cast %245 : vector<1x1x1x32xf32> to vector<1x32xf32>
    %247 = vector.broadcast %246 : vector<1x32xf32> to vector<32x32xf32>
    %248 = arith.addf %244, %247 : vector<32x32xf32>
    %c1_151 = arith.constant 1 : index
    %c0_152 = arith.constant 0 : index
    %c0_153 = arith.constant 0 : index
    %c0_154 = arith.constant 0 : index
    %249 = vector.load %arg9[%c1_151, %c0_152, %c0_153, %c0_154] : memref<2x2x64x32xbf16, #tpu.memory_space<vmem>>, vector<1x1x64x32xbf16>
    %250 = vector.shape_cast %249 : vector<1x1x64x32xbf16> to vector<64x32xbf16>
    %cst_155 = arith.constant dense<0.000000e+00> : vector<32x32xf32>
    %251 = tpu.matmul %233, %250, %cst_155 {dimension_numbers = #tpu.dot_dimension_numbers<[1], [0], [0], [1], [0, 0, 1, 1], [], []>} : vector<32x64xbf16>, vector<64x32xbf16>, vector<32x32xf32> -> vector<32x32xf32>
    %c1_156 = arith.constant 1 : index
    %c0_157 = arith.constant 0 : index
    %c0_158 = arith.constant 0 : index
    %c0_159 = arith.constant 0 : index
    %252 = vector.load %arg10[%c1_156, %c0_157, %c0_158, %c0_159] : memref<2x2x1x32xf32, #tpu.memory_space<vmem>>, vector<1x1x1x32xf32>
    %253 = vector.shape_cast %252 : vector<1x1x1x32xf32> to vector<1x32xf32>
    %254 = vector.broadcast %253 : vector<1x32xf32> to vector<32x32xf32>
    %255 = arith.addf %251, %254 : vector<32x32xf32>
    %256 = vector.shape_cast %241 : vector<32x32xf32> to vector<2x16x32xf32>
    %257 = arith.truncf %256 : vector<2x16x32xf32> to vector<2x16x32xbf16>
    %258 = vector.shape_cast %248 : vector<32x32xf32> to vector<2x16x32xf32>
    %259 = arith.truncf %258 : vector<2x16x32xf32> to vector<2x16x32xbf16>
    %260 = vector.shape_cast %255 : vector<32x32xf32> to vector<2x16x32xf32>
    %261 = arith.truncf %260 : vector<2x16x32xf32> to vector<2x16x32xbf16>
    "tpu.trace_start"() <{level = 10 : i32, message = "bqd,bkd->bqk"}> : () -> ()
    %cst_160 = arith.constant dense<0.000000e+00> : vector<2x16x16xf32>
    %262 = tpu.matmul %257, %259, %cst_160 {dimension_numbers = #tpu.dot_dimension_numbers<[2], [2], [1], [1], [0, 0, 0, 1, 1, 1], [0], [0]>} : vector<2x16x32xbf16>, vector<2x16x32xbf16>, vector<2x16x16xf32> -> vector<2x16x16xf32>
    "tpu.trace_stop"() : () -> ()
    %263 = arith.addf %262, %22 : vector<2x16x16xf32>
    %cst_161 = arith.constant dense<0xFF800000> : vector<2x16xf32>
    %264 = vector.multi_reduction <maximumf>, %263, %cst_161 [2] : vector<2x16x16xf32> to vector<2x16xf32>
    %265 = vector.shape_cast %264 : vector<2x16xf32> to vector<2x16x1xf32>
    %266 = vector.broadcast %265 : vector<2x16x1xf32> to vector<2x16x16xf32>
    %267 = arith.subf %263, %266 : vector<2x16x16xf32>
    %268 = math.exp %267 : vector<2x16x16xf32>
    %cst_162 = arith.constant dense<0.000000e+00> : vector<2x16xf32>
    %269 = vector.multi_reduction <add>, %268, %cst_162 [2] : vector<2x16x16xf32> to vector<2x16xf32>
    %270 = vector.shape_cast %269 : vector<2x16xf32> to vector<2x16x1xf32>
    %271 = tpu.reciprocal %270 {approx = true} : vector<2x16x1xf32> -> vector<2x16x1xf32>
    %272 = vector.broadcast %271 : vector<2x16x1xf32> to vector<2x16x16xf32>
    %273 = arith.mulf %268, %272 : vector<2x16x16xf32>
    %274 = arith.truncf %273 : vector<2x16x16xf32> to vector<2x16x16xbf16>
    "tpu.trace_start"() <{level = 10 : i32, message = "bqk,bkd->bqd"}> : () -> ()
    %cst_163 = arith.constant dense<0.000000e+00> : vector<2x16x32xf32>
    %275 = tpu.matmul %274, %261, %cst_163 {dimension_numbers = #tpu.dot_dimension_numbers<[2], [1], [1], [2], [0, 0, 0, 1, 1, 2], [0], [0]>} : vector<2x16x16xbf16>, vector<2x16x32xbf16>, vector<2x16x32xf32> -> vector<2x16x32xf32>
    "tpu.trace_stop"() : () -> ()
    %276 = vector.shape_cast %275 : vector<2x16x32xf32> to vector<32x32xf32>
    %277 = arith.truncf %276 : vector<32x32xf32> to vector<32x32xbf16>
    %c1_164 = arith.constant 1 : index
    %c0_165 = arith.constant 0 : index
    %c0_166 = arith.constant 0 : index
    %c0_167 = arith.constant 0 : index
    %278 = vector.load %arg11[%c1_164, %c0_165, %c0_166, %c0_167] : memref<2x2x32x64xbf16, #tpu.memory_space<vmem>>, vector<1x1x32x64xbf16>
    %279 = vector.shape_cast %278 : vector<1x1x32x64xbf16> to vector<32x64xbf16>
    %cst_168 = arith.constant dense<0.000000e+00> : vector<32x64xf32>
    %280 = tpu.matmul %277, %279, %cst_168 {dimension_numbers = #tpu.dot_dimension_numbers<[1], [0], [0], [1], [0, 0, 1, 1], [], []>} : vector<32x32xbf16>, vector<32x64xbf16>, vector<32x64xf32> -> vector<32x64xf32>
    %281 = arith.addf %234, %280 : vector<32x64xf32>
    %c1_169 = arith.constant 1 : index
    %c1_170 = arith.constant 1 : index
    %c0_171 = arith.constant 0 : index
    %c0_172 = arith.constant 0 : index
    %282 = vector.load %arg5[%c1_169, %c1_170, %c0_171, %c0_172] : memref<2x2x64x32xbf16, #tpu.memory_space<vmem>>, vector<1x1x64x32xbf16>
    %283 = vector.shape_cast %282 : vector<1x1x64x32xbf16> to vector<64x32xbf16>
    %cst_173 = arith.constant dense<0.000000e+00> : vector<32x32xf32>
    %284 = tpu.matmul %233, %283, %cst_173 {dimension_numbers = #tpu.dot_dimension_numbers<[1], [0], [0], [1], [0, 0, 1, 1], [], []>} : vector<32x64xbf16>, vector<64x32xbf16>, vector<32x32xf32> -> vector<32x32xf32>
    %c1_174 = arith.constant 1 : index
    %c1_175 = arith.constant 1 : index
    %c0_176 = arith.constant 0 : index
    %c0_177 = arith.constant 0 : index
    %285 = vector.load %arg6[%c1_174, %c1_175, %c0_176, %c0_177] : memref<2x2x1x32xf32, #tpu.memory_space<vmem>>, vector<1x1x1x32xf32>
    %286 = vector.shape_cast %285 : vector<1x1x1x32xf32> to vector<1x32xf32>
    %287 = vector.broadcast %286 : vector<1x32xf32> to vector<32x32xf32>
    %288 = arith.addf %284, %287 : vector<32x32xf32>
    %c1_178 = arith.constant 1 : index
    %c1_179 = arith.constant 1 : index
    %c0_180 = arith.constant 0 : index
    %c0_181 = arith.constant 0 : index
    %289 = vector.load %arg7[%c1_178, %c1_179, %c0_180, %c0_181] : memref<2x2x64x32xbf16, #tpu.memory_space<vmem>>, vector<1x1x64x32xbf16>
    %290 = vector.shape_cast %289 : vector<1x1x64x32xbf16> to vector<64x32xbf16>
    %cst_182 = arith.constant dense<0.000000e+00> : vector<32x32xf32>
    %291 = tpu.matmul %233, %290, %cst_182 {dimension_numbers = #tpu.dot_dimension_numbers<[1], [0], [0], [1], [0, 0, 1, 1], [], []>} : vector<32x64xbf16>, vector<64x32xbf16>, vector<32x32xf32> -> vector<32x32xf32>
    %c1_183 = arith.constant 1 : index
    %c1_184 = arith.constant 1 : index
    %c0_185 = arith.constant 0 : index
    %c0_186 = arith.constant 0 : index
    %292 = vector.load %arg8[%c1_183, %c1_184, %c0_185, %c0_186] : memref<2x2x1x32xf32, #tpu.memory_space<vmem>>, vector<1x1x1x32xf32>
    %293 = vector.shape_cast %292 : vector<1x1x1x32xf32> to vector<1x32xf32>
    %294 = vector.broadcast %293 : vector<1x32xf32> to vector<32x32xf32>
    %295 = arith.addf %291, %294 : vector<32x32xf32>
    %c1_187 = arith.constant 1 : index
    %c1_188 = arith.constant 1 : index
    %c0_189 = arith.constant 0 : index
    %c0_190 = arith.constant 0 : index
    %296 = vector.load %arg9[%c1_187, %c1_188, %c0_189, %c0_190] : memref<2x2x64x32xbf16, #tpu.memory_space<vmem>>, vector<1x1x64x32xbf16>
    %297 = vector.shape_cast %296 : vector<1x1x64x32xbf16> to vector<64x32xbf16>
    %cst_191 = arith.constant dense<0.000000e+00> : vector<32x32xf32>
    %298 = tpu.matmul %233, %297, %cst_191 {dimension_numbers = #tpu.dot_dimension_numbers<[1], [0], [0], [1], [0, 0, 1, 1], [], []>} : vector<32x64xbf16>, vector<64x32xbf16>, vector<32x32xf32> -> vector<32x32xf32>
    %c1_192 = arith.constant 1 : index
    %c1_193 = arith.constant 1 : index
    %c0_194 = arith.constant 0 : index
    %c0_195 = arith.constant 0 : index
    %299 = vector.load %arg10[%c1_192, %c1_193, %c0_194, %c0_195] : memref<2x2x1x32xf32, #tpu.memory_space<vmem>>, vector<1x1x1x32xf32>
    %300 = vector.shape_cast %299 : vector<1x1x1x32xf32> to vector<1x32xf32>
    %301 = vector.broadcast %300 : vector<1x32xf32> to vector<32x32xf32>
    %302 = arith.addf %298, %301 : vector<32x32xf32>
    %303 = vector.shape_cast %288 : vector<32x32xf32> to vector<2x16x32xf32>
    %304 = arith.truncf %303 : vector<2x16x32xf32> to vector<2x16x32xbf16>
    %305 = vector.shape_cast %295 : vector<32x32xf32> to vector<2x16x32xf32>
    %306 = arith.truncf %305 : vector<2x16x32xf32> to vector<2x16x32xbf16>
    %307 = vector.shape_cast %302 : vector<32x32xf32> to vector<2x16x32xf32>
    %308 = arith.truncf %307 : vector<2x16x32xf32> to vector<2x16x32xbf16>
    "tpu.trace_start"() <{level = 10 : i32, message = "bqd,bkd->bqk"}> : () -> ()
    %cst_196 = arith.constant dense<0.000000e+00> : vector<2x16x16xf32>
    %309 = tpu.matmul %304, %306, %cst_196 {dimension_numbers = #tpu.dot_dimension_numbers<[2], [2], [1], [1], [0, 0, 0, 1, 1, 1], [0], [0]>} : vector<2x16x32xbf16>, vector<2x16x32xbf16>, vector<2x16x16xf32> -> vector<2x16x16xf32>
    "tpu.trace_stop"() : () -> ()
    %310 = arith.addf %309, %22 : vector<2x16x16xf32>
    %cst_197 = arith.constant dense<0xFF800000> : vector<2x16xf32>
    %311 = vector.multi_reduction <maximumf>, %310, %cst_197 [2] : vector<2x16x16xf32> to vector<2x16xf32>
    %312 = vector.shape_cast %311 : vector<2x16xf32> to vector<2x16x1xf32>
    %313 = vector.broadcast %312 : vector<2x16x1xf32> to vector<2x16x16xf32>
    %314 = arith.subf %310, %313 : vector<2x16x16xf32>
    %315 = math.exp %314 : vector<2x16x16xf32>
    %cst_198 = arith.constant dense<0.000000e+00> : vector<2x16xf32>
    %316 = vector.multi_reduction <add>, %315, %cst_198 [2] : vector<2x16x16xf32> to vector<2x16xf32>
    %317 = vector.shape_cast %316 : vector<2x16xf32> to vector<2x16x1xf32>
    %318 = tpu.reciprocal %317 {approx = true} : vector<2x16x1xf32> -> vector<2x16x1xf32>
    %319 = vector.broadcast %318 : vector<2x16x1xf32> to vector<2x16x16xf32>
    %320 = arith.mulf %315, %319 : vector<2x16x16xf32>
    %321 = arith.truncf %320 : vector<2x16x16xf32> to vector<2x16x16xbf16>
    "tpu.trace_start"() <{level = 10 : i32, message = "bqk,bkd->bqd"}> : () -> ()
    %cst_199 = arith.constant dense<0.000000e+00> : vector<2x16x32xf32>
    %322 = tpu.matmul %321, %308, %cst_199 {dimension_numbers = #tpu.dot_dimension_numbers<[2], [1], [1], [2], [0, 0, 0, 1, 1, 2], [0], [0]>} : vector<2x16x16xbf16>, vector<2x16x32xbf16>, vector<2x16x32xf32> -> vector<2x16x32xf32>
    "tpu.trace_stop"() : () -> ()
    %323 = vector.shape_cast %322 : vector<2x16x32xf32> to vector<32x32xf32>
    %324 = arith.truncf %323 : vector<32x32xf32> to vector<32x32xbf16>
    %c1_200 = arith.constant 1 : index
    %c1_201 = arith.constant 1 : index
    %c0_202 = arith.constant 0 : index
    %c0_203 = arith.constant 0 : index
    %325 = vector.load %arg11[%c1_200, %c1_201, %c0_202, %c0_203] : memref<2x2x32x64xbf16, #tpu.memory_space<vmem>>, vector<1x1x32x64xbf16>
    %326 = vector.shape_cast %325 : vector<1x1x32x64xbf16> to vector<32x64xbf16>
    %cst_204 = arith.constant dense<0.000000e+00> : vector<32x64xf32>
    %327 = tpu.matmul %324, %326, %cst_204 {dimension_numbers = #tpu.dot_dimension_numbers<[1], [0], [0], [1], [0, 0, 1, 1], [], []>} : vector<32x32xbf16>, vector<32x64xbf16>, vector<32x64xf32> -> vector<32x64xf32>
    %328 = arith.addf %281, %327 : vector<32x64xf32>
    %329 = arith.addf %206, %328 : vector<32x64xf32>
    %c1_205 = arith.constant 1 : index
    %c0_206 = arith.constant 0 : index
    %c0_207 = arith.constant 0 : index
    %330 = vector.load %arg12[%c1_205, %c0_206, %c0_207] : memref<2x1x64xf32, #tpu.memory_space<vmem>>, vector<1x1x64xf32>
    %331 = vector.shape_cast %330 : vector<1x1x64xf32> to vector<1x64xf32>
    %332 = vector.broadcast %331 : vector<1x64xf32> to vector<32x64xf32>
    %333 = arith.addf %329, %332 : vector<32x64xf32>
    %c1_208 = arith.constant 1 : index
    %c0_209 = arith.constant 0 : index
    %c0_210 = arith.constant 0 : index
    %334 = vector.load %arg13[%c1_208, %c0_209, %c0_210] : memref<2x1x64xf32, #tpu.memory_space<vmem>>, vector<1x1x64xf32>
    %335 = vector.shape_cast %334 : vector<1x1x64xf32> to vector<1x64xf32>
    %c1_211 = arith.constant 1 : index
    %c0_212 = arith.constant 0 : index
    %c0_213 = arith.constant 0 : index
    %336 = vector.load %arg14[%c1_211, %c0_212, %c0_213] : memref<2x1x64xf32, #tpu.memory_space<vmem>>, vector<1x1x64xf32>
    %337 = vector.shape_cast %336 : vector<1x1x64xf32> to vector<1x64xf32>
    %cst_214 = arith.constant dense<0.000000e+00> : vector<32xf32>
    %338 = vector.multi_reduction <add>, %333, %cst_214 [1] : vector<32x64xf32> to vector<32xf32>
    %339 = vector.shape_cast %338 : vector<32xf32> to vector<32x1xf32>
    %cst_215 = arith.constant 6.400000e+01 : f32
    %340 = vector.broadcast %cst_215 : f32 to vector<32x1xf32>
    %341 = arith.divf %339, %340 : vector<32x1xf32>
    %342 = vector.broadcast %341 : vector<32x1xf32> to vector<32x64xf32>
    %343 = arith.subf %333, %342 : vector<32x64xf32>
    %344 = arith.mulf %343, %343 : vector<32x64xf32>
    %cst_216 = arith.constant dense<0.000000e+00> : vector<32xf32>
    %345 = vector.multi_reduction <add>, %344, %cst_216 [1] : vector<32x64xf32> to vector<32xf32>
    %346 = vector.shape_cast %345 : vector<32xf32> to vector<32x1xf32>
    %cst_217 = arith.constant 6.400000e+01 : f32
    %347 = vector.broadcast %cst_217 : f32 to vector<32x1xf32>
    %348 = arith.divf %346, %347 : vector<32x1xf32>
    %349 = vector.broadcast %341 : vector<32x1xf32> to vector<32x64xf32>
    %350 = arith.subf %333, %349 : vector<32x64xf32>
    %cst_218 = arith.constant 9.99999974E-6 : f32
    %351 = vector.broadcast %cst_218 : f32 to vector<32x1xf32>
    %352 = arith.addf %348, %351 : vector<32x1xf32>
    %353 = math.rsqrt %352 : vector<32x1xf32>
    %354 = vector.broadcast %353 : vector<32x1xf32> to vector<32x64xf32>
    %355 = arith.mulf %350, %354 : vector<32x64xf32>
    %356 = vector.broadcast %335 : vector<1x64xf32> to vector<32x64xf32>
    %357 = arith.mulf %355, %356 : vector<32x64xf32>
    %358 = vector.broadcast %337 : vector<1x64xf32> to vector<32x64xf32>
    %359 = arith.addf %357, %358 : vector<32x64xf32>
    %360 = arith.truncf %359 : vector<32x64xf32> to vector<32x64xbf16>
    %c1_219 = arith.constant 1 : index
    %c0_220 = arith.constant 0 : index
    %c0_221 = arith.constant 0 : index
    %361 = vector.load %arg15[%c1_219, %c0_220, %c0_221] : memref<2x64x256xbf16, #tpu.memory_space<vmem>>, vector<1x64x256xbf16>
    %362 = vector.shape_cast %361 : vector<1x64x256xbf16> to vector<64x256xbf16>
    %cst_222 = arith.constant dense<0.000000e+00> : vector<32x256xf32>
    %363 = tpu.matmul %360, %362, %cst_222 {dimension_numbers = #tpu.dot_dimension_numbers<[1], [0], [0], [1], [0, 0, 1, 1], [], []>} : vector<32x64xbf16>, vector<64x256xbf16>, vector<32x256xf32> -> vector<32x256xf32>
    %c1_223 = arith.constant 1 : index
    %c0_224 = arith.constant 0 : index
    %c0_225 = arith.constant 0 : index
    %364 = vector.load %arg16[%c1_223, %c0_224, %c0_225] : memref<2x1x256xf32, #tpu.memory_space<vmem>>, vector<1x1x256xf32>
    %365 = vector.shape_cast %364 : vector<1x1x256xf32> to vector<1x256xf32>
    %366 = vector.broadcast %365 : vector<1x256xf32> to vector<32x256xf32>
    %367 = arith.addf %363, %366 : vector<32x256xf32>
    %368 = arith.mulf %367, %367 : vector<32x256xf32>
    %369 = arith.mulf %367, %368 : vector<32x256xf32>
    %cst_226 = arith.constant 4.471500e-02 : f32
    %370 = vector.broadcast %cst_226 : f32 to vector<32x256xf32>
    %371 = arith.mulf %370, %369 : vector<32x256xf32>
    %372 = arith.addf %367, %371 : vector<32x256xf32>
    %cst_227 = arith.constant 0.797884583 : f32
    %373 = vector.broadcast %cst_227 : f32 to vector<32x256xf32>
    %374 = arith.mulf %373, %372 : vector<32x256xf32>
    %375 = math.tanh %374 : vector<32x256xf32>
    %cst_228 = arith.constant 1.000000e+00 : f32
    %376 = vector.broadcast %cst_228 : f32 to vector<32x256xf32>
    %377 = arith.addf %376, %375 : vector<32x256xf32>
    %cst_229 = arith.constant 5.000000e-01 : f32
    %378 = vector.broadcast %cst_229 : f32 to vector<32x256xf32>
    %379 = arith.mulf %378, %377 : vector<32x256xf32>
    %380 = arith.mulf %367, %379 : vector<32x256xf32>
    %381 = arith.truncf %380 : vector<32x256xf32> to vector<32x256xbf16>
    %c1_230 = arith.constant 1 : index
    %c0_231 = arith.constant 0 : index
    %c0_232 = arith.constant 0 : index
    %382 = vector.load %arg17[%c1_230, %c0_231, %c0_232] : memref<2x256x64xbf16, #tpu.memory_space<vmem>>, vector<1x256x64xbf16>
    %383 = vector.shape_cast %382 : vector<1x256x64xbf16> to vector<256x64xbf16>
    %cst_233 = arith.constant dense<0.000000e+00> : vector<32x64xf32>
    %384 = tpu.matmul %381, %383, %cst_233 {dimension_numbers = #tpu.dot_dimension_numbers<[1], [0], [0], [1], [0, 0, 1, 1], [], []>} : vector<32x256xbf16>, vector<256x64xbf16>, vector<32x64xf32> -> vector<32x64xf32>
    %c1_234 = arith.constant 1 : index
    %c0_235 = arith.constant 0 : index
    %c0_236 = arith.constant 0 : index
    %385 = vector.load %arg18[%c1_234, %c0_235, %c0_236] : memref<2x1x64xf32, #tpu.memory_space<vmem>>, vector<1x1x64xf32>
    %386 = vector.shape_cast %385 : vector<1x1x64xf32> to vector<1x64xf32>
    %387 = vector.broadcast %386 : vector<1x64xf32> to vector<32x64xf32>
    %388 = arith.addf %384, %387 : vector<32x64xf32>
    %389 = arith.addf %333, %388 : vector<32x64xf32>
    %390 = vector.shape_cast %389 : vector<32x64xf32> to vector<2x16x64xf32>
    %391 = vector.extract_strided_slice %390 {offsets = [0, 12, 0], sizes = [2, 1, 64], strides = [1, 1, 1]} : vector<2x16x64xf32> to vector<2x1x64xf32>
    %392 = vector.shape_cast %391 : vector<2x1x64xf32> to vector<2x64xf32>
    %c0_237 = arith.constant 0 : index
    %c0_238 = arith.constant 0 : index
    %393 = vector.load %arg19[%c0_237, %c0_238] : memref<1x64xf32, #tpu.memory_space<vmem>>, vector<1x64xf32>
    %c0_239 = arith.constant 0 : index
    %c0_240 = arith.constant 0 : index
    %394 = vector.load %arg20[%c0_239, %c0_240] : memref<1x64xf32, #tpu.memory_space<vmem>>, vector<1x64xf32>
    %cst_241 = arith.constant dense<0.000000e+00> : vector<2xf32>
    %395 = vector.multi_reduction <add>, %392, %cst_241 [1] : vector<2x64xf32> to vector<2xf32>
    %396 = vector.shape_cast %395 : vector<2xf32> to vector<2x1xf32>
    %cst_242 = arith.constant 6.400000e+01 : f32
    %397 = vector.broadcast %cst_242 : f32 to vector<2x1xf32>
    %398 = arith.divf %396, %397 : vector<2x1xf32>
    %399 = vector.broadcast %398 : vector<2x1xf32> to vector<2x64xf32>
    %400 = arith.subf %392, %399 : vector<2x64xf32>
    %401 = arith.mulf %400, %400 : vector<2x64xf32>
    %cst_243 = arith.constant dense<0.000000e+00> : vector<2xf32>
    %402 = vector.multi_reduction <add>, %401, %cst_243 [1] : vector<2x64xf32> to vector<2xf32>
    %403 = vector.shape_cast %402 : vector<2xf32> to vector<2x1xf32>
    %cst_244 = arith.constant 6.400000e+01 : f32
    %404 = vector.broadcast %cst_244 : f32 to vector<2x1xf32>
    %405 = arith.divf %403, %404 : vector<2x1xf32>
    %406 = vector.broadcast %398 : vector<2x1xf32> to vector<2x64xf32>
    %407 = arith.subf %392, %406 : vector<2x64xf32>
    %cst_245 = arith.constant 9.99999974E-6 : f32
    %408 = vector.broadcast %cst_245 : f32 to vector<2x1xf32>
    %409 = arith.addf %405, %408 : vector<2x1xf32>
    %410 = math.rsqrt %409 : vector<2x1xf32>
    %411 = vector.broadcast %410 : vector<2x1xf32> to vector<2x64xf32>
    %412 = arith.mulf %407, %411 : vector<2x64xf32>
    %413 = vector.broadcast %393 : vector<1x64xf32> to vector<2x64xf32>
    %414 = arith.mulf %412, %413 : vector<2x64xf32>
    %415 = vector.broadcast %394 : vector<1x64xf32> to vector<2x64xf32>
    %416 = arith.addf %414, %415 : vector<2x64xf32>
    %417 = arith.truncf %416 : vector<2x64xf32> to vector<2x64xbf16>
    %c0_246 = arith.constant 0 : index
    %c0_247 = arith.constant 0 : index
    %418 = vector.load %arg21[%c0_246, %c0_247] : memref<64x128xbf16, #tpu.memory_space<vmem>>, vector<64x128xbf16>
    %cst_248 = arith.constant dense<0.000000e+00> : vector<2x128xf32>
    %419 = tpu.matmul %417, %418, %cst_248 {dimension_numbers = #tpu.dot_dimension_numbers<[1], [0], [0], [1], [0, 0, 1, 1], [], []>} : vector<2x64xbf16>, vector<64x128xbf16>, vector<2x128xf32> -> vector<2x128xf32>
    %c0_249 = arith.constant 0 : index
    %c0_250 = arith.constant 0 : index
    %420 = vector.load %arg22[%c0_249, %c0_250] : memref<1x128xf32, #tpu.memory_space<vmem>>, vector<1x128xf32>
    %421 = vector.broadcast %420 : vector<1x128xf32> to vector<2x128xf32>
    %422 = arith.addf %419, %421 : vector<2x128xf32>
    %c0_251 = arith.constant 0 : index
    %c0_252 = arith.constant 0 : index
    %423 = vector.load %arg23[%c0_251, %c0_252] : memref<2x128xf32, #tpu.memory_space<vmem>>, vector<2x128xf32>
    tpu.vector_store %arg23[%c0_251, %c0_252], %422 {strides = array<i32>} : memref<2x128xf32, #tpu.memory_space<vmem>>, vector<2x128xf32>,
    return
  }
  func.func @transform_0(%arg0: i32) -> (i32, i32, i32) {
    %c0_i32 = arith.constant 0 : i32
    %c0_i32_0 = arith.constant 0 : i32
    %c0_i32_1 = arith.constant 0 : i32
    %c0_i32_2 = arith.constant 0 : i32
    return %c0_i32, %c0_i32_0, %c0_i32_1 : i32, i32, i32
  }
  func.func @transform_1(%arg0: i32) -> (i32, i32) {
    %c0_i32 = arith.constant 0 : i32
    %c0_i32_0 = arith.constant 0 : i32
    %c0_i32_1 = arith.constant 0 : i32
    return %c0_i32, %c0_i32_0 : i32, i32
  }
  func.func @transform_2(%arg0: i32) -> (i32, i32, i32) {
    %c0_i32 = arith.constant 0 : i32
    %c0_i32_0 = arith.constant 0 : i32
    %c0_i32_1 = arith.constant 0 : i32
    %c0_i32_2 = arith.constant 0 : i32
    return %c0_i32, %c0_i32_0, %c0_i32_1 : i32, i32, i32
  }
  func.func @transform_3(%arg0: i32) -> (i32, i32, i32) {
    %c0_i32 = arith.constant 0 : i32
    %c0_i32_0 = arith.constant 0 : i32
    %c0_i32_1 = arith.constant 0 : i32
    %c0_i32_2 = arith.constant 0 : i32
    return %c0_i32, %c0_i32_0, %c0_i32_1 : i32, i32, i32
  }
  func.func @transform_4(%arg0: i32) -> (i32, i32, i32, i32) {
    %c0_i32 = arith.constant 0 : i32
    %c0_i32_0 = arith.constant 0 : i32
    %c0_i32_1 = arith.constant 0 : i32
    %c0_i32_2 = arith.constant 0 : i32
    %c0_i32_3 = arith.constant 0 : i32
    return %c0_i32, %c0_i32_0, %c0_i32_1, %c0_i32_2 : i32, i32, i32, i32
  }
  func.func @transform_5(%arg0: i32) -> (i32, i32, i32, i32) {
    %c0_i32 = arith.constant 0 : i32
    %c0_i32_0 = arith.constant 0 : i32
    %c0_i32_1 = arith.constant 0 : i32
    %c0_i32_2 = arith.constant 0 : i32
    %c0_i32_3 = arith.constant 0 : i32
    return %c0_i32, %c0_i32_0, %c0_i32_1, %c0_i32_2 : i32, i32, i32, i32
  }
  func.func @transform_6(%arg0: i32) -> (i32, i32, i32, i32) {
    %c0_i32 = arith.constant 0 : i32
    %c0_i32_0 = arith.constant 0 : i32
    %c0_i32_1 = arith.constant 0 : i32
    %c0_i32_2 = arith.constant 0 : i32
    %c0_i32_3 = arith.constant 0 : i32
    return %c0_i32, %c0_i32_0, %c0_i32_1, %c0_i32_2 : i32, i32, i32, i32
  }
  func.func @transform_7(%arg0: i32) -> (i32, i32, i32, i32) {
    %c0_i32 = arith.constant 0 : i32
    %c0_i32_0 = arith.constant 0 : i32
    %c0_i32_1 = arith.constant 0 : i32
    %c0_i32_2 = arith.constant 0 : i32
    %c0_i32_3 = arith.constant 0 : i32
    return %c0_i32, %c0_i32_0, %c0_i32_1, %c0_i32_2 : i32, i32, i32, i32
  }
  func.func @transform_8(%arg0: i32) -> (i32, i32, i32, i32) {
    %c0_i32 = arith.constant 0 : i32
    %c0_i32_0 = arith.constant 0 : i32
    %c0_i32_1 = arith.constant 0 : i32
    %c0_i32_2 = arith.constant 0 : i32
    %c0_i32_3 = arith.constant 0 : i32
    return %c0_i32, %c0_i32_0, %c0_i32_1, %c0_i32_2 : i32, i32, i32, i32
  }
  func.func @transform_9(%arg0: i32) -> (i32, i32, i32, i32) {
    %c0_i32 = arith.constant 0 : i32
    %c0_i32_0 = arith.constant 0 : i32
    %c0_i32_1 = arith.constant 0 : i32
    %c0_i32_2 = arith.constant 0 : i32
    %c0_i32_3 = arith.constant 0 : i32
    return %c0_i32, %c0_i32_0, %c0_i32_1, %c0_i32_2 : i32, i32, i32, i32
  }
  func.func @transform_10(%arg0: i32) -> (i32, i32, i32, i32) {
    %c0_i32 = arith.constant 0 : i32
    %c0_i32_0 = arith.constant 0 : i32
    %c0_i32_1 = arith.constant 0 : i32
    %c0_i32_2 = arith.constant 0 : i32
    %c0_i32_3 = arith.constant 0 : i32
    return %c0_i32, %c0_i32_0, %c0_i32_1, %c0_i32_2 : i32, i32, i32, i32
  }
  func.func @transform_11(%arg0: i32) -> (i32, i32, i32) {
    %c0_i32 = arith.constant 0 : i32
    %c0_i32_0 = arith.constant 0 : i32
    %c0_i32_1 = arith.constant 0 : i32
    %c0_i32_2 = arith.constant 0 : i32
    return %c0_i32, %c0_i32_0, %c0_i32_1 : i32, i32, i32
  }
  func.func @transform_12(%arg0: i32) -> (i32, i32, i32) {
    %c0_i32 = arith.constant 0 : i32
    %c0_i32_0 = arith.constant 0 : i32
    %c0_i32_1 = arith.constant 0 : i32
    %c0_i32_2 = arith.constant 0 : i32
    return %c0_i32, %c0_i32_0, %c0_i32_1 : i32, i32, i32
  }
  func.func @transform_13(%arg0: i32) -> (i32, i32, i32) {
    %c0_i32 = arith.constant 0 : i32
    %c0_i32_0 = arith.constant 0 : i32
    %c0_i32_1 = arith.constant 0 : i32
    %c0_i32_2 = arith.constant 0 : i32
    return %c0_i32, %c0_i32_0, %c0_i32_1 : i32, i32, i32
  }
  func.func @transform_14(%arg0: i32) -> (i32, i32, i32) {
    %c0_i32 = arith.constant 0 : i32
    %c0_i32_0 = arith.constant 0 : i32
    %c0_i32_1 = arith.constant 0 : i32
    %c0_i32_2 = arith.constant 0 : i32
    return %c0_i32, %c0_i32_0, %c0_i32_1 : i32, i32, i32
  }
  func.func @transform_15(%arg0: i32) -> (i32, i32, i32) {
    %c0_i32 = arith.constant 0 : i32
    %c0_i32_0 = arith.constant 0 : i32
    %c0_i32_1 = arith.constant 0 : i32
    %c0_i32_2 = arith.constant 0 : i32
    return %c0_i32, %c0_i32_0, %c0_i32_1 : i32, i32, i32
  }
  func.func @transform_16(%arg0: i32) -> (i32, i32, i32) {
    %c0_i32 = arith.constant 0 : i32
    %c0_i32_0 = arith.constant 0 : i32
    %c0_i32_1 = arith.constant 0 : i32
    %c0_i32_2 = arith.constant 0 : i32
    return %c0_i32, %c0_i32_0, %c0_i32_1 : i32, i32, i32
  }
  func.func @transform_17(%arg0: i32) -> (i32, i32, i32) {
    %c0_i32 = arith.constant 0 : i32
    %c0_i32_0 = arith.constant 0 : i32
    %c0_i32_1 = arith.constant 0 : i32
    %c0_i32_2 = arith.constant 0 : i32
    return %c0_i32, %c0_i32_0, %c0_i32_1 : i32, i32, i32
  }
  func.func @transform_18(%arg0: i32) -> (i32, i32) {
    %c0_i32 = arith.constant 0 : i32
    %c0_i32_0 = arith.constant 0 : i32
    %c0_i32_1 = arith.constant 0 : i32
    return %c0_i32, %c0_i32_0 : i32, i32
  }
  func.func @transform_19(%arg0: i32) -> (i32, i32) {
    %c0_i32 = arith.constant 0 : i32
    %c0_i32_0 = arith.constant 0 : i32
    %c0_i32_1 = arith.constant 0 : i32
    return %c0_i32, %c0_i32_0 : i32, i32
  }
  func.func @transform_20(%arg0: i32) -> (i32, i32) {
    %c0_i32 = arith.constant 0 : i32
    %c0_i32_0 = arith.constant 0 : i32
    %c0_i32_1 = arith.constant 0 : i32
    return %c0_i32, %c0_i32_0 : i32, i32
  }
  func.func @transform_21(%arg0: i32) -> (i32, i32) {
    %c0_i32 = arith.constant 0 : i32
    %c0_i32_0 = arith.constant 0 : i32
    %c0_i32_1 = arith.constant 0 : i32
    return %c0_i32, %c0_i32_0 : i32, i32
  }
  func.func @transform_22(%arg0: i32) -> (i32, i32) {
    %c0_i32 = arith.constant 0 : i32
    %c0_i32_0 = arith.constant 0 : i32
    %c0_i32_1 = arith.constant 0 : i32
    return %c0_i32, %c0_i32_0 : i32, i32
  }
}

</mosaic_0001>

<bundles_post_ra>
// kernel: tpu_custom_call.1
= control target key start
LH: loop header
LB: loop body
LE: loop exit
PB: predicated region body
PF: predicated region fallthrough
CT: control target
= control target key end

     0   :  { %s5836_s0 = inlined_call_operand.vmem [shape: f32[2,16,64], index: 0, kind: input, shape index: {}]   ;;  %s5837_s1 = inlined_call_operand.vmem [shape: f32[2,16], index: 1, kind: input, shape index: {}]   ;;  %s5838_s2 = inlined_call_operand.vmem [shape: f32[2,1,64], index: 2, kind: input, shape index: {}]   ;;  %s5839_s3 = inlined_call_operand.vmem [shape: f32[2,1,64], index: 3, kind: input, shape index: {}]   ;;  %s5840_s4 = inlined_call_operand.vmem [shape: bf16[2,2,64,32], index: 4, kind: input, shape index: {}]   ;;  %s5841_s5 = inlined_call_operand.vmem [shape: f32[2,2,1,32], index: 5, kind: input, shape index: {}]   ;;  %s5842_s6 = inlined_call_operand.vmem [shape: bf16[2,2,64,32], index: 6, kind: input, shape index: {}]   ;;  %s5843_s7 = inlined_call_operand.vmem [shape: f32[2,2,1,32], index: 7, kind: input, shape index: {}]   ;;  %s5844_s8 = inlined_call_operand.vmem [shape: bf16[2,2,64,32], index: 8, kind: input, shape index: {}]   ;;  %s5845_s9 = inlined_call_operand.vmem [shape: f32[2,2,1,32], index: 9, kind: input, shape index: {}]   ;;  %s5846_s10 = inlined_call_operand.vmem [shape: bf16[2,2,32,64], index: 10, kind: input, shape index: {}]   ;;  %s5847_s11 = inlined_call_operand.vmem [shape: f32[2,1,64], index: 11, kind: input, shape index: {}]   ;;  %s5848_s12 = inlined_call_operand.vmem [shape: f32[2,1,64], index: 12, kind: input, shape index: {}]   ;;  %s5849_s13 = inlined_call_operand.vmem [shape: f32[2,1,64], index: 13, kind: input, shape index: {}]   ;;  %s5850_s14 = inlined_call_operand.vmem [shape: bf16[2,64,256], index: 14, kind: input, shape index: {}]   ;;  %s5851_s15 = inlined_call_operand.vmem [shape: f32[2,1,256], index: 15, kind: input, shape index: {}]   ;;  %s5852_s16 = inlined_call_operand.vmem [shape: bf16[2,256,64], index: 16, kind: input, shape index: {}]   ;;  %s5853_s17 = inlined_call_operand.vmem [shape: f32[2,1,64], index: 17, kind: input, shape index: {}]   ;;  %s5854_s18 = inlined_call_operand.vmem [shape: f32[1,64], index: 18, kind: input, shape index: {}]   ;;  %s5855_s19 = inlined_call_operand.vmem [shape: f32[1,64], index: 19, kind: input, shape index: {}]   ;;  %s5856_s20 = inlined_call_operand.vmem [shape: bf16[64,128], index: 20, kind: input, shape index: {}]   ;;  %s5857_s21 = inlined_call_operand.vmem [shape: f32[1,128], index: 21, kind: input, shape index: {}]   ;;  %s5858_s22 = inlined_call_operand.hbm [shape: f32[2,128], index: 22, kind: output, shape index: {}]  }
   0x1   :  { %5865 = sst [smem:[#allocation5_spill]] %s5836_s0 }
   0x2   :  { %5866 = sst [smem:[#allocation6_spill]] %s5837_s1 }
   0x3   :  { %5867 = sst [smem:[#allocation7_spill]] %s5838_s2 }
   0x4   :  { %5868 = sst [smem:[#allocation8_spill]] %s5839_s3 }
   0x5   :  { %5869 = sst [smem:[#allocation9_spill]] %s5840_s4 }
   0x6   :  { %5870 = sst [smem:[#allocation10_spill]] %s5841_s5 }
   0x7   :  { %5871 = sst [smem:[#allocation11_spill]] %s5842_s6 }
   0x8   :  { %s5872_s29 = sld [smem:[#allocation5_spill]]  ;;  %vm146_vm0 = vcmask 523264  }
   0xe   :  { %v73_v0 = vld [vmem:[%s5872_s29] sm:$0xff]  ;;  %v75_v1 = vld [vmem:[%s5872_s29 + $0x10] sm:$0xff]  ;;  %v74_v2 = vld [vmem:[%s5872_s29 + $0x8] sm:$0xff] }
   0xf   :  { %v147_v3 = vsel %vm146_vm0, %v73_v0, 0.0  ;;  %v153_v4 = vsel %vm146_vm0, %v75_v1, 0.0  ;;  %v150_v5 = vsel %vm146_vm0, %v74_v2, 0.0  ;;  %v76_v6 = vld [vmem:[%s5872_s29 + $0x18] sm:$0xff] }
  0x10   :  { %148 = vadd.xlane.f32.xlu0 %v147_v3  ;;  %154 = vadd.xlane.f32.xlu1 %v153_v4  ;;  %v156_v7 = vsel %vm146_vm0, %v76_v6, 0.0 }
  0x14   :  { %151 = vadd.xlane.f32.xlu0 %v150_v5  ;;  %157 = vadd.xlane.f32.xlu1 %v156_v7 }
  0x15   :  { %27 = vsyncpa [#allocation3], 0  ;;  %s5873_s25 = sld [smem:[#allocation9_spill]]  ;;  %v4544_v36 = vld [vmem:[%s5844_s8 + $0x18] sm:$0xff]   ;;  %v4545_v5 = vld [vmem:[%s5844_s8 + $0x10] sm:$0xff]   ;;  %vm4809_vm1 = vmmov 0  }
  0x16   :  { %s5874_s27 = sld [smem:[#allocation11_spill]]  ;;  %v4547_v7 = vld [vmem:[%s5844_s8] sm:$0xff]   ;;  %vm498_vm2 = vcmask 261120   ;;  %vm593_vm11 = vcmask 130048   ;;  %vm3575_vm12 = vcmask 1045509   ;;  %vm3578_vm13 = vcmask 521220  }
  0x17   :  { %s5875_s0 = sld [smem:[#allocation7_spill]]  ;;  %vm3647_vm14 = vcmask 1041409  }
  0x18   :  { %s5876_s5 = sld [smem:[#allocation8_spill]] }
  0x19   :  { %s5877_s24 = sld [smem:[#allocation10_spill]] }
  0x1a   :  { %s5878_s28 = sld [smem:[#allocation6_spill]] }
  0x1b   :  { %v4536_v28 = vld [vmem:[%s5873_s25 + $0x18] sm:$0xff]   ;;  %v4538_v30 = vld [vmem:[%s5873_s25 + $0x10] sm:$0xff]   ;;  %v4540_v32 = vld [vmem:[%s5873_s25 + $0x8] sm:$0xff]  }
  0x1c   :  { %v4537_v29 = vld [vmem:[%s5874_s27 + $0x18] sm:$0xff]   ;;  %4246 = vmatprep.subr.bf16.mxu0 %v4536_v28  ;;  %v4539_v31 = vld [vmem:[%s5874_s27 + $0x10] sm:$0xff]   ;;  %v4541_v33 = vld [vmem:[%s5874_s27 + $0x8] sm:$0xff]  }
  0x1d   :  { %4247 = vmatpush3.bf16.msra.mxu0 %v4536_v28  ;;  %4258 = vmatprep.subr.bf16.mxu1 %v4537_v29  ;;  %v4542_v34 = vld [vmem:[%s5873_s25] sm:$0xff]  }
  0x1e   :  { %4259 = vmatpush3.bf16.msra.mxu1 %v4537_v29  ;;  %4248 = vmatprep.subr.bf16.mxu0 %v4538_v30  ;;  %v4543_v35 = vld [vmem:[%s5874_s27] sm:$0xff]  }
  0x1f   :  { %4260 = vmatprep.subr.bf16.mxu1 %v4539_v31  ;;  %v3737_v51 = vld [vmem:[%s5875_s0] ss:$0 sm:$0xff] }
  0x20   :  { %v3738_v57 = vld [vmem:[%s5876_s5] ss:$0 sm:$0xff] }
  0x21   :  { %4249 = vmatpush3.bf16.msra.mxu0 %v4538_v30 }
  0x22   :  { %4261 = vmatpush3.bf16.msra.mxu1 %v4539_v31  ;;  %4250 = vmatprep.subr.bf16.mxu0 %v4540_v32 }
  0x23   :  { %4262 = vmatprep.subr.bf16.mxu1 %v4541_v33 }
  0x25   :  { %4251 = vmatpush3.bf16.msra.mxu0 %v4540_v32 }
  0x26   :  { %4263 = vmatpush3.bf16.msra.mxu1 %v4541_v33  ;;  %4252 = vmatprep.subr.bf16.mxu0 %v4542_v34 }
  0x27   :  { %4264 = vmatprep.subr.bf16.mxu1 %v4543_v35 }
  0x29   :  { %4253 = vmatpush3.bf16.msra.mxu0 %v4542_v34  ;;  %v3753_v34 = vld [vmem:[%s5845_s9] ss:$0 sm:$0xff] }
  0x2a   :  { %4265 = vmatpush3.bf16.msra.mxu1 %v4543_v35  ;;  %4270 = vmatprep.subr.bf16.mxu0 %v4544_v36 }
  0x99   :  { %v149_v8 = vpop.xlane.xlu0 %148  ;;  %v155_v9 = vpop.xlane.xlu1 %154 }
  0x9a   :  { %v160_v10 = vmul.f32 0.015625, %v149_v8  ;;  %v162_v11 = vmul.f32 0.015625, %v155_v9  ;;  %v4808_v8 = vmov 0.0  }
  0x9b   :  { %4282 = vmatprep.subr.bf16.mxu1 %v4808_v8 }
  0x9c   :  { %v4945_v12 = vsub.f32 %v73_v0, %v160_v10  ;;  %v4947_v13 = vsub.f32 %v75_v1, %v162_v11 }
  0x9d   :  { %v152_v14 = vpop.xlane.xlu0 %151  ;;  %v158_v15 = vpop.xlane.xlu1 %157 }
  0x9e   :  { %v161_v16 = vmul.f32 0.015625, %v152_v14  ;;  %v163_v17 = vmul.f32 0.015625, %v158_v15  ;;  %v168_v18 = vmul.f32 %v4945_v12, %v4945_v12  ;;  %v170_v19 = vmul.f32 %v4947_v13, %v4947_v13  ;;  %v3746_v14 = vld [vmem:[%s5843_s7] ss:$0 sm:$0xff] }
  0xa0   :  { %v165_v20 = vsub.f32 %v74_v2, %v161_v16  ;;  %v4953_v21 = vsub.f32 %v76_v6, %v163_v17  ;;  %v172_v22 = vsel %vm146_vm0, %v168_v18, 0.0  ;;  %v178_v23 = vsel %vm146_vm0, %v170_v19, 0.0  ;;  %v4546_v6 = vld [vmem:[%s5844_s8 + $0x8] sm:$0xff]  }
  0xa1   :  { %173 = vadd.xlane.f32.xlu0 %v172_v22 }
  0xa2   :  { %v169_v24 = vmul.f32 %v165_v20, %v165_v20  ;;  %v171_v25 = vmul.f32 %v4953_v21, %v4953_v21 }
  0xa4   :  { %v175_v26 = vsel %vm146_vm0, %v169_v24, 0.0  ;;  %v181_v27 = vsel %vm146_vm0, %v171_v25, 0.0 }
  0xa5   :  { %179 = vadd.xlane.f32.xlu0 %v178_v23  ;;  %176 = vadd.xlane.f32.xlu1 %v175_v26  ;;  %v3739_v23 = vld [vmem:[%s5877_s24] ss:$0 sm:$0xff] }
  0xa9   :  { %182 = vadd.xlane.f32.xlu1 %v181_v27 }
 0x12a   :  { %v174_v37 = vpop.xlane.xlu0 %173 }
 0x12b   :  { %v184_v38 = vmul.f32 0.015625, %v174_v37 }
 0x12d   :  { %v188_v39 = vadd.f32 1e-05, %v184_v38 }
 0x12e   :  { %v177_v40 = vpop.xlane.xlu1 %176  ;;  %v180_v41 = vpop.xlane.xlu0 %179 }
 0x12f   :  { %4652 = vrsqrt.f32 %v188_v39  ;;  %v185_v42 = vmul.f32 0.015625, %v177_v40  ;;  %v186_v43 = vmul.f32 0.015625, %v180_v41 }
 0x131   :  { %v189_v44 = vadd.f32 1e-05, %v185_v42  ;;  %v190_v45 = vadd.f32 1e-05, %v186_v43 }
 0x132   :  { %v183_v46 = vpop.xlane.xlu1 %182 }
 0x133   :  { %4654 = vrsqrt.f32 %v189_v44  ;;  %v187_v47 = vmul.f32 0.015625, %v183_v46  ;;  %v78_v44 = vlaneseq }
 0x134   :  { %4656 = vrsqrt.f32 %v190_v45  ;;  %v4810_v45 = vmov 1966171168  }
 0x135   :  { %v191_v48 = vadd.f32 1e-05, %v187_v47  ;;  %v105_v46 = vunpack.c.l.s4 %v4810_v45  ;;  %v5047_v47 = vshrl.u32 %v78_v44, 7 }
 0x137   :  { %4658 = vrsqrt.f32 %v191_v48  ;;  %v106_v48 = vunpack.c.0.s8 %v105_v46 }
 0x13c   :  { %v4653_v49 = vpop.eup %4652 }
 0x13d   :  { %v196_v50 = vmul.f32 %v4653_v49, %v4945_v12  ;;  %v3736_v49 = vld.sshfl [vmem:[%s5878_s28] sm:$0x11 pattern:$0x75316420] }
 0x13f   :  { %v206_v54 = vmul.f32 %v3737_v51, %v196_v50  ;;  %v103_v50 = vcombine.high %v3736_v49, %v3736_v49 }
 0x140   :  { %v4655_v52 = vpop.eup %4654 }
 0x141   :  { %v4657_v53 = vpop.eup %4656  ;;  %v197_v55 = vmul.f32 %v4655_v52, %v165_v20  ;;  %v216_v62 = vadd.f32 %v3738_v57, %v206_v54  ;;  %v82_v52 = vand.u32 127, %v78_v44 }
 0x142   :  { %v198_v56 = vmul.f32 %v4657_v53, %v4947_v13 }
 0x143   :  { %v207_v58 = vmul.f32 %v3737_v51, %v197_v55  ;;  %v5054_v55 = vsub.s32 0, %v5047_v47  ;;  %vm83_vm3 = vcmp.le.s32.totalorder %v82_v52, %v5047_v47  ;;  %vm89_vm4 = vcmp.eq.s32.totalorder %v82_v52, %v5047_v47 }
 0x144   :  { %v4659_v59 = vpop.eup %4658  ;;  %v208_v60 = vmul.f32 %v3737_v51, %v198_v56  ;;  %v80_v56 = vadd.s32 8, %v5047_v47 }
 0x145   :  { %v199_v61 = vmul.f32 %v4659_v59, %v4953_v21  ;;  %v217_v63 = vadd.f32 %v3738_v57, %v207_v58  ;;  %v3732_v59 = vsel %vm83_vm3, 1.0, %v4808_v8 }
 0x146   :  { %v218_v2 = vadd.f32 %v3738_v57, %v208_v60  ;;  %vm84_vm5 = vcmp.le.s32.totalorder %v82_v52, %v80_v56  ;;  %vm90_vm6 = vcmp.eq.s32.totalorder %v82_v52, %v80_v56  ;;  %v4548_v52 = vld [vmem:[%s5874_s27 + $0x38] sm:$0xff]  }
 0x147   :  { %v209_v0 = vmul.f32 %v3737_v51, %v199_v61  ;;  %v4997_v1 = vpack.c.bf16 %v217_v63, %v216_v62  ;;  %v109_v51 = vsub.s32 %v106_v48, %v5047_v47  ;;  %v3734_v62 = vsel %vm89_vm4, 1.0, %v4808_v8 }
 0x148   :  { %v3733_v63 = vsel %vm84_vm5, 1.0, %v4808_v8 }
 0x149   :  { %4254 = vmatprep.mubr.msk.bf16.mxu0 %vm146_vm0, %v4997_v1  ;;  %4266 = vmatprep.mubr.msk.bf16.mxu1 %vm146_vm0, %v4997_v1  ;;  %v219_v3 = vadd.f32 %v3738_v57, %v209_v0  ;;  %v117_v53 = vrot.slane %v103_v50, %v109_v51  ;;  %v110_v54 = vrot.slane %v3736_v49, %v109_v51 }
 0x14b   :  { %v5003_v4 = vpack.c.bf16 %v219_v3, %v218_v2  ;;  %v125_v57 = vrot.slane %v117_v53, %v5054_v55  ;;  %v121_v58 = vrot.slane %v110_v54, %v5054_v55  ;;  %v4549_v53 = vld [vmem:[%s5873_s25 + $0x38] sm:$0xff]  }
 0x14d   :  { %4255 = vmatmul.mubr.msk.bf16.vlgmr.msra.gmra.mxu0 %vm146_vm0, %v5003_v4  ;;  %4267 = vmatmul.mubr.msk.bf16.vlgmr.msra.gmra.mxu1 %vm146_vm0, %v5003_v4  ;;  %v130_v60 = vmul.f32 %v3732_v59, %v125_v57  ;;  %v128_v61 = vmul.f32 %v3732_v59, %v121_v58  ;;  %v131_v2 = vmul.f32 %v3733_v63, %v125_v57 }
 0x14e   :  { %4271 = vmatpush3.bf16.msra.mxu0 %v4544_v36  ;;  %4278 = vmatprep.mubr.msk.bf16.mxu0 %vm146_vm0, %v4997_v1 }
 0x14f   :  { %4272 = vmatprep.subr.bf16.mxu0 %v4545_v5  ;;  %4284 = vmatprep.mubr.msk.bf16.mxu1 %vm4809_vm1, %v4808_v8  ;;  %v134_v0 = vmax.f32 %v130_v60, %v3734_v62 }
 0x151   :  { %vm138_vm7 = vcmp.gt.f32.partialorder %v134_v0, 0.0 }
 0x152   :  { %4273 = vmatpush3.bf16.msra.mxu0 %v4545_v5  ;;  %v132_v5 = vmax.f32 %v128_v61, %v3734_v62 }
 0x153   :  { %4274 = vmatprep.subr.bf16.mxu0 %v4546_v6 }
 0x154   :  { %vm136_vm8 = vcmp.gt.f32.partialorder %v132_v5, 0.0 }
 0x156   :  { %4275 = vmatpush3.bf16.msra.mxu0 %v4546_v6  ;;  %v129_v6 = vmul.f32 %v3733_v63, %v121_v58 }
 0x157   :  { %4276 = vmatprep.subr.bf16.mxu0 %v4547_v7 }
 0x15a   :  { %4277 = vmatpush3.bf16.msra.mxu0 %v4547_v7 }
 0x15b   :  { %4294 = vmatprep.subr.bf16.mxu0 %v4808_v8 }
 0x15d   :  { %4279 = vmatmul.mubr.msk.bf16.vlgmr.msra.gmra.mxu0 %vm146_vm0, %v5003_v4 }
 0x15e   :  { %4296 = vmatprep.mubr.msk.bf16.mxu0 %vm4809_vm1, %v4808_v8 }
 0x20d   :  { %v4256_v9 = vpop.f32.mrf.mxu0  ;;  %v4268_v10 = vpop.f32.mrf.mxu1 }
 0x20e   :  { %v398_v24 = vadd.f32 %v4268_v10, %v3746_v14  ;;  %v310_v37 = vadd.f32 %v4256_v9, %v3739_v23  ;;  %v3735_v9 = vsel %vm90_vm6, 1.0, %v4808_v8 }
 0x20f   :  { %v301_v11 = vpop.f32.mrf.mxu0  ;;  %v389_v12 = vpop.f32.mrf.mxu1  ;;  %v135_v10 = vmax.f32 %v131_v2, %v3735_v9  ;;  %v4550_v2 = vld [vmem:[%s5874_s27 + $0x30] sm:$0xff]  }
 0x210   :  { %v390_v17 = vadd.f32 %v3746_v14, %v389_v12  ;;  %v302_v26 = vadd.f32 %v3739_v23, %v301_v11  ;;  %v133_v12 = vmax.f32 %v129_v6, %v3735_v9  ;;  %v4551_v9 = vld [vmem:[%s5873_s25 + $0x30] sm:$0xff]  }
 0x211   :  { %v4269_v13 = vpop.f32.mrf.mxu1  ;;  %v4257_v15 = vpop.f32.mrf.mxu0  ;;  %vm139_vm9 = vcmp.gt.f32.partialorder %v135_v10, 0.0  ;;  %v4552_v10 = vld [vmem:[%s5874_s27 + $0x28] sm:$0xff]  }
 0x212   :  { %v401_v21 = vadd.f32 %v4269_v13, %v3746_v14  ;;  %v313_v33 = vadd.f32 %v4257_v15, %v3739_v23  ;;  %vm137_vm10 = vcmp.gt.f32.partialorder %v133_v12, 0.0  ;;  %v4554_v12 = vld [vmem:[%s5874_s27 + $0x20] sm:$0xff]  }
 0x213   :  { %v392_v16 = vpop.f32.mrf.mxu1  ;;  %v304_v20 = vpop.f32.mrf.mxu0 }
 0x214   :  { %v393_v18 = vadd.f32 %v3746_v14, %v392_v16  ;;  %v305_v25 = vadd.f32 %v3739_v23, %v304_v20  ;;  %v495_v27 = vpack.c.bf16 %v401_v21, %v398_v24  ;;  %v493_v41 = vpack.c.bf16 %v313_v33, %v310_v37 }
 0x215   :  { %v4811_v14 = vmov -1e+09  }
 0x216   :  { %v494_v19 = vpack.c.bf16 %v393_v18, %v390_v17  ;;  %v492_v29 = vpack.c.bf16 %v305_v25, %v302_v26  ;;  %v550_v31 = vsel %vm498_vm2, %v495_v27, 0  ;;  %v5065_v15 = vsel %vm138_vm7, 0.0, %v4811_v14 }
 0x217   :  { %v5067_v16 = vsel %vm136_vm8, 0.0, %v4811_v14  ;;  %v5070_v20 = vsel %vm139_vm9, 0.0, %v4811_v14  ;;  %v5074_v23 = vsel %vm137_vm10, 0.0, %v4811_v14  ;;  %v4556_v14 = vld [vmem:[%s5844_s8 + $0x38] sm:$0xff]  }
 0x218   :  { %v503_v22 = vsel %vm498_vm2, %v494_v19, 0 }
 0x219   :  { %4283 = vmatpush3.bf16.xpose.msra.mxu1 %v503_v22 }
 0x21a   :  { %4288 = vmatprep.subr.bf16.mxu1 %v4808_v8 }
 0x21d   :  { %v4280_v28 = vpop.f32.mrf.mxu0 }
 0x21e   :  { %v486_v40 = vadd.f32 %v4280_v28, %v3753_v34 }
 0x21f   :  { %v477_v30 = vpop.f32.mrf.mxu0 }
 0x220   :  { %4285 = vmatmul.mubr.msk.bf16.vlgmr.msra.gmra.mxu1 %vm498_vm2, %v492_v29  ;;  %v478_v38 = vadd.f32 %v3753_v34, %v477_v30 }
 0x221   :  { %v4281_v32 = vpop.f32.mrf.mxu0  ;;  %4289 = vmatpush3.bf16.xpose.msra.mxu1 %v550_v31  ;;  %4290 = vmatprep.mubr.msk.bf16.mxu1 %vm4809_vm1, %v4808_v8 }
 0x222   :  { %4300 = vmatprep.subr.bf16.mxu1 %v4808_v8  ;;  %v489_v35 = vadd.f32 %v4281_v32, %v3753_v34 }
 0x223   :  { %v480_v36 = vpop.f32.mrf.mxu0 }
 0x224   :  { %v481_v39 = vadd.f32 %v3753_v34, %v480_v36  ;;  %v497_v43 = vpack.c.bf16 %v489_v35, %v486_v40 }
 0x226   :  { %v496_v42 = vpack.c.bf16 %v481_v39, %v478_v38 }
 0x228   :  { %4295 = vmatpush3.bf16.msra.mxu0 %v496_v42  ;;  %4291 = vmatmul.mubr.msk.bf16.vlgmr.msra.gmra.mxu1 %vm498_vm2, %v493_v41 }
 0x229   :  { %4301 = vmatpush3.bf16.msra.mxu1 %v497_v43  ;;  %4302 = vmatprep.mubr.msk.bf16.mxu1 %vm4809_vm1, %v4808_v8 }
 0x22a   :  { %4318 = vmatprep.subr.bf16.mxu1 %v4548_v52  ;;  %4306 = vmatprep.subr.bf16.mxu0 %v4549_v53 }
 0x2e0   :  { %v539_v3 = vpop.f32.mrf.mxu1 }
 0x2e1   :  { %v540_v21 = vadd.f32 %v539_v3, %v5067_v16 }
 0x2e2   :  { %v4286_v7 = vpop.f32.mrf.mxu1 }
 0x2e3   :  { %v594_v28 = vsel %vm593_vm11, %v540_v21, -inf }
 0x2e4   :  { %v542_v11 = vpop.f32.mrf.mxu1 }
 0x2e5   :  { %v543_v27 = vadd.f32 %v542_v11, %v5074_v23  ;;  %v4553_v11 = vld [vmem:[%s5873_s25 + $0x28] sm:$0xff]  }
 0x2e6   :  { %v4287_v13 = vpop.f32.mrf.mxu1 }
 0x2e7   :  { %v597_v30 = vsel %vm593_vm11, %v543_v27, -inf  ;;  %v4555_v13 = vld [vmem:[%s5873_s25 + $0x20] sm:$0xff]  }
 0x2e8   :  { %v586_v17 = vpop.f32.mrf.mxu1 }
 0x2e9   :  { %v587_v18 = vadd.f32 %v586_v17, %v5065_v15  ;;  %v4557_v17 = vld [vmem:[%s5844_s8 + $0x30] sm:$0xff]  }
 0x2ea   :  { %v4292_v19 = vpop.f32.mrf.mxu1 }
 0x2eb   :  { %v600_v22 = vsel %vm593_vm11, %v587_v18, -inf  ;;  %v4559_v19 = vld [vmem:[%s5844_s8 + $0x20] sm:$0xff]  }
 0x2ec   :  { %601 = vmax.xlane.f32.xlu0 %v600_v22  ;;  %v589_v24 = vpop.f32.mrf.mxu1 }
 0x2ed   :  { %v590_v25 = vadd.f32 %v589_v24, %v5070_v20 }
 0x2ee   :  { %v4293_v26 = vpop.f32.mrf.mxu1 }
 0x2ef   :  { %v603_v29 = vsel %vm593_vm11, %v590_v25, -inf }
 0x2f0   :  { %595 = vmax.xlane.f32.xlu0 %v594_v28  ;;  %604 = vmax.xlane.f32.xlu1 %v603_v29 }
 0x2f4   :  { %598 = vmax.xlane.f32.xlu1 %v597_v30 }
 0x375   :  { %v602_v31 = vpop.xlane.xlu0 %601 }
 0x376   :  { %v608_v32 = vsub.f32 %v587_v18, %v602_v31  ;;  %v4558_v18 = vld [vmem:[%s5844_s8 + $0x28] sm:$0xff]  }
 0x378   :  { %v614_v33 = vmul.f32 1.442695, %v608_v32 }
 0x379   :  { %v596_v34 = vpop.xlane.xlu0 %595  ;;  %v605_v35 = vpop.xlane.xlu1 %604 }
 0x37a   :  { %4660 = vpow2.f32 %v614_v33  ;;  %v606_v36 = vsub.f32 %v540_v21, %v596_v34  ;;  %v609_v37 = vsub.f32 %v590_v25, %v605_v35  ;;  %v3789_v34 = vld [vmem:[%s5843_s7 + $0x1] ss:$0 sm:$0xff] }
 0x37c   :  { %v610_v38 = vmul.f32 1.442695, %v606_v36  ;;  %v616_v39 = vmul.f32 1.442695, %v609_v37 }
 0x37d   :  { %v599_v40 = vpop.xlane.xlu1 %598 }
 0x37e   :  { %4662 = vpow2.f32 %v610_v38  ;;  %v607_v41 = vsub.f32 %v543_v27, %v599_v40 }
 0x37f   :  { %4664 = vpow2.f32 %v616_v39 }
 0x380   :  { %v612_v42 = vmul.f32 1.442695, %v607_v41 }
 0x382   :  { %4666 = vpow2.f32 %v612_v42 }
 0x387   :  { %v4661_v43 = vpop.eup %4660 }
 0x388   :  { %v624_v44 = vsel %vm593_vm11, %v4661_v43, 0.0 }
 0x389   :  { %625 = vadd.xlane.f32.xlu0 %v624_v44  ;;  %v3773_v44 = vld [vmem:[%s5877_s24 + $0x1] ss:$0 sm:$0xff] }
 0x38b   :  { %v4663_v45 = vpop.eup %4662 }
 0x38c   :  { %v4665_v46 = vpop.eup %4664  ;;  %v618_v48 = vsel %vm593_vm11, %v4663_v45, 0.0 }
 0x38d   :  { %619 = vadd.xlane.f32.xlu0 %v618_v48  ;;  %v627_v49 = vsel %vm593_vm11, %v4665_v46, 0.0 }
 0x38e   :  { %628 = vadd.xlane.f32.xlu1 %v627_v49 }
 0x38f   :  { %v4667_v50 = vpop.eup %4666 }
 0x390   :  { %v621_v51 = vsel %vm593_vm11, %v4667_v50, 0.0 }
 0x392   :  { %622 = vadd.xlane.f32.xlu1 %v621_v51 }
 0x412   :  { %v626_v54 = vpop.xlane.xlu0 %625 }
 0x413   :  { %4668 = vrcp.f32 %v626_v54  ;;  %v3805_v54 = vld [vmem:[%s5845_s9 + $0x1] ss:$0 sm:$0xff] }
 0x416   :  { %v620_v56 = vpop.xlane.xlu0 %619 }
 0x417   :  { %v629_v57 = vpop.xlane.xlu1 %628 }
 0x418   :  { %4670 = vrcp.f32 %v629_v57 }
 0x419   :  { %4672 = vrcp.f32 %v620_v56 }
 0x41b   :  { %v623_v58 = vpop.xlane.xlu1 %622 }
 0x41c   :  { %4674 = vrcp.f32 %v623_v58 }
 0x420   :  { %v4669_v59 = vpop.eup %4668 }
 0x421   :  { %v636_v61 = vmul.f32 %v4669_v59, %v4661_v43 }
 0x425   :  { %v4671_v60 = vpop.eup %4670 }
 0x426   :  { %v637_v62 = vmul.f32 %v4671_v60, %v4665_v46  ;;  %v4673_v63 = vpop.eup %4672 }
 0x427   :  { %v634_v5 = vmul.f32 %v4673_v63, %v4663_v45 }
 0x428   :  { %v639_v0 = vpack.c.bf16 %v637_v62, %v636_v61 }
 0x429   :  { %v4675_v3 = vpop.eup %4674 }
 0x42a   :  { %4303 = vmatmul.mubr.msk.bf16.vlgmr.msra.gmra.mxu1 %vm593_vm11, %v639_v0  ;;  %v635_v6 = vmul.f32 %v4675_v3, %v4667_v50 }
 0x42b   :  { %4319 = vmatpush3.bf16.msra.mxu1 %v4548_v52  ;;  %4326 = vmatprep.mubr.msk.bf16.mxu1 %vm146_vm0, %v4997_v1 }
 0x42c   :  { %4320 = vmatprep.subr.bf16.mxu1 %v4550_v2  ;;  %v638_v7 = vpack.c.bf16 %v635_v6, %v634_v5 }
 0x42e   :  { %4297 = vmatmul.mubr.msk.bf16.vlgmr.msra.gmra.mxu0 %vm593_vm11, %v638_v7 }
 0x42f   :  { %4307 = vmatpush3.bf16.msra.mxu0 %v4549_v53  ;;  %4321 = vmatpush3.bf16.msra.mxu1 %v4550_v2 }
 0x430   :  { %4314 = vmatprep.mubr.msk.bf16.mxu0 %vm146_vm0, %v4997_v1  ;;  %4308 = vmatprep.subr.bf16.mxu0 %v4551_v9 }
 0x431   :  { %4322 = vmatprep.subr.bf16.mxu1 %v4552_v10 }
 0x433   :  { %4309 = vmatpush3.bf16.msra.mxu0 %v4551_v9  ;;  %4323 = vmatpush3.bf16.msra.mxu1 %v4552_v10 }
 0x434   :  { %4310 = vmatprep.subr.bf16.mxu0 %v4553_v11  ;;  %4324 = vmatprep.subr.bf16.mxu1 %v4554_v12 }
 0x437   :  { %4311 = vmatpush3.bf16.msra.mxu0 %v4553_v11  ;;  %4325 = vmatpush3.bf16.msra.mxu1 %v4554_v12 }
 0x438   :  { %4312 = vmatprep.subr.bf16.mxu0 %v4555_v13  ;;  %4342 = vmatprep.subr.bf16.mxu1 %v4808_v8 }
 0x43a   :  { %4327 = vmatmul.mubr.msk.bf16.vlgmr.msra.gmra.mxu1 %vm146_vm0, %v5003_v4 }
 0x43b   :  { %4313 = vmatpush3.bf16.msra.mxu0 %v4555_v13  ;;  %4344 = vmatprep.mubr.msk.bf16.mxu1 %vm4809_vm1, %v4808_v8 }
 0x43c   :  { %4330 = vmatprep.subr.bf16.mxu0 %v4556_v14 }
 0x43e   :  { %4315 = vmatmul.mubr.msk.bf16.vlgmr.msra.gmra.mxu0 %vm146_vm0, %v5003_v4 }
 0x43f   :  { %4331 = vmatpush3.bf16.msra.mxu0 %v4556_v14  ;;  %4338 = vmatprep.mubr.msk.bf16.mxu0 %vm146_vm0, %v4997_v1 }
 0x440   :  { %4332 = vmatprep.subr.bf16.mxu0 %v4557_v17 }
 0x443   :  { %4333 = vmatpush3.bf16.msra.mxu0 %v4557_v17 }
 0x444   :  { %4334 = vmatprep.subr.bf16.mxu0 %v4558_v18 }
 0x447   :  { %4335 = vmatpush3.bf16.msra.mxu0 %v4558_v18 }
 0x448   :  { %4336 = vmatprep.subr.bf16.mxu0 %v4559_v19 }
 0x44b   :  { %4337 = vmatpush3.bf16.msra.mxu0 %v4559_v19 }
 0x44c   :  { %4354 = vmatprep.subr.bf16.mxu0 %v4808_v8 }
 0x44e   :  { %4339 = vmatmul.mubr.msk.bf16.vlgmr.msra.gmra.mxu0 %vm146_vm0, %v5003_v4 }
 0x44f   :  { %4356 = vmatprep.mubr.msk.bf16.mxu0 %vm4809_vm1, %v4808_v8 }
 0x4ea   :  { %v5141_v1 = vpop.f32.mrf.mxu1 }
 0x4ec   :  { %v4304_v21 = vpop.f32.mrf.mxu1 }
 0x4ee   :  { %v5143_v22 = vpop.f32.mrf.mxu0  ;;  %v5145_v24 = vpop.f32.mrf.mxu1 }
 0x4ef   :  { %v729_v25 = vpack.c.bf16 %v5145_v24, %v5141_v1 }
 0x4f0   :  { %v4298_v26 = vpop.f32.mrf.mxu0  ;;  %v4305_v27 = vpop.f32.mrf.mxu1 }
 0x4f2   :  { %v5149_v28 = vpop.f32.mrf.mxu0 }
 0x4f3   :  { %v728_v4 = vpack.c.bf16 %v5149_v28, %v5143_v22 }
 0x4f4   :  { %v4299_v29 = vpop.f32.mrf.mxu0 }
 0x4fa   :  { %v4328_v30 = vpop.f32.mrf.mxu1 }
 0x4fb   :  { %v908_v45 = vadd.f32 %v4328_v30, %v3789_v34 }
 0x4fc   :  { %v899_v31 = vpop.f32.mrf.mxu1 }
 0x4fd   :  { %v900_v37 = vadd.f32 %v3789_v34, %v899_v31 }
 0x4fe   :  { %v4316_v32 = vpop.f32.mrf.mxu0  ;;  %v4329_v33 = vpop.f32.mrf.mxu1 }
 0x4ff   :  { %v911_v42 = vadd.f32 %v4329_v33, %v3789_v34  ;;  %v818_v57 = vadd.f32 %v4316_v32, %v3773_v44 }
 0x500   :  { %v809_v35 = vpop.f32.mrf.mxu0  ;;  %v902_v36 = vpop.f32.mrf.mxu1 }
 0x501   :  { %v903_v38 = vadd.f32 %v3789_v34, %v902_v36  ;;  %v1007_v48 = vpack.c.bf16 %v911_v42, %v908_v45  ;;  %v810_v49 = vadd.f32 %v3773_v44, %v809_v35 }
 0x502   :  { %v4317_v39 = vpop.f32.mrf.mxu0 }
 0x503   :  { %v1006_v40 = vpack.c.bf16 %v903_v38, %v900_v37  ;;  %v1061_v51 = vsel %vm498_vm2, %v1007_v48, 0  ;;  %v821_v53 = vadd.f32 %v4317_v39, %v3773_v44 }
 0x504   :  { %v812_v41 = vpop.f32.mrf.mxu0 }
 0x505   :  { %v1014_v43 = vsel %vm498_vm2, %v1006_v40, 0  ;;  %v813_v46 = vadd.f32 %v3773_v44, %v812_v41  ;;  %v1005_v59 = vpack.c.bf16 %v821_v53, %v818_v57 }
 0x506   :  { %4343 = vmatpush3.bf16.xpose.msra.mxu1 %v1014_v43 }
 0x507   :  { %4348 = vmatprep.subr.bf16.mxu1 %v4808_v8  ;;  %v1004_v50 = vpack.c.bf16 %v813_v46, %v810_v49 }
 0x50d   :  { %4345 = vmatmul.mubr.msk.bf16.vlgmr.msra.gmra.mxu1 %vm498_vm2, %v1004_v50 }
 0x50e   :  { %v4340_v52 = vpop.f32.mrf.mxu0  ;;  %4349 = vmatpush3.bf16.xpose.msra.mxu1 %v1061_v51  ;;  %4350 = vmatprep.mubr.msk.bf16.mxu1 %vm4809_vm1, %v4808_v8  ;;  %v4560_v51 = vld [vmem:[%s5846_s10 + $0x8] sm:$0xff]  }
 0x50f   :  { %4360 = vmatprep.subr.bf16.mxu1 %v4808_v8  ;;  %v998_v60 = vadd.f32 %v4340_v52, %v3805_v54 }
 0x510   :  { %v989_v56 = vpop.f32.mrf.mxu0 }
 0x511   :  { %v990_v63 = vadd.f32 %v3805_v54, %v989_v56 }
 0x512   :  { %v4341_v58 = vpop.f32.mrf.mxu0 }
 0x513   :  { %v1001_v61 = vadd.f32 %v4341_v58, %v3805_v54 }
 0x514   :  { %v992_v62 = vpop.f32.mrf.mxu0 }
 0x515   :  { %v1009_v0 = vpack.c.bf16 %v1001_v61, %v998_v60  ;;  %v993_v2 = vadd.f32 %v3805_v54, %v992_v62  ;;  %4351 = vmatmul.mubr.msk.bf16.vlgmr.msra.gmra.mxu1 %vm498_vm2, %v1005_v59 }
 0x516   :  { %4362 = vmatprep.mubr.msk.bf16.mxu1 %vm4809_vm1, %v4808_v8 }
 0x517   :  { %v1008_v3 = vpack.c.bf16 %v993_v2, %v990_v63  ;;  %4361 = vmatpush3.bf16.msra.mxu1 %v1009_v0 }
 0x518   :  { %4374 = vmatprep.subr.bf16.mxu1 %v4560_v51 }
 0x519   :  { %4355 = vmatpush3.bf16.msra.mxu0 %v1008_v3 }
 0x5cd   :  { %v1050_v5 = vpop.f32.mrf.mxu1 }
 0x5ce   :  { %v1051_v6 = vadd.f32 %v1050_v5, %v5067_v16  ;;  %v4561_v5 = vld [vmem:[%s5846_s10] sm:$0xff]  }
 0x5cf   :  { %v4346_v7 = vpop.f32.mrf.mxu1 }
 0x5d0   :  { %v1104_v9 = vsel %vm593_vm11, %v1051_v6, -inf  ;;  %v4563_v7 = vld [vmem:[%s5846_s10 + $0x10] sm:$0xff]  }
 0x5d1   :  { %1105 = vmax.xlane.f32.xlu0 %v1104_v9  ;;  %v1053_v10 = vpop.f32.mrf.mxu1 }
 0x5d2   :  { %v1054_v11 = vadd.f32 %v1053_v10, %v5074_v23 }
 0x5d3   :  { %v4347_v12 = vpop.f32.mrf.mxu1 }
 0x5d4   :  { %v1107_v13 = vsel %vm593_vm11, %v1054_v11, -inf }
 0x5d5   :  { %1108 = vmax.xlane.f32.xlu1 %v1107_v13  ;;  %v1097_v14 = vpop.f32.mrf.mxu1 }
 0x5d6   :  { %v1098_v17 = vadd.f32 %v1097_v14, %v5065_v15 }
 0x5d7   :  { %v4352_v18 = vpop.f32.mrf.mxu1 }
 0x5d8   :  { %v1110_v19 = vsel %vm593_vm11, %v1098_v17, -inf }
 0x5d9   :  { %1111 = vmax.xlane.f32.xlu0 %v1110_v19  ;;  %v1100_v21 = vpop.f32.mrf.mxu1 }
 0x5da   :  { %v1101_v26 = vadd.f32 %v1100_v21, %v5070_v20 }
 0x5db   :  { %v4353_v27 = vpop.f32.mrf.mxu1 }
 0x5dc   :  { %v1113_v29 = vsel %vm593_vm11, %v1101_v26, -inf }
 0x5dd   :  { %1114 = vmax.xlane.f32.xlu1 %v1113_v29  ;;  %v4782_v29 = vld [vmem:[%s5872_s29 + $0x10] sm:$0xff] }
 0x65a   :  { %v1106_v30 = vpop.xlane.xlu0 %1105 }
 0x65b   :  { %v1116_v31 = vsub.f32 %v1051_v6, %v1106_v30  ;;  %v4562_v6 = vld [vmem:[%s5846_s10 + $0x18] sm:$0xff]  }
 0x65c   :  { %4366 = vmatprep.subr.bf16.mxu0 %v4562_v6 }
 0x65d   :  { %v1120_v32 = vmul.f32 1.442695, %v1116_v31  ;;  %v4783_v31 = vld [vmem:[%s5872_s29] sm:$0xff] }
 0x65e   :  { %v1109_v33 = vpop.xlane.xlu1 %1108 }
 0x65f   :  { %4676 = vpow2.f32 %v1120_v32  ;;  %v1117_v34 = vsub.f32 %v1054_v11, %v1109_v33 }
 0x661   :  { %v1122_v35 = vmul.f32 1.442695, %v1117_v34 }
 0x662   :  { %v1112_v36 = vpop.xlane.xlu0 %1111 }
 0x663   :  { %4678 = vpow2.f32 %v1122_v35  ;;  %v1118_v37 = vsub.f32 %v1098_v17, %v1112_v36  ;;  %v3828_v35 = vld [vmem:[%s5847_s11] ss:$0 sm:$0xff] }
 0x665   :  { %v1124_v38 = vmul.f32 1.442695, %v1118_v37 }
 0x666   :  { %v1115_v39 = vpop.xlane.xlu1 %1114 }
 0x667   :  { %4680 = vpow2.f32 %v1124_v38  ;;  %v1119_v40 = vsub.f32 %v1101_v26, %v1115_v39 }
 0x669   :  { %v1126_v41 = vmul.f32 1.442695, %v1119_v40  ;;  %v4784_v40 = vld [vmem:[%s5872_s29 + $0x18] sm:$0xff] }
 0x66b   :  { %4682 = vpow2.f32 %v1126_v41 }
 0x66c   :  { %v4677_v42 = vpop.eup %4676 }
 0x66d   :  { %v1128_v43 = vsel %vm593_vm11, %v4677_v42, 0.0 }
 0x66e   :  { %1129 = vadd.xlane.f32.xlu0 %v1128_v43 }
 0x670   :  { %v4679_v44 = vpop.eup %4678 }
 0x671   :  { %v1131_v45 = vsel %vm593_vm11, %v4679_v44, 0.0 }
 0x672   :  { %1132 = vadd.xlane.f32.xlu1 %v1131_v45 }
 0x674   :  { %v4681_v46 = vpop.eup %4680 }
 0x675   :  { %v1134_v48 = vsel %vm593_vm11, %v4681_v46, 0.0 }
 0x676   :  { %1135 = vadd.xlane.f32.xlu0 %v1134_v48 }
 0x678   :  { %v4683_v49 = vpop.eup %4682 }
 0x679   :  { %v1137_v50 = vsel %vm593_vm11, %v4683_v49, 0.0 }
 0x67a   :  { %1138 = vadd.xlane.f32.xlu1 %v1137_v50 }
 0x6f7   :  { %v1130_v52 = vpop.xlane.xlu0 %1129 }
 0x6f8   :  { %4684 = vrcp.f32 %v1130_v52 }
 0x6fb   :  { %v1133_v53 = vpop.xlane.xlu1 %1132 }
 0x6fc   :  { %4686 = vrcp.f32 %v1133_v53 }
 0x6ff   :  { %v1136_v54 = vpop.xlane.xlu0 %1135 }
 0x700   :  { %4688 = vrcp.f32 %v1136_v54 }
 0x703   :  { %v1139_v56 = vpop.xlane.xlu1 %1138 }
 0x704   :  { %4690 = vrcp.f32 %v1139_v56 }
 0x705   :  { %v4685_v57 = vpop.eup %4684 }
 0x706   :  { %v1144_v59 = vmul.f32 %v4685_v57, %v4677_v42  ;;  %v4785_v42 = vld [vmem:[%s5872_s29 + $0x8] sm:$0xff] }
 0x709   :  { %v4687_v58 = vpop.eup %4686 }
 0x70a   :  { %v1145_v60 = vmul.f32 %v4687_v58, %v4679_v44 }
 0x70c   :  { %v1148_v61 = vpack.c.bf16 %v1145_v60, %v1144_v59 }
 0x70d   :  { %v4689_v62 = vpop.eup %4688 }
 0x70e   :  { %4357 = vmatmul.mubr.msk.bf16.vlgmr.msra.gmra.mxu0 %vm593_vm11, %v1148_v61  ;;  %v1146_v0 = vmul.f32 %v4689_v62, %v4681_v46 }
 0x70f   :  { %4367 = vmatpush3.bf16.msra.mxu0 %v4562_v6 }
 0x710   :  { %4368 = vmatprep.subr.bf16.mxu0 %v4563_v7 }
 0x711   :  { %v4691_v63 = vpop.eup %4690 }
 0x712   :  { %v1147_v2 = vmul.f32 %v4691_v63, %v4683_v49 }
 0x713   :  { %4369 = vmatpush3.bf16.msra.mxu0 %v4563_v7 }
 0x714   :  { %v1149_v3 = vpack.c.bf16 %v1147_v2, %v1146_v0 }
 0x716   :  { %4363 = vmatmul.mubr.msk.bf16.vlgmr.msra.gmra.mxu1 %vm593_vm11, %v1149_v3 }
 0x717   :  { %4375 = vmatpush3.bf16.msra.mxu1 %v4560_v51  ;;  %4378 = vmatprep.mubr.msk.bf16.mxu1 %vm498_vm2, %v728_v4 }
 0x718   :  { %4376 = vmatprep.subr.bf16.mxu1 %v4561_v5 }
 0x71b   :  { %4377 = vmatpush3.bf16.msra.mxu1 %v4561_v5 }
 0x71e   :  { %4379 = vmatmul.mubr.msk.bf16.vlgmr.msra.gmra.mxu1 %vm498_vm2, %v729_v25 }
 0x7ce   :  { %v1187_v22 = vpop.f32.mrf.mxu0 }
 0x7d0   :  { %v4358_v28 = vpop.f32.mrf.mxu0 }
 0x7d2   :  { %v1190_v4 = vpop.f32.mrf.mxu0 }
 0x7d3   :  { %v1238_v9 = vpack.c.bf16 %v1190_v4, %v1187_v22  ;;  %v4566_v4 = vld [vmem:[%s5850_s14 + $0x34] ss:$8 sps:$4 sm:$0xff]  }
 0x7d4   :  { %v4359_v10 = vpop.f32.mrf.mxu0  ;;  %1544 = vmatprep.subr.bf16.mxu0 %v4566_v4  ;;  %v4588_v4 = vld [vmem:[%s5852_s16 + $0x48] sm:$0xff]  }
 0x7d5   :  { %4370 = vmatprep.mubr.msk.bf16.mxu0 %vm498_vm2, %v1238_v9  ;;  %v4564_v9 = vld [vmem:[%s5850_s14 + $0x30] ss:$8 sps:$4 sm:$0xff]   ;;  %v4569_v10 = vld [vmem:[%s5850_s14 + $0x24] ss:$8 sps:$4 sm:$0xff]  }
 0x7d6   :  { %v1231_v1 = vpop.f32.mrf.mxu1 }
 0x7d8   :  { %v4364_v24 = vpop.f32.mrf.mxu1 }
 0x7d9   :  { %v4572_v24 = vld [vmem:[%s5850_s14 + $0x14] ss:$8 sps:$4 sm:$0xff]  }
 0x7da   :  { %v1234_v25 = vpop.f32.mrf.mxu1 }
 0x7db   :  { %v1239_v11 = vpack.c.bf16 %v1234_v25, %v1231_v1  ;;  %v4567_v1 = vld [vmem:[%s5850_s14 + $0x20] ss:$8 sps:$4 sm:$0xff]   ;;  %v4570_v25 = vld [vmem:[%s5850_s14 + $0x10] ss:$8 sps:$4 sm:$0xff]  }
 0x7dc   :  { %v4365_v12 = vpop.f32.mrf.mxu1 }
 0x7dd   :  { %4371 = vmatmul.mubr.msk.bf16.vlgmr.msra.gmra.mxu0 %vm498_vm2, %v1239_v11  ;;  %v4575_v11 = vld [vmem:[%s5850_s14 + $0x4] ss:$8 sps:$4 sm:$0xff]   ;;  %v4573_v12 = vld [vmem:[%s5850_s14] ss:$8 sps:$4 sm:$0xff]  }
 0x7de   :  { %v4380_v13 = vpop.f32.mrf.mxu1  ;;  %1545 = vmatpush1.bf16.msra.mxu0 %v4564_v9  ;;  %v4589_v9 = vld [vmem:[%s5852_s16 + $0x8] sm:$0xff]  }
 0x7df   :  { %1546 = vmatprep.subr.bf16.mxu0 %v4569_v10  ;;  %v4590_v10 = vld [vmem:[%s5852_s16 + $0x40] sm:$0xff]  }
 0x7e0   :  { %v1364_v14 = vpop.f32.mrf.mxu1 }
 0x7e2   :  { %v4381_v19 = vpop.f32.mrf.mxu1  ;;  %1547 = vmatpush1.bf16.msra.mxu0 %v4567_v1  ;;  %v4591_v1 = vld [vmem:[%s5852_s16] sm:$0xff]  }
 0x7e3   :  { %1548 = vmatprep.subr.bf16.mxu0 %v4572_v24  ;;  %v1478_v24 = vld [vmem:[%s5851_s15] sm:$0x3] }
 0x7e4   :  { %v1367_v34 = vpop.f32.mrf.mxu1 }
 0x7e6   :  { %1549 = vmatpush1.bf16.msra.mxu0 %v4570_v25  ;;  %v1486_v25 = vsub.s32 1, %v5047_v47 }
 0x7e7   :  { %1550 = vmatprep.subr.bf16.mxu0 %v4575_v11  ;;  %v1483_v11 = vrot.slane %v1478_v24, %v5054_v55 }
 0x7ea   :  { %1551 = vmatpush1.bf16.msra.mxu0 %v4573_v12  ;;  %v1487_v12 = vrot.slane %v1478_v24, %v1486_v25 }
 0x89d   :  { %v4372_v17 = vpop.f32.mrf.mxu0 }
 0x89e   :  { %v1373_v18 = vadd.f32 %v4380_v13, %v4372_v17  ;;  %v4812_v13 = vmov 0  }
 0x89f   :  { %v1297_v21 = vpop.f32.mrf.mxu0  ;;  %1568 = vmatprep.mubr.bf16.mxu0 %v4812_v13 }
 0x8a0   :  { %v1365_v26 = vadd.f32 %v1364_v14, %v1297_v21  ;;  %v1381_v30 = vadd.f32 %v4782_v29, %v1373_v18 }
 0x8a1   :  { %v4373_v27 = vpop.f32.mrf.mxu0 }
 0x8a2   :  { %v1379_v32 = vadd.f32 %v4783_v31, %v1365_v26  ;;  %v1376_v33 = vadd.f32 %v4381_v19, %v4373_v27  ;;  %v5219_v39 = vadd.f32 %v3828_v35, %v1381_v30 }
 0x8a3   :  { %v1300_v36 = vpop.f32.mrf.mxu0 }
 0x8a4   :  { %v5217_v37 = vadd.f32 %v3828_v35, %v1379_v32  ;;  %v1368_v38 = vadd.f32 %v1367_v34, %v1300_v36  ;;  %v1382_v41 = vadd.f32 %v4784_v40, %v1376_v33  ;;  %v1402_v49 = vsel %vm146_vm0, %v5219_v39, 0.0  ;;  %v3829_v36 = vld [vmem:[%s5848_s12] ss:$0 sm:$0xff] }
 0x8a6   :  { %v1380_v43 = vadd.f32 %v4785_v42, %v1368_v38  ;;  %v1396_v44 = vsel %vm146_vm0, %v5217_v37, 0.0  ;;  %v5231_v46 = vadd.f32 %v3828_v35, %v1382_v41 }
 0x8a7   :  { %1397 = vadd.xlane.f32.xlu0 %v1396_v44 }
 0x8a8   :  { %v5229_v45 = vadd.f32 %v3828_v35, %v1380_v43  ;;  %v1405_v50 = vsel %vm146_vm0, %v5231_v46, 0.0  ;;  %v3830_v43 = vld [vmem:[%s5849_s13] ss:$0 sm:$0xff] }
 0x8aa   :  { %v1399_v48 = vsel %vm146_vm0, %v5229_v45, 0.0 }
 0x8ab   :  { %1400 = vadd.xlane.f32.xlu1 %v1399_v48  ;;  %1403 = vadd.xlane.f32.xlu0 %v1402_v49 }
 0x8af   :  { %1406 = vadd.xlane.f32.xlu1 %v1405_v50 }
 0x930   :  { %v1398_v51 = vpop.xlane.xlu0 %1397 }
 0x931   :  { %v1408_v52 = vmul.f32 0.015625, %v1398_v51 }
 0x933   :  { %v1412_v53 = vsub.f32 %v5217_v37, %v1408_v52 }
 0x934   :  { %v1401_v54 = vpop.xlane.xlu1 %1400  ;;  %v1404_v56 = vpop.xlane.xlu0 %1403 }
 0x935   :  { %v1409_v57 = vmul.f32 0.015625, %v1401_v54  ;;  %v1410_v58 = vmul.f32 0.015625, %v1404_v56  ;;  %v1416_v59 = vmul.f32 %v1412_v53, %v1412_v53 }
 0x937   :  { %v1413_v60 = vsub.f32 %v5229_v45, %v1409_v57  ;;  %v1414_v61 = vsub.f32 %v5219_v39, %v1410_v58  ;;  %v1420_v62 = vsel %vm146_vm0, %v1416_v59, 0.0 }
 0x938   :  { %v1407_v63 = vpop.xlane.xlu1 %1406  ;;  %1421 = vadd.xlane.f32.xlu0 %v1420_v62  ;;  %v4578_v62 = vld [vmem:[%s5852_s16 + $0x70] sm:$0xff]  }
 0x939   :  { %v1411_v0 = vmul.f32 0.015625, %v1407_v63  ;;  %v1417_v2 = vmul.f32 %v1413_v60, %v1413_v60  ;;  %v1418_v3 = vmul.f32 %v1414_v61, %v1414_v61  ;;  %v4579_v63 = vld [vmem:[%s5852_s16 + $0x30] sm:$0xff]  }
 0x93b   :  { %v1415_v5 = vsub.f32 %v5231_v46, %v1411_v0  ;;  %v1423_v6 = vsel %vm146_vm0, %v1417_v2, 0.0  ;;  %v1426_v7 = vsel %vm146_vm0, %v1418_v3, 0.0  ;;  %v4580_v0 = vld [vmem:[%s5852_s16 + $0x68] sm:$0xff]   ;;  %v4582_v3 = vld [vmem:[%s5852_s16 + $0x60] sm:$0xff]  }
 0x93c   :  { %1424 = vadd.xlane.f32.xlu1 %v1423_v6  ;;  %1427 = vadd.xlane.f32.xlu0 %v1426_v7  ;;  %v4581_v2 = vld [vmem:[%s5852_s16 + $0x28] sm:$0xff]   ;;  %v4584_v6 = vld [vmem:[%s5852_s16 + $0x58] sm:$0xff]  }
 0x93d   :  { %v1419_v22 = vmul.f32 %v1415_v5, %v1415_v5  ;;  %v4585_v7 = vld [vmem:[%s5852_s16 + $0x18] sm:$0xff]  }
 0x93f   :  { %v1429_v28 = vsel %vm146_vm0, %v1419_v22, 0.0  ;;  %v4586_v22 = vld [vmem:[%s5852_s16 + $0x50] sm:$0xff]  }
 0x940   :  { %1430 = vadd.xlane.f32.xlu1 %v1429_v28  ;;  %v4587_v28 = vld [vmem:[%s5852_s16 + $0x10] sm:$0xff]  }
 0x9c1   :  { %v1422_v14 = vpop.xlane.xlu0 %1421 }
 0x9c2   :  { %v1432_v17 = vmul.f32 0.015625, %v1422_v14 }
 0x9c4   :  { %v1436_v18 = vadd.f32 1e-05, %v1432_v17 }
 0x9c5   :  { %v1425_v19 = vpop.xlane.xlu1 %1424  ;;  %v1428_v21 = vpop.xlane.xlu0 %1427 }
 0x9c6   :  { %4692 = vrsqrt.f32 %v1436_v18  ;;  %v1433_v26 = vmul.f32 0.015625, %v1425_v19  ;;  %v1434_v27 = vmul.f32 0.015625, %v1428_v21 }
 0x9c8   :  { %v1437_v29 = vadd.f32 1e-05, %v1433_v26  ;;  %v1438_v30 = vadd.f32 1e-05, %v1434_v27 }
 0x9c9   :  { %v1431_v31 = vpop.xlane.xlu1 %1430 }
 0x9ca   :  { %4694 = vrsqrt.f32 %v1437_v29  ;;  %v1435_v32 = vmul.f32 0.015625, %v1431_v31 }
 0x9cb   :  { %4696 = vrsqrt.f32 %v1438_v30 }
 0x9cc   :  { %v1439_v33 = vadd.f32 1e-05, %v1435_v32 }
 0x9ce   :  { %4698 = vrsqrt.f32 %v1439_v33 }
 0x9d3   :  { %v4693_v34 = vpop.eup %4692 }
 0x9d4   :  { %v1444_v35 = vmul.f32 %v4693_v34, %v1412_v53 }
 0x9d6   :  { %v1454_v41 = vmul.f32 %v3829_v36, %v1444_v35 }
 0x9d7   :  { %v4695_v38 = vpop.eup %4694 }
 0x9d8   :  { %v1445_v40 = vmul.f32 %v4695_v38, %v1413_v60  ;;  %v4697_v42 = vpop.eup %4696  ;;  %v1464_v49 = vadd.f32 %v3830_v43, %v1454_v41  ;;  %v4576_v60 = vld [vmem:[%s5852_s16 + $0x78] sm:$0xff]  }
 0x9d9   :  { %v1446_v51 = vmul.f32 %v4697_v42, %v1414_v61  ;;  %v4577_v61 = vld [vmem:[%s5852_s16 + $0x38] sm:$0xff]   ;;  %4125 = vmatprep.subr.bf16.mxu1 %v4576_v60 }
 0x9da   :  { %v1455_v44 = vmul.f32 %v3829_v36, %v1445_v40  ;;  %4126 = vmatpush3.bf16.msra.mxu1 %v4577_v61 }
 0x9db   :  { %v4699_v48 = vpop.eup %4698  ;;  %v1456_v56 = vmul.f32 %v3829_v36, %v1446_v51  ;;  %4127 = vmatprep.subr.bf16.mxu1 %v4578_v62 }
 0x9dc   :  { %v1465_v50 = vadd.f32 %v3830_v43, %v1455_v44  ;;  %v1447_v52 = vmul.f32 %v4699_v48, %v1415_v5  ;;  %v4583_v5 = vld [vmem:[%s5852_s16 + $0x20] sm:$0xff]  }
 0x9dd   :  { %v1466_v58 = vadd.f32 %v3830_v43, %v1456_v56 }
 0x9de   :  { %v1468_v54 = vpack.c.bf16 %v1465_v50, %v1464_v49  ;;  %v1457_v53 = vmul.f32 %v3829_v36, %v1447_v52  ;;  %4128 = vmatpush3.bf16.msra.mxu1 %v4579_v63 }
 0x9df   :  { %4129 = vmatprep.subr.bf16.mxu1 %v4580_v0 }
 0x9e0   :  { %3839 = vmatmul.mubr.msk.bf16.vlgmr.msra.gmra.mxu0 %vm146_vm0, %v1468_v54  ;;  %v1467_v57 = vadd.f32 %v3830_v43, %v1457_v53 }
 0x9e1   :  { %1578 = vmatprep.mubr.bf16.mxu0 %v4812_v13 }
 0x9e2   :  { %v1469_v59 = vpack.c.bf16 %v1467_v57, %v1466_v58  ;;  %4130 = vmatpush3.bf16.msra.mxu1 %v4581_v2 }
 0x9e3   :  { %4131 = vmatprep.subr.bf16.mxu1 %v4582_v3 }
 0x9e6   :  { %4132 = vmatpush3.bf16.msra.mxu1 %v4583_v5 }
 0x9e7   :  { %4133 = vmatprep.subr.bf16.mxu1 %v4584_v6 }
 0x9e8   :  { %3840 = vmatmul.mubr.msk.bf16.gmra.mxu0 %vm146_vm0, %v1469_v59 }
 0x9ea   :  { %4134 = vmatpush3.bf16.msra.mxu1 %v4585_v7 }
 0x9eb   :  { %4135 = vmatprep.subr.bf16.mxu1 %v4586_v22 }
 0x9ee   :  { %4136 = vmatpush3.bf16.msra.mxu1 %v4587_v28 }
 0x9ef   :  { %4137 = vmatprep.subr.bf16.mxu1 %v4588_v4 }
 0x9f2   :  { %4138 = vmatpush3.bf16.msra.mxu1 %v4589_v9 }
 0x9f3   :  { %4139 = vmatprep.subr.bf16.mxu1 %v4590_v10 }
 0x9f6   :  { %4140 = vmatpush3.bf16.msra.mxu1 %v4591_v1 }
 0xaa0   :  { %v1570_v14 = vpop.f32.mrf.mxu0 }
 0xaa1   :  { %v5336_v17 = vadd.f32 %v1570_v14, %v1483_v11 }
 0xaa2   :  { %v1572_v18 = vpop.f32.mrf.mxu0 }
 0xaa3   :  { %v1589_v19 = vmul.f32 %v5336_v17, %v5336_v17  ;;  %v5340_v21 = vadd.f32 %v1572_v18, %v1487_v12 }
 0xaa4   :  { %v1574_v26 = vpop.f32.mrf.mxu0 }
 0xaa5   :  { %v1597_v27 = vmul.f32 %v1589_v19, %v5336_v17  ;;  %v1590_v29 = vmul.f32 %v5340_v21, %v5340_v21  ;;  %v5345_v30 = vadd.f32 %v1574_v26, %v1483_v11 }
 0xaa6   :  { %v1576_v31 = vpop.f32.mrf.mxu0 }
 0xaa7   :  { %v1605_v32 = vmul.f32 0.044715, %v1597_v27  ;;  %v1598_v33 = vmul.f32 %v1590_v29, %v5340_v21  ;;  %v1591_v34 = vmul.f32 %v5345_v30, %v5345_v30  ;;  %v5350_v35 = vadd.f32 %v1576_v31, %v1487_v12 }
 0xaa8   :  { %v1580_v36 = vpop.f32.mrf.mxu0 }
 0xaa9   :  { %v1613_v38 = vadd.f32 %v1605_v32, %v5336_v17  ;;  %v1606_v40 = vmul.f32 0.044715, %v1598_v33  ;;  %v1599_v41 = vmul.f32 %v1591_v34, %v5345_v30  ;;  %v1592_v42 = vmul.f32 %v5350_v35, %v5350_v35 }
 0xaaa   :  { %v5356_v43 = vadd.f32 %v1580_v36, %v1483_v11  ;;  %v1582_v44 = vpop.f32.mrf.mxu0 }
 0xaab   :  { %v1621_v48 = vmul.f32 0.7978846, %v1613_v38  ;;  %v1614_v49 = vadd.f32 %v1606_v40, %v5340_v21  ;;  %v1607_v50 = vmul.f32 0.044715, %v1599_v41  ;;  %v1600_v51 = vmul.f32 %v1592_v42, %v5350_v35 }
 0xaac   :  { %v1593_v52 = vmul.f32 %v5356_v43, %v5356_v43  ;;  %v5362_v54 = vadd.f32 %v1582_v44, %v1487_v12  ;;  %v1584_v53 = vpop.f32.mrf.mxu0 }
 0xaad   :  { %v1622_v56 = vmul.f32 0.7978846, %v1614_v49  ;;  %v1615_v57 = vadd.f32 %v1607_v50, %v5345_v30  ;;  %v1608_v58 = vmul.f32 0.044715, %v1600_v51  ;;  %4700 = vtanh.f32 %v1621_v48 }
 0xaae   :  { %v1601_v59 = vmul.f32 %v1593_v52, %v5356_v43  ;;  %v1594_v60 = vmul.f32 %v5362_v54, %v5362_v54  ;;  %v1585_v61 = vadd.f32 %v1584_v53, %v1483_v11  ;;  %v1586_v62 = vpop.f32.mrf.mxu0 }
 0xaaf   :  { %4702 = vtanh.f32 %v1622_v56  ;;  %v1623_v63 = vmul.f32 0.7978846, %v1615_v57  ;;  %v1616_v0 = vadd.f32 %v1608_v58, %v5350_v35  ;;  %v1587_v2 = vadd.f32 %v1586_v62, %v1487_v12 }
 0xab0   :  { %v1609_v3 = vmul.f32 0.044715, %v1601_v59  ;;  %v1602_v5 = vmul.f32 %v1594_v60, %v5362_v54  ;;  %v1595_v6 = vmul.f32 %v1585_v61, %v1585_v61 }
 0xab1   :  { %4704 = vtanh.f32 %v1623_v63  ;;  %v1624_v7 = vmul.f32 0.7978846, %v1616_v0  ;;  %v1596_v22 = vmul.f32 %v1587_v2, %v1587_v2 }
 0xab2   :  { %v1617_v28 = vadd.f32 %v1609_v3, %v5356_v43  ;;  %v1610_v4 = vmul.f32 0.044715, %v1602_v5  ;;  %v1603_v9 = vmul.f32 %v1595_v6, %v1585_v61 }
 0xab3   :  { %4706 = vtanh.f32 %v1624_v7  ;;  %v1604_v10 = vmul.f32 %v1596_v22, %v1587_v2 }
 0xab4   :  { %v1625_v1 = vmul.f32 0.7978846, %v1617_v28  ;;  %v1618_v24 = vadd.f32 %v1610_v4, %v5362_v54  ;;  %v1611_v11 = vmul.f32 0.044715, %v1603_v9 }
 0xab5   :  { %v1612_v14 = vmul.f32 0.044715, %v1604_v10  ;;  %v3841_v10 = vld [vmem:[%s5853_s17] ss:$0 sm:$0xff] }
 0xab6   :  { %4708 = vtanh.f32 %v1625_v1  ;;  %v1626_v12 = vmul.f32 0.7978846, %v1618_v24  ;;  %v1619_v18 = vadd.f32 %v1611_v11, %v1585_v61 }
 0xab7   :  { %v1620_v19 = vadd.f32 %v1612_v14, %v1587_v2 }
 0xab8   :  { %4710 = vtanh.f32 %v1626_v12  ;;  %v1627_v26 = vmul.f32 0.7978846, %v1619_v18 }
 0xab9   :  { %v1628_v27 = vmul.f32 0.7978846, %v1620_v19 }
 0xaba   :  { %4712 = vtanh.f32 %v1627_v26  ;;  %v4701_v29 = vpop.eup %4700 }
 0xabb   :  { %4714 = vtanh.f32 %v1628_v27  ;;  %v1637_v34 = vadd.f32 1.0, %v4701_v29 }
 0xabc   :  { %v4703_v31 = vpop.eup %4702 }
 0xabd   :  { %v1638_v32 = vadd.f32 1.0, %v4703_v31  ;;  %v1645_v44 = vmul.f32 0.5, %v1637_v34 }
 0xabe   :  { %v4705_v33 = vpop.eup %4704 }
 0xabf   :  { %v1639_v36 = vadd.f32 1.0, %v4705_v33  ;;  %v1646_v42 = vmul.f32 0.5, %v1638_v32  ;;  %v1653_v56 = vmul.f32 %v1645_v44, %v5336_v17 }
 0xac0   :  { %v4707_v38 = vpop.eup %4706 }
 0xac1   :  { %v1647_v40 = vmul.f32 0.5, %v1639_v36  ;;  %v1640_v41 = vadd.f32 1.0, %v4707_v38  ;;  %v1654_v52 = vmul.f32 %v1646_v42, %v5340_v21 }
 0xac3   :  { %v4709_v48 = vpop.eup %4708  ;;  %v1648_v49 = vmul.f32 0.5, %v1640_v41  ;;  %v1655_v50 = vmul.f32 %v1647_v40, %v5345_v30 }
 0xac4   :  { %v1641_v58 = vadd.f32 1.0, %v4709_v48 }
 0xac5   :  { %v4711_v51 = vpop.eup %4710  ;;  %v1656_v53 = vmul.f32 %v1648_v49, %v5350_v35  ;;  %v1661_v63 = vpack.c.bf16 %v1655_v50, %v1653_v56 }
 0xac6   :  { %v1642_v57 = vadd.f32 1.0, %v4711_v51  ;;  %v1649_v6 = vmul.f32 0.5, %v1641_v58 }
 0xac7   :  { %v4713_v59 = vpop.eup %4712  ;;  %v1662_v60 = vpack.c.bf16 %v1656_v53, %v1654_v52 }
 0xac8   :  { %v4715_v62 = vpop.eup %4714  ;;  %v1643_v0 = vadd.f32 1.0, %v4713_v59  ;;  %v1650_v5 = vmul.f32 0.5, %v1642_v57  ;;  %v1657_v17 = vmul.f32 %v1649_v6, %v5356_v43  ;;  %v4593_v6 = vld [vmem:[%s5844_s8 + $0x58] sm:$0xff]  }
 0xac9   :  { %1832 = vmatprep.mubr.bf16.mxu1 %v1662_v60  ;;  %v1644_v3 = vadd.f32 1.0, %v4715_v62  ;;  %4406 = vmatprep.subr.bf16.mxu1 %v4593_v6 }
 0xaca   :  { %1833 = vmatmul.mubr.bf16.vlgmr.msra.gmra.mxu1 %v1661_v63  ;;  %v1651_v30 = vmul.f32 0.5, %v1643_v0  ;;  %v1658_v21 = vmul.f32 %v1650_v5, %v5362_v54  ;;  %v4592_v5 = vld [vmem:[%s5873_s25 + $0x58] sm:$0xff]  }
 0xacb   :  { %v1652_v7 = vmul.f32 0.5, %v1644_v3  ;;  %4382 = vmatprep.subr.bf16.mxu0 %v4592_v5  ;;  %4407 = vmatpush3.bf16.msra.mxu1 %v4593_v6 }
 0xacc   :  { %v1659_v22 = vmul.f32 %v1651_v30, %v1585_v61  ;;  %4383 = vmatpush3.bf16.msra.mxu0 %v4592_v5  ;;  %v4594_v30 = vld [vmem:[%s5873_s25 + $0x50] sm:$0xff]  }
 0xacd   :  { %v1660_v35 = vmul.f32 %v1652_v7, %v1587_v2  ;;  %v4595_v7 = vld [vmem:[%s5844_s8 + $0x50] sm:$0xff]   ;;  %4384 = vmatprep.subr.bf16.mxu0 %v4594_v30 }
 0xace   :  { %v1663_v4 = vpack.c.bf16 %v1659_v22, %v1657_v17  ;;  %4408 = vmatprep.subr.bf16.mxu1 %v4595_v7  ;;  %v4596_v22 = vld [vmem:[%s5873_s25 + $0x48] sm:$0xff]   ;;  %v4599_v17 = vld [vmem:[%s5844_s8 + $0x40] sm:$0xff]  }
 0xacf   :  { %v1664_v28 = vpack.c.bf16 %v1660_v35, %v1658_v21  ;;  %4409 = vmatpush3.bf16.msra.mxu1 %v4595_v7  ;;  %v4597_v21 = vld [vmem:[%s5844_s8 + $0x48] sm:$0xff]   ;;  %v4598_v35 = vld [vmem:[%s5873_s25 + $0x40] sm:$0xff]  }
 0xad0   :  { %4385 = vmatpush3.bf16.msra.mxu0 %v4594_v30  ;;  %4410 = vmatprep.subr.bf16.mxu1 %v4597_v21 }
 0xad1   :  { %1840 = vmatprep.mubr.bf16.mxu1 %v1664_v28  ;;  %4386 = vmatprep.subr.bf16.mxu0 %v4596_v22  ;;  %v4600_v28 = vld [vmem:[%s5874_s27 + $0x58] sm:$0xff]  }
 0xad2   :  { %1841 = vmatmul.mubr.bf16.gmra.mxu1 %v1663_v4 }
 0xad3   :  { %4411 = vmatpush3.bf16.msra.mxu1 %v4597_v21 }
 0xad4   :  { %4387 = vmatpush3.bf16.msra.mxu0 %v4596_v22  ;;  %4412 = vmatprep.subr.bf16.mxu1 %v4599_v17 }
 0xad5   :  { %4388 = vmatprep.subr.bf16.mxu0 %v4598_v35 }
 0xad7   :  { %4413 = vmatpush3.bf16.msra.mxu1 %v4599_v17 }
 0xad8   :  { %4389 = vmatpush3.bf16.msra.mxu0 %v4598_v35  ;;  %4424 = vmatprep.subr.bf16.mxu1 %v4808_v8 }
 0xad9   :  { %4394 = vmatprep.subr.bf16.mxu0 %v4600_v28 }
 0xb8a   :  { %v4141_v9 = vpop.f32.mrf.mxu1 }
 0xb8c   :  { %v4142_v1 = vpop.f32.mrf.mxu1 }
 0xb8d   :  { %v4143_v24 = vadd.f32 %v4142_v1, %v4141_v9 }
 0xb8e   :  { %v4144_v11 = vpop.f32.mrf.mxu1 }
 0xb8f   :  { %v1835_v14 = vadd.f32 %v4143_v24, %v3841_v10 }
 0xb90   :  { %v4145_v12 = vpop.f32.mrf.mxu1 }
 0xb91   :  { %v5382_v61 = vadd.f32 %v1835_v14, %v5217_v37  ;;  %v4146_v54 = vadd.f32 %v4145_v12, %v4144_v11 }
 0xb92   :  { %v4147_v2 = vpop.f32.mrf.mxu1 }
 0xb93   :  { %v1838_v43 = vadd.f32 %v4146_v54, %v3841_v10  ;;  %v1857_v18 = vsel %vm146_vm0, %v5382_v61, 0.0 }
 0xb94   :  { %1858 = vadd.xlane.f32.xlu0 %v1857_v18  ;;  %v4148_v19 = vpop.f32.mrf.mxu1 }
 0xb95   :  { %v5387_v26 = vadd.f32 %v1838_v43, %v5229_v45  ;;  %v4149_v27 = vadd.f32 %v4148_v19, %v4147_v2 }
 0xb96   :  { %v4150_v29 = vpop.f32.mrf.mxu1 }
 0xb97   :  { %v1843_v31 = vadd.f32 %v4149_v27, %v3841_v10  ;;  %v1860_v32 = vsel %vm146_vm0, %v5387_v26, 0.0 }
 0xb98   :  { %1861 = vadd.xlane.f32.xlu1 %v1860_v32  ;;  %v4151_v37 = vpop.f32.mrf.mxu1 }
 0xb99   :  { %v5392_v33 = vadd.f32 %v1843_v31, %v5219_v39  ;;  %v4152_v34 = vadd.f32 %v4151_v37, %v4150_v29  ;;  %v3860_v29 = vld [vmem:[%s5875_s0 + $0x1] ss:$0 sm:$0xff] }
 0xb9b   :  { %v1846_v36 = vadd.f32 %v4152_v34, %v3841_v10  ;;  %v1863_v38 = vsel %vm146_vm0, %v5392_v33, 0.0  ;;  %v3861_v34 = vld [vmem:[%s5876_s5 + $0x1] ss:$0 sm:$0xff] }
 0xb9c   :  { %1864 = vadd.xlane.f32.xlu0 %v1863_v38 }
 0xb9d   :  { %v5397_v45 = vadd.f32 %v1846_v36, %v5231_v46 }
 0xb9f   :  { %v1866_v40 = vsel %vm146_vm0, %v5397_v45, 0.0 }
 0xba0   :  { %1867 = vadd.xlane.f32.xlu1 %v1866_v40 }
 0xc1d   :  { %v1859_v41 = vpop.xlane.xlu0 %1858 }
 0xc1e   :  { %v1869_v42 = vmul.f32 0.015625, %v1859_v41 }
 0xc20   :  { %v5402_v44 = vsub.f32 %v5382_v61, %v1869_v42 }
 0xc21   :  { %v1862_v39 = vpop.xlane.xlu1 %1861 }
 0xc22   :  { %v1870_v48 = vmul.f32 0.015625, %v1862_v39  ;;  %v1877_v49 = vmul.f32 %v5402_v44, %v5402_v44 }
 0xc24   :  { %v5407_v50 = vsub.f32 %v5387_v26, %v1870_v48  ;;  %v1881_v46 = vsel %vm146_vm0, %v1877_v49, 0.0 }
 0xc25   :  { %1882 = vadd.xlane.f32.xlu0 %v1881_v46  ;;  %v1865_v51 = vpop.xlane.xlu0 %1864 }
 0xc26   :  { %v1871_v52 = vmul.f32 0.015625, %v1865_v51  ;;  %v1878_v53 = vmul.f32 %v5407_v50, %v5407_v50 }
 0xc28   :  { %v5413_v56 = vsub.f32 %v5392_v33, %v1871_v52  ;;  %v1884_v57 = vsel %vm146_vm0, %v1878_v53, 0.0  ;;  %v4601_v53 = vld [vmem:[%s5874_s27 + $0x50] sm:$0xff]  }
 0xc29   :  { %1885 = vadd.xlane.f32.xlu1 %v1884_v57  ;;  %v1868_v58 = vpop.xlane.xlu1 %1867  ;;  %v4603_v57 = vld [vmem:[%s5874_s27 + $0x40] sm:$0xff]  }
 0xc2a   :  { %v1872_v59 = vmul.f32 0.015625, %v1868_v58  ;;  %v1879_v60 = vmul.f32 %v5413_v56, %v5413_v56 }
 0xc2c   :  { %v5419_v62 = vsub.f32 %v5397_v45, %v1872_v59  ;;  %v1887_v63 = vsel %vm146_vm0, %v1879_v60, 0.0 }
 0xc2d   :  { %1888 = vadd.xlane.f32.xlu0 %v1887_v63 }
 0xc2e   :  { %v1880_v0 = vmul.f32 %v5419_v62, %v5419_v62 }
 0xc30   :  { %v1890_v3 = vsel %vm146_vm0, %v1880_v0, 0.0 }
 0xc31   :  { %1891 = vadd.xlane.f32.xlu1 %v1890_v3  ;;  %v3887_v3 = vld [vmem:[%s5843_s7 + $0x2] ss:$0 sm:$0xff] }
 0xcae   :  { %v1883_v4 = vpop.xlane.xlu0 %1882 }
 0xcaf   :  { %v1893_v9 = vmul.f32 0.015625, %v1883_v4 }
 0xcb1   :  { %v1897_v10 = vadd.f32 1e-05, %v1893_v9 }
 0xcb2   :  { %v1886_v1 = vpop.xlane.xlu1 %1885 }
 0xcb3   :  { %4716 = vrsqrt.f32 %v1897_v10  ;;  %v1894_v24 = vmul.f32 0.015625, %v1886_v1  ;;  %v3871_v1 = vld [vmem:[%s5877_s24 + $0x2] ss:$0 sm:$0xff] }
 0xcb5   :  { %v1898_v11 = vadd.f32 1e-05, %v1894_v24  ;;  %v3903_v24 = vld [vmem:[%s5845_s9 + $0x2] ss:$0 sm:$0xff] }
 0xcb6   :  { %v1889_v14 = vpop.xlane.xlu0 %1888 }
 0xcb7   :  { %4718 = vrsqrt.f32 %v1898_v11  ;;  %v1895_v12 = vmul.f32 0.015625, %v1889_v14 }
 0xcb9   :  { %v1899_v54 = vadd.f32 1e-05, %v1895_v12 }
 0xcba   :  { %v1892_v2 = vpop.xlane.xlu1 %1891 }
 0xcbb   :  { %4720 = vrsqrt.f32 %v1899_v54  ;;  %v1896_v43 = vmul.f32 0.015625, %v1892_v2 }
 0xcbd   :  { %v1900_v18 = vadd.f32 1e-05, %v1896_v43 }
 0xcbf   :  { %4722 = vrsqrt.f32 %v1900_v18 }
 0xcc0   :  { %v4717_v19 = vpop.eup %4716 }
 0xcc1   :  { %v1905_v27 = vmul.f32 %v4717_v19, %v5402_v44 }
 0xcc3   :  { %v1915_v32 = vmul.f32 %v3860_v29, %v1905_v27 }
 0xcc4   :  { %v4719_v31 = vpop.eup %4718 }
 0xcc5   :  { %v1906_v37 = vmul.f32 %v4719_v31, %v5407_v50  ;;  %v1925_v41 = vadd.f32 %v3861_v34, %v1915_v32 }
 0xcc7   :  { %v1916_v36 = vmul.f32 %v3860_v29, %v1906_v37 }
 0xcc8   :  { %v4721_v38 = vpop.eup %4720 }
 0xcc9   :  { %v1907_v40 = vmul.f32 %v4721_v38, %v5413_v56  ;;  %v1926_v42 = vadd.f32 %v3861_v34, %v1916_v36  ;;  %v4602_v56 = vld [vmem:[%s5874_s27 + $0x48] sm:$0xff]  }
 0xccb   :  { %v5462_v39 = vpack.c.bf16 %v1926_v42, %v1925_v41  ;;  %v1917_v48 = vmul.f32 %v3860_v29, %v1907_v40 }
 0xccc   :  { %v4723_v44 = vpop.eup %4722 }
 0xccd   :  { %v1908_v49 = vmul.f32 %v4723_v44, %v5419_v62  ;;  %4390 = vmatprep.mubr.msk.bf16.mxu0 %vm146_vm0, %v5462_v39  ;;  %4414 = vmatprep.mubr.msk.bf16.mxu1 %vm146_vm0, %v5462_v39  ;;  %v1927_v46 = vadd.f32 %v3861_v34, %v1917_v48 }
 0xccf   :  { %v1918_v50 = vmul.f32 %v3860_v29, %v1908_v49 }
 0xcd1   :  { %v1928_v51 = vadd.f32 %v3861_v34, %v1918_v50 }
 0xcd3   :  { %v5469_v52 = vpack.c.bf16 %v1928_v51, %v1927_v46 }
 0xcd5   :  { %4391 = vmatmul.mubr.msk.bf16.vlgmr.msra.gmra.mxu0 %vm146_vm0, %v5469_v52  ;;  %4415 = vmatmul.mubr.msk.bf16.vlgmr.msra.gmra.mxu1 %vm146_vm0, %v5469_v52 }
 0xcd6   :  { %4395 = vmatpush3.bf16.msra.mxu0 %v4600_v28  ;;  %4402 = vmatprep.mubr.msk.bf16.mxu0 %vm146_vm0, %v5462_v39 }
 0xcd7   :  { %4396 = vmatprep.subr.bf16.mxu0 %v4601_v53  ;;  %4426 = vmatprep.mubr.msk.bf16.mxu1 %vm4809_vm1, %v4808_v8 }
 0xcda   :  { %4397 = vmatpush3.bf16.msra.mxu0 %v4601_v53 }
 0xcdb   :  { %4398 = vmatprep.subr.bf16.mxu0 %v4602_v56 }
 0xcde   :  { %4399 = vmatpush3.bf16.msra.mxu0 %v4602_v56 }
 0xcdf   :  { %4400 = vmatprep.subr.bf16.mxu0 %v4603_v57 }
 0xce2   :  { %4401 = vmatpush3.bf16.msra.mxu0 %v4603_v57 }
 0xce3   :  { %4418 = vmatprep.subr.bf16.mxu0 %v4808_v8 }
 0xce5   :  { %4403 = vmatmul.mubr.msk.bf16.vlgmr.msra.gmra.mxu0 %vm146_vm0, %v5469_v52 }
 0xce6   :  { %4420 = vmatprep.mubr.msk.bf16.mxu0 %vm4809_vm1, %v4808_v8 }
 0xd95   :  { %v4392_v58 = vpop.f32.mrf.mxu0  ;;  %v4416_v63 = vpop.f32.mrf.mxu1 }
 0xd96   :  { %v2021_v2 = vadd.f32 %v4392_v58, %v3871_v1  ;;  %v2201_v18 = vadd.f32 %v4416_v63, %v3903_v24 }
 0xd97   :  { %v2012_v59 = vpop.f32.mrf.mxu0  ;;  %v2192_v6 = vpop.f32.mrf.mxu1 }
 0xd98   :  { %v2013_v27 = vadd.f32 %v3871_v1, %v2012_v59  ;;  %v2193_v31 = vadd.f32 %v3903_v24, %v2192_v6 }
 0xd99   :  { %v4393_v60 = vpop.f32.mrf.mxu0  ;;  %v4417_v35 = vpop.f32.mrf.mxu1 }
 0xd9a   :  { %v2024_v11 = vadd.f32 %v4393_v60, %v3871_v1  ;;  %v2204_v54 = vadd.f32 %v4417_v35, %v3903_v24 }
 0xd9b   :  { %v2015_v62 = vpop.f32.mrf.mxu0  ;;  %v2195_v14 = vpop.f32.mrf.mxu1 }
 0xd9c   :  { %v2016_v43 = vadd.f32 %v3871_v1, %v2015_v62  ;;  %v2196_v19 = vadd.f32 %v3903_v24, %v2195_v14  ;;  %v2208_v29 = vpack.c.bf16 %v2024_v11, %v2021_v2  ;;  %v2212_v32 = vpack.c.bf16 %v2204_v54, %v2201_v18  ;;  %v4604_v14 = vld [vmem:[%s5874_s27 + $0x78] sm:$0xff]  }
 0xd9e   :  { %v2207_v37 = vpack.c.bf16 %v2016_v43, %v2013_v27  ;;  %v2211_v34 = vpack.c.bf16 %v2196_v19, %v2193_v31 }
 0xda5   :  { %v4404_v0 = vpop.f32.mrf.mxu0 }
 0xda6   :  { %v2111_v7 = vadd.f32 %v4404_v0, %v3887_v3 }
 0xda7   :  { %v2102_v5 = vpop.f32.mrf.mxu0 }
 0xda8   :  { %v2103_v17 = vadd.f32 %v3887_v3, %v2102_v5 }
 0xda9   :  { %v4405_v30 = vpop.f32.mrf.mxu0 }
 0xdaa   :  { %v2114_v22 = vadd.f32 %v4405_v30, %v3887_v3 }
 0xdab   :  { %v2105_v21 = vpop.f32.mrf.mxu0 }
 0xdac   :  { %v2210_v28 = vpack.c.bf16 %v2114_v22, %v2111_v7  ;;  %v2106_v4 = vadd.f32 %v3887_v3, %v2105_v21 }
 0xdae   :  { %v2209_v9 = vpack.c.bf16 %v2106_v4, %v2103_v17  ;;  %v2264_v10 = vsel %vm498_vm2, %v2210_v28, 0 }
 0xdaf   :  { %4425 = vmatpush3.bf16.xpose.msra.mxu1 %v2264_v10 }
 0xdb0   :  { %v2217_v12 = vsel %vm498_vm2, %v2209_v9, 0  ;;  %4436 = vmatprep.subr.bf16.mxu1 %v4808_v8 }
 0xdb1   :  { %4419 = vmatpush3.bf16.xpose.msra.mxu0 %v2217_v12  ;;  %v4605_v12 = vld [vmem:[%s5873_s25 + $0x78] sm:$0xff]  }
 0xdb2   :  { %4430 = vmatprep.subr.bf16.mxu0 %v4808_v8 }
 0xdb6   :  { %4427 = vmatmul.mubr.msk.bf16.vlgmr.msra.gmra.mxu1 %vm498_vm2, %v2208_v29 }
 0xdb7   :  { %4437 = vmatpush3.bf16.msra.mxu1 %v2212_v32  ;;  %4438 = vmatprep.mubr.msk.bf16.mxu1 %vm4809_vm1, %v4808_v8 }
 0xdb8   :  { %4421 = vmatmul.mubr.msk.bf16.vlgmr.msra.gmra.mxu0 %vm498_vm2, %v2207_v37  ;;  %4454 = vmatprep.subr.bf16.mxu1 %v4604_v14 }
 0xdb9   :  { %4431 = vmatpush3.bf16.msra.mxu0 %v2211_v34  ;;  %4432 = vmatprep.mubr.msk.bf16.mxu0 %vm4809_vm1, %v4808_v8  ;;  %v4606_v34 = vld [vmem:[%s5874_s27 + $0x70] sm:$0xff]  }
 0xdba   :  { %4442 = vmatprep.subr.bf16.mxu0 %v4605_v12 }
 0xe76   :  { %v2300_v36 = vpop.f32.mrf.mxu1 }
 0xe77   :  { %v2301_v38 = vadd.f32 %v2300_v36, %v5065_v15 }
 0xe78   :  { %v2253_v40 = vpop.f32.mrf.mxu0  ;;  %v4428_v41 = vpop.f32.mrf.mxu1 }
 0xe79   :  { %v2254_v42 = vadd.f32 %v2253_v40, %v5067_v16  ;;  %v2313_v44 = vsel %vm593_vm11, %v2301_v38, -inf }
 0xe7a   :  { %2314 = vmax.xlane.f32.xlu0 %v2313_v44  ;;  %v4422_v48 = vpop.f32.mrf.mxu0  ;;  %v2303_v49 = vpop.f32.mrf.mxu1  ;;  %v4608_v44 = vld [vmem:[%s5874_s27 + $0x68] sm:$0xff]  }
 0xe7b   :  { %v2304_v50 = vadd.f32 %v2303_v49, %v5070_v20  ;;  %v2307_v57 = vsel %vm593_vm11, %v2254_v42, -inf  ;;  %v4609_v48 = vld [vmem:[%s5873_s25 + $0x68] sm:$0xff]   ;;  %v4610_v49 = vld [vmem:[%s5874_s27 + $0x60] sm:$0xff]  }
 0xe7c   :  { %v2256_v46 = vpop.f32.mrf.mxu0  ;;  %v4429_v51 = vpop.f32.mrf.mxu1 }
 0xe7d   :  { %v2257_v53 = vadd.f32 %v2256_v46, %v5074_v23  ;;  %v2316_v56 = vsel %vm593_vm11, %v2304_v50, -inf  ;;  %v4612_v46 = vld [vmem:[%s5844_s8 + $0x78] sm:$0xff]   ;;  %v4613_v51 = vld [vmem:[%s5844_s8 + $0x70] sm:$0xff]  }
 0xe7e   :  { %2317 = vmax.xlane.f32.xlu1 %v2316_v56  ;;  %2308 = vmax.xlane.f32.xlu0 %v2307_v57  ;;  %v4423_v58 = vpop.f32.mrf.mxu0  ;;  %v4615_v56 = vld [vmem:[%s5844_s8 + $0x60] sm:$0xff]  }
 0xe7f   :  { %v2310_v59 = vsel %vm593_vm11, %v2257_v53, -inf }
 0xe82   :  { %2311 = vmax.xlane.f32.xlu1 %v2310_v59 }
 0xf03   :  { %v2315_v60 = vpop.xlane.xlu0 %2314 }
 0xf04   :  { %v2321_v62 = vsub.f32 %v2301_v38, %v2315_v60 }
 0xf06   :  { %v2327_v63 = vmul.f32 1.442695, %v2321_v62 }
 0xf07   :  { %v2318_v0 = vpop.xlane.xlu1 %2317  ;;  %v2309_v3 = vpop.xlane.xlu0 %2308 }
 0xf08   :  { %4724 = vpow2.f32 %v2327_v63  ;;  %v2322_v5 = vsub.f32 %v2304_v50, %v2318_v0  ;;  %v2319_v6 = vsub.f32 %v2254_v42, %v2309_v3  ;;  %v4607_v42 = vld [vmem:[%s5873_s25 + $0x70] sm:$0xff]   ;;  %v4611_v50 = vld [vmem:[%s5873_s25 + $0x60] sm:$0xff]  }
 0xf0a   :  { %v2329_v30 = vmul.f32 1.442695, %v2322_v5  ;;  %v2323_v7 = vmul.f32 1.442695, %v2319_v6 }
 0xf0b   :  { %v2312_v22 = vpop.xlane.xlu1 %2311 }
 0xf0c   :  { %4726 = vpow2.f32 %v2329_v30  ;;  %v2320_v21 = vsub.f32 %v2257_v53, %v2312_v22  ;;  %v4614_v53 = vld [vmem:[%s5844_s8 + $0x68] sm:$0xff]   ;;  %v3943_v22 = vld [vmem:[%s5843_s7 + $0x3] ss:$0 sm:$0xff] }
 0xf0d   :  { %4728 = vpow2.f32 %v2323_v7 }
 0xf0e   :  { %v2325_v35 = vmul.f32 1.442695, %v2320_v21 }
 0xf10   :  { %4730 = vpow2.f32 %v2325_v35 }
 0xf15   :  { %v4725_v17 = vpop.eup %4724 }
 0xf16   :  { %v2337_v28 = vsel %vm593_vm11, %v4725_v17, 0.0 }
 0xf17   :  { %2338 = vadd.xlane.f32.xlu0 %v2337_v28 }
 0xf19   :  { %v4727_v4 = vpop.eup %4726 }
 0xf1a   :  { %v4729_v9 = vpop.eup %4728  ;;  %v2340_v10 = vsel %vm593_vm11, %v4727_v4, 0.0 }
 0xf1b   :  { %v2331_v1 = vsel %vm593_vm11, %v4729_v9, 0.0  ;;  %2341 = vadd.xlane.f32.xlu1 %v2340_v10 }
 0xf1c   :  { %2332 = vadd.xlane.f32.xlu0 %v2331_v1 }
 0xf1d   :  { %v4731_v24 = vpop.eup %4730 }
 0xf1e   :  { %v2334_v11 = vsel %vm593_vm11, %v4731_v24, 0.0 }
 0xf1f   :  { %2335 = vadd.xlane.f32.xlu1 %v2334_v11  ;;  %v3927_v11 = vld [vmem:[%s5877_s24 + $0x3] ss:$0 sm:$0xff] }
 0xfa0   :  { %v2339_v54 = vpop.xlane.xlu0 %2338 }
 0xfa1   :  { %4732 = vrcp.f32 %v2339_v54 }
 0xfa4   :  { %v2342_v2 = vpop.xlane.xlu1 %2341 }
 0xfa5   :  { %v2333_v43 = vpop.xlane.xlu0 %2332  ;;  %4734 = vrcp.f32 %v2342_v2 }
 0xfa6   :  { %4736 = vrcp.f32 %v2333_v43 }
 0xfa8   :  { %v2336_v18 = vpop.xlane.xlu1 %2335 }
 0xfa9   :  { %4738 = vrcp.f32 %v2336_v18 }
 0xfae   :  { %v4733_v19 = vpop.eup %4732 }
 0xfaf   :  { %v2349_v29 = vmul.f32 %v4733_v19, %v4725_v17 }
 0xfb2   :  { %v4735_v27 = vpop.eup %4734 }
 0xfb3   :  { %v2350_v31 = vmul.f32 %v4735_v27, %v4727_v4  ;;  %v4737_v32 = vpop.eup %4736 }
 0xfb4   :  { %v2347_v38 = vmul.f32 %v4737_v32, %v4729_v9 }
 0xfb5   :  { %v2352_v37 = vpack.c.bf16 %v2350_v31, %v2349_v29  ;;  %v3959_v29 = vld [vmem:[%s5845_s9 + $0x3] ss:$0 sm:$0xff] }
 0xfb6   :  { %v4739_v36 = vpop.eup %4738 }
 0xfb7   :  { %4439 = vmatmul.mubr.msk.bf16.vlgmr.msra.gmra.mxu1 %vm593_vm11, %v2352_v37  ;;  %v2348_v40 = vmul.f32 %v4739_v36, %v4731_v24 }
 0xfb8   :  { %4455 = vmatpush3.bf16.msra.mxu1 %v4604_v14  ;;  %4462 = vmatprep.mubr.msk.bf16.mxu1 %vm146_vm0, %v5462_v39 }
 0xfb9   :  { %4456 = vmatprep.subr.bf16.mxu1 %v4606_v34  ;;  %v2351_v41 = vpack.c.bf16 %v2348_v40, %v2347_v38 }
 0xfbb   :  { %4433 = vmatmul.mubr.msk.bf16.vlgmr.msra.gmra.mxu0 %vm593_vm11, %v2351_v41 }
 0xfbc   :  { %4443 = vmatpush3.bf16.msra.mxu0 %v4605_v12  ;;  %4457 = vmatpush3.bf16.msra.mxu1 %v4606_v34 }
 0xfbd   :  { %4450 = vmatprep.mubr.msk.bf16.mxu0 %vm146_vm0, %v5462_v39  ;;  %4444 = vmatprep.subr.bf16.mxu0 %v4607_v42 }
 0xfbe   :  { %4458 = vmatprep.subr.bf16.mxu1 %v4608_v44 }
 0xfc0   :  { %4445 = vmatpush3.bf16.msra.mxu0 %v4607_v42  ;;  %4459 = vmatpush3.bf16.msra.mxu1 %v4608_v44 }
 0xfc1   :  { %4446 = vmatprep.subr.bf16.mxu0 %v4609_v48  ;;  %4460 = vmatprep.subr.bf16.mxu1 %v4610_v49 }
 0xfc4   :  { %4447 = vmatpush3.bf16.msra.mxu0 %v4609_v48  ;;  %4461 = vmatpush3.bf16.msra.mxu1 %v4610_v49 }
 0xfc5   :  { %4448 = vmatprep.subr.bf16.mxu0 %v4611_v50  ;;  %4478 = vmatprep.subr.bf16.mxu1 %v4808_v8 }
 0xfc7   :  { %4463 = vmatmul.mubr.msk.bf16.vlgmr.msra.gmra.mxu1 %vm146_vm0, %v5469_v52 }
 0xfc8   :  { %4449 = vmatpush3.bf16.msra.mxu0 %v4611_v50  ;;  %4480 = vmatprep.mubr.msk.bf16.mxu1 %vm4809_vm1, %v4808_v8 }
 0xfc9   :  { %4466 = vmatprep.subr.bf16.mxu0 %v4612_v46 }
 0xfcb   :  { %4451 = vmatmul.mubr.msk.bf16.vlgmr.msra.gmra.mxu0 %vm146_vm0, %v5469_v52 }
 0xfcc   :  { %4467 = vmatpush3.bf16.msra.mxu0 %v4612_v46  ;;  %4474 = vmatprep.mubr.msk.bf16.mxu0 %vm146_vm0, %v5462_v39 }
 0xfcd   :  { %4468 = vmatprep.subr.bf16.mxu0 %v4613_v51 }
 0xfd0   :  { %4469 = vmatpush3.bf16.msra.mxu0 %v4613_v51 }
 0xfd1   :  { %4470 = vmatprep.subr.bf16.mxu0 %v4614_v53 }
 0xfd4   :  { %4471 = vmatpush3.bf16.msra.mxu0 %v4614_v53 }
 0xfd5   :  { %4472 = vmatprep.subr.bf16.mxu0 %v4615_v56 }
 0xfd8   :  { %4473 = vmatpush3.bf16.msra.mxu0 %v4615_v56 }
 0xfd9   :  { %4490 = vmatprep.subr.bf16.mxu0 %v4808_v8 }
 0xfdb   :  { %4475 = vmatmul.mubr.msk.bf16.vlgmr.msra.gmra.mxu0 %vm146_vm0, %v5469_v52 }
 0xfdc   :  { %4492 = vmatprep.mubr.msk.bf16.mxu0 %vm4809_vm1, %v4808_v8 }
0x1077   :  { %v5580_v39 = vpop.f32.mrf.mxu1 }
0x1079   :  { %v4440_v57 = vpop.f32.mrf.mxu1 }
0x107b   :  { %v5582_v58 = vpop.f32.mrf.mxu0  ;;  %v5584_v59 = vpop.f32.mrf.mxu1 }
0x107c   :  { %v2442_v60 = vpack.c.bf16 %v5584_v59, %v5580_v39 }
0x107d   :  { %v4434_v62 = vpop.f32.mrf.mxu0  ;;  %v4441_v63 = vpop.f32.mrf.mxu1 }
0x107f   :  { %v5588_v0 = vpop.f32.mrf.mxu0 }
0x1080   :  { %v2441_v52 = vpack.c.bf16 %v5588_v0, %v5582_v58 }
0x1081   :  { %v4435_v3 = vpop.f32.mrf.mxu0 }
0x1087   :  { %v4464_v5 = vpop.f32.mrf.mxu1 }
0x1088   :  { %v2622_v14 = vadd.f32 %v4464_v5, %v3943_v22 }
0x1089   :  { %v2613_v6 = vpop.f32.mrf.mxu1 }
0x108a   :  { %v2614_v17 = vadd.f32 %v3943_v22, %v2613_v6 }
0x108b   :  { %v4452_v30 = vpop.f32.mrf.mxu0  ;;  %v4465_v7 = vpop.f32.mrf.mxu1 }
0x108c   :  { %v2625_v1 = vadd.f32 %v4465_v7, %v3943_v22  ;;  %v2532_v32 = vadd.f32 %v4452_v30, %v3927_v11 }
0x108d   :  { %v2523_v21 = vpop.f32.mrf.mxu0  ;;  %v2616_v35 = vpop.f32.mrf.mxu1 }
0x108e   :  { %v2617_v28 = vadd.f32 %v3943_v22, %v2616_v35  ;;  %v2721_v54 = vpack.c.bf16 %v2625_v1, %v2622_v14  ;;  %v2524_v2 = vadd.f32 %v3927_v11, %v2523_v21 }
0x108f   :  { %v4453_v4 = vpop.f32.mrf.mxu0 }
0x1090   :  { %v2720_v9 = vpack.c.bf16 %v2617_v28, %v2614_v17  ;;  %v2775_v18 = vsel %vm498_vm2, %v2721_v54, 0  ;;  %v2535_v27 = vadd.f32 %v4453_v4, %v3927_v11 }
0x1091   :  { %v2526_v10 = vpop.f32.mrf.mxu0 }
0x1092   :  { %v2728_v24 = vsel %vm498_vm2, %v2720_v9, 0  ;;  %v2527_v12 = vadd.f32 %v3927_v11, %v2526_v10  ;;  %v2719_v34 = vpack.c.bf16 %v2535_v27, %v2532_v32  ;;  %v4616_v27 = vld [vmem:[%s5846_s10 + $0x28] sm:$0xff]  }
0x1093   :  { %4479 = vmatpush3.bf16.xpose.msra.mxu1 %v2728_v24 }
0x1094   :  { %4484 = vmatprep.subr.bf16.mxu1 %v4808_v8  ;;  %v2718_v43 = vpack.c.bf16 %v2527_v12, %v2524_v2 }
0x109a   :  { %4481 = vmatmul.mubr.msk.bf16.vlgmr.msra.gmra.mxu1 %vm498_vm2, %v2718_v43 }
0x109b   :  { %v4476_v19 = vpop.f32.mrf.mxu0  ;;  %4485 = vmatpush3.bf16.xpose.msra.mxu1 %v2775_v18  ;;  %4486 = vmatprep.mubr.msk.bf16.mxu1 %vm4809_vm1, %v4808_v8 }
0x109c   :  { %4496 = vmatprep.subr.bf16.mxu1 %v4808_v8  ;;  %v2712_v36 = vadd.f32 %v4476_v19, %v3959_v29 }
0x109d   :  { %v2703_v31 = vpop.f32.mrf.mxu0 }
0x109e   :  { %v2704_v41 = vadd.f32 %v3959_v29, %v2703_v31 }
0x109f   :  { %v4477_v37 = vpop.f32.mrf.mxu0 }
0x10a0   :  { %v2715_v38 = vadd.f32 %v4477_v37, %v3959_v29 }
0x10a1   :  { %v2706_v40 = vpop.f32.mrf.mxu0 }
0x10a2   :  { %v2723_v42 = vpack.c.bf16 %v2715_v38, %v2712_v36  ;;  %v2707_v44 = vadd.f32 %v3959_v29, %v2706_v40  ;;  %4487 = vmatmul.mubr.msk.bf16.vlgmr.msra.gmra.mxu1 %vm498_vm2, %v2719_v34 }
0x10a3   :  { %4498 = vmatprep.mubr.msk.bf16.mxu1 %vm4809_vm1, %v4808_v8 }
0x10a4   :  { %v2722_v48 = vpack.c.bf16 %v2707_v44, %v2704_v41  ;;  %4497 = vmatpush3.bf16.msra.mxu1 %v2723_v42 }
0x10a5   :  { %4510 = vmatprep.subr.bf16.mxu1 %v4616_v27 }
0x10a6   :  { %4491 = vmatpush3.bf16.msra.mxu0 %v2722_v48 }
0x115a   :  { %v2764_v49 = vpop.f32.mrf.mxu1 }
0x115b   :  { %v2765_v50 = vadd.f32 %v2764_v49, %v5067_v16 }
0x115c   :  { %v4482_v46 = vpop.f32.mrf.mxu1 }
0x115d   :  { %v2818_v51 = vsel %vm593_vm11, %v2765_v50, -inf  ;;  %v4617_v46 = vld [vmem:[%s5846_s10 + $0x20] sm:$0xff]  }
0x115e   :  { %2819 = vmax.xlane.f32.xlu0 %v2818_v51  ;;  %v2767_v53 = vpop.f32.mrf.mxu1  ;;  %v4618_v51 = vld [vmem:[%s5846_s10 + $0x38] sm:$0xff]  }
0x115f   :  { %v2768_v56 = vadd.f32 %v2767_v53, %v5074_v23  ;;  %4502 = vmatprep.subr.bf16.mxu0 %v4618_v51  ;;  %v4619_v53 = vld [vmem:[%s5846_s10 + $0x30] sm:$0xff]  }
0x1160   :  { %v4483_v57 = vpop.f32.mrf.mxu1 }
0x1161   :  { %v2821_v62 = vsel %vm593_vm11, %v2768_v56, -inf }
0x1162   :  { %2822 = vmax.xlane.f32.xlu1 %v2821_v62  ;;  %v2811_v63 = vpop.f32.mrf.mxu1 }
0x1163   :  { %v2812_v3 = vadd.f32 %v2811_v63, %v5065_v15 }
0x1164   :  { %v4488_v5 = vpop.f32.mrf.mxu1 }
0x1165   :  { %v2824_v6 = vsel %vm593_vm11, %v2812_v3, -inf }
0x1166   :  { %2825 = vmax.xlane.f32.xlu0 %v2824_v6  ;;  %v2814_v30 = vpop.f32.mrf.mxu1 }
0x1167   :  { %v2815_v16 = vadd.f32 %v2814_v30, %v5070_v20 }
0x1168   :  { %v4489_v7 = vpop.f32.mrf.mxu1 }
0x1169   :  { %v2827_v22 = vsel %vm593_vm11, %v2815_v16, -inf }
0x116a   :  { %2828 = vmax.xlane.f32.xlu1 %v2827_v22 }
0x11e7   :  { %v2820_v21 = vpop.xlane.xlu0 %2819 }
0x11e8   :  { %v2830_v23 = vsub.f32 %v2765_v50, %v2820_v21 }
0x11ea   :  { %v2834_v35 = vmul.f32 1.442695, %v2830_v23 }
0x11eb   :  { %v2823_v17 = vpop.xlane.xlu1 %2822 }
0x11ec   :  { %4740 = vpow2.f32 %v2834_v35  ;;  %v2831_v28 = vsub.f32 %v2768_v56, %v2823_v17 }
0x11ee   :  { %v2836_v4 = vmul.f32 1.442695, %v2831_v28 }
0x11ef   :  { %v2826_v9 = vpop.xlane.xlu0 %2825 }
0x11f0   :  { %4742 = vpow2.f32 %v2836_v4  ;;  %v2832_v15 = vsub.f32 %v2812_v3, %v2826_v9  ;;  %v3983_v4 = vld [vmem:[%s5847_s11 + $0x1] ss:$0 sm:$0xff] }
0x11f2   :  { %v2838_v10 = vmul.f32 1.442695, %v2832_v15 }
0x11f3   :  { %v2829_v1 = vpop.xlane.xlu1 %2828 }
0x11f4   :  { %4744 = vpow2.f32 %v2838_v10  ;;  %v2833_v24 = vsub.f32 %v2815_v16, %v2829_v1 }
0x11f6   :  { %v2840_v11 = vmul.f32 1.442695, %v2833_v24 }
0x11f8   :  { %4746 = vpow2.f32 %v2840_v11 }
0x11f9   :  { %v4741_v20 = vpop.eup %4740 }
0x11fa   :  { %v2842_v14 = vsel %vm593_vm11, %v4741_v20, 0.0 }
0x11fb   :  { %2843 = vadd.xlane.f32.xlu0 %v2842_v14 }
0x11fd   :  { %v4743_v12 = vpop.eup %4742 }
0x11fe   :  { %v2845_v54 = vsel %vm593_vm11, %v4743_v12, 0.0 }
0x11ff   :  { %2846 = vadd.xlane.f32.xlu1 %v2845_v54 }
0x1201   :  { %v4745_v2 = vpop.eup %4744 }
0x1202   :  { %v2848_v43 = vsel %vm593_vm11, %v4745_v2, 0.0 }
0x1203   :  { %2849 = vadd.xlane.f32.xlu0 %v2848_v43 }
0x1205   :  { %v4747_v18 = vpop.eup %4746 }
0x1206   :  { %v2851_v19 = vsel %vm593_vm11, %v4747_v18, 0.0 }
0x1207   :  { %2852 = vadd.xlane.f32.xlu1 %v2851_v19 }
0x1284   :  { %v2844_v29 = vpop.xlane.xlu0 %2843 }
0x1285   :  { %4748 = vrcp.f32 %v2844_v29 }
0x1288   :  { %v2847_v31 = vpop.xlane.xlu1 %2846 }
0x1289   :  { %4750 = vrcp.f32 %v2847_v31 }
0x128c   :  { %v2850_v32 = vpop.xlane.xlu0 %2849 }
0x128d   :  { %4752 = vrcp.f32 %v2850_v32 }
0x1290   :  { %v2853_v37 = vpop.xlane.xlu1 %2852 }
0x1291   :  { %4754 = vrcp.f32 %v2853_v37 }
0x1292   :  { %v4749_v34 = vpop.eup %4748 }
0x1293   :  { %v2858_v38 = vmul.f32 %v4749_v34, %v4741_v20 }
0x1296   :  { %v4751_v36 = vpop.eup %4750 }
0x1297   :  { %v2859_v40 = vmul.f32 %v4751_v36, %v4743_v12 }
0x1299   :  { %v2862_v41 = vpack.c.bf16 %v2859_v40, %v2858_v38 }
0x129a   :  { %v4753_v42 = vpop.eup %4752 }
0x129b   :  { %4493 = vmatmul.mubr.msk.bf16.vlgmr.msra.gmra.mxu0 %vm593_vm11, %v2862_v41  ;;  %v2860_v48 = vmul.f32 %v4753_v42, %v4745_v2 }
0x129c   :  { %4503 = vmatpush3.bf16.msra.mxu0 %v4618_v51  ;;  %v4625_v51 = vld [vmem:[%s5850_s14 + $0x64] ss:$8 sps:$4 sm:$0xff]  }
0x129d   :  { %4504 = vmatprep.subr.bf16.mxu0 %v4619_v53 }
0x129e   :  { %v4755_v44 = vpop.eup %4754 }
0x129f   :  { %v2861_v49 = vmul.f32 %v4755_v44, %v4747_v18 }
0x12a0   :  { %4505 = vmatpush3.bf16.msra.mxu0 %v4619_v53  ;;  %v4623_v53 = vld [vmem:[%s5850_s14 + $0x60] ss:$8 sps:$4 sm:$0xff]  }
0x12a1   :  { %v2863_v50 = vpack.c.bf16 %v2861_v49, %v2860_v48 }
0x12a3   :  { %4499 = vmatmul.mubr.msk.bf16.vlgmr.msra.gmra.mxu1 %vm593_vm11, %v2863_v50  ;;  %v4622_v50 = vld [vmem:[%s5850_s14 + $0x74] ss:$8 sps:$4 sm:$0xff]  }
0x12a4   :  { %4511 = vmatpush3.bf16.msra.mxu1 %v4616_v27  ;;  %4514 = vmatprep.mubr.msk.bf16.mxu1 %vm498_vm2, %v2441_v52 }
0x12a5   :  { %4512 = vmatprep.subr.bf16.mxu1 %v4617_v46  ;;  %3263 = vmatprep.subr.bf16.mxu0 %v4622_v50 }
0x12a8   :  { %4513 = vmatpush3.bf16.msra.mxu1 %v4617_v46  ;;  %v4620_v46 = vld [vmem:[%s5850_s14 + $0x70] ss:$8 sps:$4 sm:$0xff]  }
0x12ab   :  { %4515 = vmatmul.mubr.msk.bf16.vlgmr.msra.gmra.mxu1 %vm498_vm2, %v2442_v60 }
0x135b   :  { %v2901_v58 = vpop.f32.mrf.mxu0 }
0x135d   :  { %v4494_v0 = vpop.f32.mrf.mxu0 }
0x135e   :  { %v4626_v0 = vld [vmem:[%s5850_s14 + $0x50] ss:$8 sps:$4 sm:$0xff]  }
0x135f   :  { %v2904_v52 = vpop.f32.mrf.mxu0 }
0x1360   :  { %v2952_v56 = vpack.c.bf16 %v2904_v52, %v2901_v58  ;;  %v4628_v58 = vld [vmem:[%s5850_s14 + $0x54] ss:$8 sps:$4 sm:$0xff]   ;;  %v4631_v52 = vld [vmem:[%s5850_s14 + $0x44] ss:$8 sps:$4 sm:$0xff]  }
0x1361   :  { %v4495_v57 = vpop.f32.mrf.mxu0 }
0x1362   :  { %4506 = vmatprep.mubr.msk.bf16.mxu0 %vm498_vm2, %v2952_v56  ;;  %v4629_v56 = vld [vmem:[%s5850_s14 + $0x40] ss:$8 sps:$4 sm:$0xff]  }
0x1363   :  { %v2945_v39 = vpop.f32.mrf.mxu1 }
0x1365   :  { %v4500_v59 = vpop.f32.mrf.mxu1 }
0x1367   :  { %v2948_v60 = vpop.f32.mrf.mxu1 }
0x1368   :  { %v2953_v62 = vpack.c.bf16 %v2948_v60, %v2945_v39 }
0x1369   :  { %v4501_v63 = vpop.f32.mrf.mxu1 }
0x136a   :  { %4507 = vmatmul.mubr.msk.bf16.vlgmr.msra.gmra.mxu0 %vm498_vm2, %v2953_v62 }
0x136b   :  { %3287 = vmatprep.mubr.bf16.mxu0 %v4812_v13  ;;  %v4516_v3 = vpop.f32.mrf.mxu1  ;;  %3264 = vmatpush1.bf16.msra.mxu0 %v4620_v46 }
0x136c   :  { %3265 = vmatprep.subr.bf16.mxu0 %v4625_v51 }
0x136d   :  { %v3078_v5 = vpop.f32.mrf.mxu1 }
0x136f   :  { %v4517_v16 = vpop.f32.mrf.mxu1  ;;  %3266 = vmatpush1.bf16.msra.mxu0 %v4623_v53 }
0x1370   :  { %3267 = vmatprep.subr.bf16.mxu0 %v4628_v58 }
0x1371   :  { %v3081_v28 = vpop.f32.mrf.mxu1 }
0x1373   :  { %3268 = vmatpush1.bf16.msra.mxu0 %v4626_v0 }
0x1374   :  { %3269 = vmatprep.subr.bf16.mxu0 %v4631_v52 }
0x1377   :  { %3270 = vmatpush1.bf16.msra.mxu0 %v4629_v56 }
0x1378   :  { %4518 = vmatprep.subr.bf16.mxu0 %v4808_v8 }
0x142a   :  { %v4508_v6 = vpop.f32.mrf.mxu0 }
0x142b   :  { %v3087_v30 = vadd.f32 %v4516_v3, %v4508_v6 }
0x142c   :  { %v3011_v7 = vpop.f32.mrf.mxu0 }
0x142d   :  { %v3079_v22 = vadd.f32 %v3078_v5, %v3011_v7  ;;  %v3095_v23 = vadd.f32 %v3087_v30, %v5392_v33 }
0x142e   :  { %v4509_v21 = vpop.f32.mrf.mxu0 }
0x142f   :  { %v3093_v35 = vadd.f32 %v3079_v22, %v5382_v61  ;;  %v3090_v17 = vadd.f32 %v4517_v16, %v4509_v21  ;;  %v3107_v20 = vadd.f32 %v3983_v4, %v3095_v23  ;;  %v3986_v23 = vld [vmem:[%s5848_s12 + $0x1] ss:$0 sm:$0xff] }
0x1430   :  { %v3014_v9 = vpop.f32.mrf.mxu0 }
0x1431   :  { %v3082_v15 = vadd.f32 %v3081_v28, %v3014_v9  ;;  %v3105_v10 = vadd.f32 %v3983_v4, %v3093_v35  ;;  %v3096_v1 = vadd.f32 %v3090_v17, %v5397_v45  ;;  %v3119_v12 = vsel %vm146_vm0, %v3107_v20, 0.0  ;;  %v3987_v9 = vld [vmem:[%s5849_s13 + $0x1] ss:$0 sm:$0xff] }
0x1433   :  { %v3094_v24 = vadd.f32 %v3082_v15, %v5387_v26  ;;  %v3113_v11 = vsel %vm146_vm0, %v3105_v10, 0.0  ;;  %v5658_v61 = vadd.f32 %v3983_v4, %v3096_v1 }
0x1434   :  { %3114 = vadd.xlane.f32.xlu0 %v3113_v11 }
0x1435   :  { %v5656_v33 = vadd.f32 %v3983_v4, %v3094_v24  ;;  %v3122_v45 = vsel %vm146_vm0, %v5658_v61, 0.0 }
0x1437   :  { %v3116_v14 = vsel %vm146_vm0, %v5656_v33, 0.0 }
0x1438   :  { %3117 = vadd.xlane.f32.xlu1 %v3116_v14  ;;  %3120 = vadd.xlane.f32.xlu0 %v3119_v12 }
0x143c   :  { %3123 = vadd.xlane.f32.xlu1 %v3122_v45 }
0x14bd   :  { %v3115_v26 = vpop.xlane.xlu0 %3114 }
0x14be   :  { %v3125_v54 = vmul.f32 0.015625, %v3115_v26 }
0x14c0   :  { %v3129_v2 = vsub.f32 %v3105_v10, %v3125_v54 }
0x14c1   :  { %v3118_v43 = vpop.xlane.xlu1 %3117  ;;  %v3121_v18 = vpop.xlane.xlu0 %3120 }
0x14c2   :  { %v3126_v19 = vmul.f32 0.015625, %v3118_v43  ;;  %v3127_v27 = vmul.f32 0.015625, %v3121_v18  ;;  %v3133_v29 = vmul.f32 %v3129_v2, %v3129_v2  ;;  %v4632_v43 = vld [vmem:[%s5852_s16 + $0xf8] sm:$0xff]  }
0x14c3   :  { %v4633_v18 = vld [vmem:[%s5852_s16 + $0xb8] sm:$0xff]   ;;  %4213 = vmatprep.subr.bf16.mxu1 %v4632_v43 }
0x14c4   :  { %v3130_v31 = vsub.f32 %v5656_v33, %v3126_v19  ;;  %v3131_v32 = vsub.f32 %v3107_v20, %v3127_v27  ;;  %v3137_v37 = vsel %vm146_vm0, %v3133_v29, 0.0  ;;  %4214 = vmatpush3.bf16.msra.mxu1 %v4633_v18  ;;  %v4635_v19 = vld [vmem:[%s5852_s16 + $0xb0] sm:$0xff]   ;;  %v4636_v27 = vld [vmem:[%s5852_s16 + $0xe8] sm:$0xff]  }
0x14c5   :  { %v3124_v34 = vpop.xlane.xlu1 %3123  ;;  %3138 = vadd.xlane.f32.xlu0 %v3137_v37  ;;  %v4637_v29 = vld [vmem:[%s5852_s16 + $0xa8] sm:$0xff]   ;;  %v4640_v37 = vld [vmem:[%s5852_s16 + $0xd8] sm:$0xff]  }
0x14c6   :  { %v3128_v36 = vmul.f32 0.015625, %v3124_v34  ;;  %v3134_v38 = vmul.f32 %v3130_v31, %v3130_v31  ;;  %v3135_v40 = vmul.f32 %v3131_v32, %v3131_v32  ;;  %v4641_v34 = vld [vmem:[%s5852_s16 + $0x98] sm:$0xff]  }
0x14c8   :  { %v3132_v41 = vsub.f32 %v5658_v61, %v3128_v36  ;;  %v3140_v42 = vsel %vm146_vm0, %v3134_v38, 0.0  ;;  %v3143_v44 = vsel %vm146_vm0, %v3135_v40, 0.0  ;;  %v4642_v36 = vld [vmem:[%s5852_s16 + $0xd0] sm:$0xff]   ;;  %v4644_v40 = vld [vmem:[%s5852_s16 + $0xc8] sm:$0xff]  }
0x14c9   :  { %3141 = vadd.xlane.f32.xlu1 %v3140_v42  ;;  %3144 = vadd.xlane.f32.xlu0 %v3143_v44  ;;  %v4643_v38 = vld [vmem:[%s5852_s16 + $0x90] sm:$0xff]   ;;  %v4646_v42 = vld [vmem:[%s5852_s16 + $0xc0] sm:$0xff]  }
0x14ca   :  { %v3136_v48 = vmul.f32 %v3132_v41, %v3132_v41  ;;  %v4647_v44 = vld [vmem:[%s5852_s16 + $0x80] sm:$0xff]  }
0x14cc   :  { %v3146_v49 = vsel %vm146_vm0, %v3136_v48, 0.0  ;;  %v3996_v48 = vld [vmem:[%s5851_s15 + $0x2] sm:$0x3] }
0x14cd   :  { %3147 = vadd.xlane.f32.xlu1 %v3146_v49  ;;  %v3202_v49 = vrot.slane %v3996_v48, %v5054_v55  ;;  %v3206_v50 = vrot.slane %v3996_v48, %v1486_v25 }
0x154e   :  { %v3139_v57 = vpop.xlane.xlu0 %3138 }
0x154f   :  { %v3149_v39 = vmul.f32 0.015625, %v3139_v57 }
0x1551   :  { %v3153_v59 = vadd.f32 1e-05, %v3149_v39 }
0x1552   :  { %v3142_v60 = vpop.xlane.xlu1 %3141  ;;  %v3145_v62 = vpop.xlane.xlu0 %3144 }
0x1553   :  { %4756 = vrsqrt.f32 %v3153_v59  ;;  %v3150_v63 = vmul.f32 0.015625, %v3142_v60  ;;  %v3151_v3 = vmul.f32 0.015625, %v3145_v62 }
0x1555   :  { %v3154_v5 = vadd.f32 1e-05, %v3150_v63  ;;  %v3155_v6 = vadd.f32 1e-05, %v3151_v3 }
0x1556   :  { %v3148_v30 = vpop.xlane.xlu1 %3147 }
0x1557   :  { %4758 = vrsqrt.f32 %v3154_v5  ;;  %v3152_v16 = vmul.f32 0.015625, %v3148_v30 }
0x1558   :  { %4760 = vrsqrt.f32 %v3155_v6 }
0x1559   :  { %v3156_v7 = vadd.f32 1e-05, %v3152_v16 }
0x155b   :  { %4762 = vrsqrt.f32 %v3156_v7 }
0x1560   :  { %v4757_v22 = vpop.eup %4756 }
0x1561   :  { %v3161_v21 = vmul.f32 %v4757_v22, %v3129_v2 }
0x1563   :  { %v3171_v28 = vmul.f32 %v3986_v23, %v3161_v21 }
0x1564   :  { %v4759_v35 = vpop.eup %4758 }
0x1565   :  { %v3162_v17 = vmul.f32 %v4759_v35, %v3130_v31  ;;  %v4761_v4 = vpop.eup %4760  ;;  %v3181_v1 = vadd.f32 %v3987_v9, %v3171_v28  ;;  %v4638_v31 = vld [vmem:[%s5852_s16 + $0xe0] sm:$0xff]  }
0x1566   :  { %v3163_v11 = vmul.f32 %v4761_v4, %v3131_v32  ;;  %v4639_v32 = vld [vmem:[%s5852_s16 + $0xa0] sm:$0xff]  }
0x1567   :  { %v3172_v15 = vmul.f32 %v3986_v23, %v3162_v17 }
0x1568   :  { %v4763_v10 = vpop.eup %4762  ;;  %v3173_v45 = vmul.f32 %v3986_v23, %v3163_v11 }
0x1569   :  { %v3182_v24 = vadd.f32 %v3987_v9, %v3172_v15  ;;  %v3164_v20 = vmul.f32 %v4763_v10, %v3132_v41  ;;  %v4645_v41 = vld [vmem:[%s5852_s16 + $0x88] sm:$0xff]  }
0x156a   :  { %v3183_v54 = vadd.f32 %v3987_v9, %v3173_v45 }
0x156b   :  { %v3185_v14 = vpack.c.bf16 %v3182_v24, %v3181_v1  ;;  %v3174_v12 = vmul.f32 %v3986_v23, %v3164_v20 }
0x156d   :  { %4005 = vmatmul.mubr.msk.bf16.vlgmr.msra.gmra.mxu0 %vm146_vm0, %v3185_v14  ;;  %v3184_v26 = vadd.f32 %v3987_v9, %v3174_v12 }
0x156e   :  { %3297 = vmatprep.mubr.bf16.mxu0 %v4812_v13  ;;  %v4634_v13 = vld [vmem:[%s5852_s16 + $0xf0] sm:$0xff]  }
0x156f   :  { %v3186_v2 = vpack.c.bf16 %v3184_v26, %v3183_v54  ;;  %4215 = vmatprep.subr.bf16.mxu1 %v4634_v13 }
0x1570   :  { %4216 = vmatpush3.bf16.msra.mxu1 %v4635_v19 }
0x1571   :  { %4217 = vmatprep.subr.bf16.mxu1 %v4636_v27 }
0x1574   :  { %4218 = vmatpush3.bf16.msra.mxu1 %v4637_v29 }
0x1575   :  { %4006 = vmatmul.mubr.msk.bf16.gmra.mxu0 %vm146_vm0, %v3186_v2  ;;  %4219 = vmatprep.subr.bf16.mxu1 %v4638_v31 }
0x1576   :  { %4526 = vmatprep.mubr.msk.bf16.mxu0 %vm4809_vm1, %v4808_v8 }
0x1578   :  { %4220 = vmatpush3.bf16.msra.mxu1 %v4639_v32 }
0x1579   :  { %4221 = vmatprep.subr.bf16.mxu1 %v4640_v37 }
0x157c   :  { %4222 = vmatpush3.bf16.msra.mxu1 %v4641_v34 }
0x157d   :  { %4223 = vmatprep.subr.bf16.mxu1 %v4642_v36 }
0x1580   :  { %4224 = vmatpush3.bf16.msra.mxu1 %v4643_v38 }
0x1581   :  { %4225 = vmatprep.subr.bf16.mxu1 %v4644_v40 }
0x1584   :  { %4226 = vmatpush3.bf16.msra.mxu1 %v4645_v41 }
0x1585   :  { %4227 = vmatprep.subr.bf16.mxu1 %v4646_v42 }
0x1588   :  { %4228 = vmatpush3.bf16.msra.mxu1 %v4647_v44 }
0x162d   :  { %v3289_v46 = vpop.f32.mrf.mxu0 }
0x162e   :  { %v5761_v51 = vadd.f32 %v3289_v46, %v3202_v49 }
0x162f   :  { %v3291_v53 = vpop.f32.mrf.mxu0 }
0x1630   :  { %v3308_v58 = vmul.f32 %v5761_v51, %v5761_v51  ;;  %v5765_v0 = vadd.f32 %v3291_v53, %v3206_v50 }
0x1631   :  { %v3293_v52 = vpop.f32.mrf.mxu0 }
0x1632   :  { %v3316_v56 = vmul.f32 %v3308_v58, %v5761_v51  ;;  %v3309_v57 = vmul.f32 %v5765_v0, %v5765_v0  ;;  %v5770_v39 = vadd.f32 %v3293_v52, %v3202_v49 }
0x1633   :  { %v3295_v55 = vpop.f32.mrf.mxu0 }
0x1634   :  { %v3324_v47 = vmul.f32 0.044715, %v3316_v56  ;;  %v3317_v25 = vmul.f32 %v3309_v57, %v5765_v0  ;;  %v3310_v59 = vmul.f32 %v5770_v39, %v5770_v39  ;;  %v5775_v60 = vadd.f32 %v3295_v55, %v3206_v50 }
0x1635   :  { %v3299_v62 = vpop.f32.mrf.mxu0 }
0x1636   :  { %v3332_v63 = vadd.f32 %v3324_v47, %v5761_v51  ;;  %v3325_v3 = vmul.f32 0.044715, %v3317_v25  ;;  %v3318_v5 = vmul.f32 %v3310_v59, %v5770_v39  ;;  %v3311_v6 = vmul.f32 %v5775_v60, %v5775_v60 }
0x1637   :  { %v5781_v30 = vadd.f32 %v3299_v62, %v3202_v49  ;;  %v3301_v16 = vpop.f32.mrf.mxu0 }
0x1638   :  { %v3340_v7 = vmul.f32 0.7978846, %v3332_v63  ;;  %v3333_v22 = vadd.f32 %v3325_v3, %v5765_v0  ;;  %v3326_v21 = vmul.f32 0.044715, %v3318_v5  ;;  %v3319_v23 = vmul.f32 %v3311_v6, %v5775_v60 }
0x1639   :  { %v3312_v35 = vmul.f32 %v5781_v30, %v5781_v30  ;;  %v5787_v17 = vadd.f32 %v3301_v16, %v3206_v50  ;;  %v3303_v28 = vpop.f32.mrf.mxu0 }
0x163a   :  { %v3341_v4 = vmul.f32 0.7978846, %v3333_v22  ;;  %v3334_v9 = vadd.f32 %v3326_v21, %v5770_v39  ;;  %v3327_v15 = vmul.f32 0.044715, %v3319_v23  ;;  %4764 = vtanh.f32 %v3340_v7 }
0x163b   :  { %v3320_v10 = vmul.f32 %v3312_v35, %v5781_v30  ;;  %v3313_v1 = vmul.f32 %v5787_v17, %v5787_v17  ;;  %v3304_v24 = vadd.f32 %v3303_v28, %v3202_v49  ;;  %v3305_v11 = vpop.f32.mrf.mxu0 }
0x163c   :  { %4766 = vtanh.f32 %v3341_v4  ;;  %v3342_v20 = vmul.f32 0.7978846, %v3334_v9  ;;  %v3335_v14 = vadd.f32 %v3327_v15, %v5775_v60  ;;  %v3306_v12 = vadd.f32 %v3305_v11, %v3206_v50 }
0x163d   :  { %v3328_v45 = vmul.f32 0.044715, %v3320_v10  ;;  %v3321_v26 = vmul.f32 %v3313_v1, %v5787_v17  ;;  %v3314_v54 = vmul.f32 %v3304_v24, %v3304_v24 }
0x163e   :  { %4768 = vtanh.f32 %v3342_v20  ;;  %v3343_v2 = vmul.f32 0.7978846, %v3335_v14  ;;  %v3315_v43 = vmul.f32 %v3306_v12, %v3306_v12 }
0x163f   :  { %v3336_v18 = vadd.f32 %v3328_v45, %v5781_v30  ;;  %v3329_v13 = vmul.f32 0.044715, %v3321_v26  ;;  %v3322_v19 = vmul.f32 %v3314_v54, %v3304_v24 }
0x1640   :  { %4770 = vtanh.f32 %v3343_v2  ;;  %v3323_v27 = vmul.f32 %v3315_v43, %v3306_v12 }
0x1641   :  { %v3344_v29 = vmul.f32 0.7978846, %v3336_v18  ;;  %v3337_v31 = vadd.f32 %v3329_v13, %v5787_v17  ;;  %v3330_v32 = vmul.f32 0.044715, %v3322_v19 }
0x1642   :  { %v3331_v37 = vmul.f32 0.044715, %v3323_v27 }
0x1643   :  { %4772 = vtanh.f32 %v3344_v29  ;;  %v3345_v34 = vmul.f32 0.7978846, %v3337_v31  ;;  %v3338_v36 = vadd.f32 %v3330_v32, %v3304_v24 }
0x1644   :  { %v3339_v38 = vadd.f32 %v3331_v37, %v3306_v12 }
0x1645   :  { %4774 = vtanh.f32 %v3345_v34  ;;  %v3346_v40 = vmul.f32 0.7978846, %v3338_v36 }
0x1646   :  { %v3347_v41 = vmul.f32 0.7978846, %v3339_v38 }
0x1647   :  { %4776 = vtanh.f32 %v3346_v40  ;;  %v4765_v42 = vpop.eup %4764 }
0x1648   :  { %4778 = vtanh.f32 %v3347_v41  ;;  %v3356_v50 = vadd.f32 1.0, %v4765_v42 }
0x1649   :  { %v4767_v44 = vpop.eup %4766 }
0x164a   :  { %v3357_v48 = vadd.f32 1.0, %v4767_v44  ;;  %v3364_v57 = vmul.f32 0.5, %v3356_v50  ;;  %v4651_v50 = vld [vmem:[%s5856_s20] sm:$0xff]  }
0x164b   :  { %v4769_v49 = vpop.eup %4768 }
0x164c   :  { %v3358_v46 = vadd.f32 1.0, %v4769_v49  ;;  %v3365_v56 = vmul.f32 0.5, %v3357_v48  ;;  %v3372_v3 = vmul.f32 %v3364_v57, %v5761_v51  ;;  %v4650_v49 = vld [vmem:[%s5856_s20 + $0x8] sm:$0xff]  }
0x164d   :  { %v4771_v53 = vpop.eup %4770 }
0x164e   :  { %v3366_v58 = vmul.f32 0.5, %v3358_v46  ;;  %v3359_v52 = vadd.f32 1.0, %v4771_v53  ;;  %v3373_v62 = vmul.f32 %v3365_v56, %v5765_v0  ;;  %v4057_v56 = vld [vmem:[%s5854_s18] ss:$0 sm:$0xff] }
0x1650   :  { %v4773_v55 = vpop.eup %4772  ;;  %v3367_v47 = vmul.f32 0.5, %v3359_v52  ;;  %v3374_v25 = vmul.f32 %v3366_v58, %v5770_v39 }
0x1651   :  { %v3360_v6 = vadd.f32 1.0, %v4773_v55 }
0x1652   :  { %v4775_v59 = vpop.eup %4774  ;;  %v3375_v63 = vmul.f32 %v3367_v47, %v5775_v60  ;;  %v3380_v21 = vpack.c.bf16 %v3374_v25, %v3372_v3  ;;  %v4058_v47 = vld [vmem:[%s5855_s19] ss:$0 sm:$0xff]  ;;  %s4813_s19 = smov [#allocation2]  }
0x1653   :  { %v3361_v5 = vadd.f32 1.0, %v4775_v59  ;;  %v3368_v4 = vmul.f32 0.5, %v3360_v6  ;;  %s3724_s10 = sshll.u32 %s4813_s19, 4  ;;  %s3725_s10 = int_to_ptr.vmem [resolvable:$true] %s3724_s10 }
0x1654   :  { %v4777_v16 = vpop.eup %4776  ;;  %v3381_v7 = vpack.c.bf16 %v3375_v63, %v3373_v62  ;;  %s4786_s12 = scalar_lea.vmem %s3725_s10, 32  ;;  %p4791_p1 = scmp.lt.s32.totalorder %s3725_s10, %s3725_s10 }
0x1655   :  { %v4779_v22 = vpop.eup %4778  ;;  %v3362_v23 = vadd.f32 1.0, %v4777_v16  ;;  %v3369_v28 = vmul.f32 0.5, %v3361_v5  ;;  %v3376_v51 = vmul.f32 %v3368_v4, %v5781_v30  ;;  %p4787_p0 = scmp.ne.s32.totalorder %s3725_s10, %s4786_s12  ;;  %p4792_p2 = scmp.lt.s32.totalorder %s4786_s12, %s4786_s12 }
0x1656   :  { %3553 = vmatprep.mubr.bf16.mxu1 %v3381_v7  ;;  %v3363_v35 = vadd.f32 1.0, %v4779_v22 }
0x1657   :  { %3554 = vmatmul.mubr.bf16.vlgmr.msra.gmra.mxu1 %v3380_v21  ;;  %v3370_v39 = vmul.f32 0.5, %v3362_v23  ;;  %v3377_v0 = vmul.f32 %v3369_v28, %v5787_v17  ;;  %p4793_p3 = por %p4792_p2, %p4791_p1 }
0x1658   :  { %v3371_v9 = vmul.f32 0.5, %v3363_v35  ;;  %v4059_v35 = vld [vmem:[%s5857_s21] ss:$0 sm:$0xff] }
0x1659   :  { %v3378_v15 = vmul.f32 %v3370_v39, %v3304_v24  ;;  %v4040_v24 = vld [vmem:[%s5853_s17 + $0x1] ss:$0 sm:$0xff]  ;;  %p4794_p4 = pnand %p4793_p3, %p4787_p0 }
0x165a   :  { %v3379_v60 = vmul.f32 %v3371_v9, %v3306_v12 }
0x165b   :  { %v3382_v1 = vpack.c.bf16 %v3378_v15, %v3376_v51 }
0x165c   :  { %v3383_v10 = vpack.c.bf16 %v3379_v60, %v3377_v0 }
0x165e   :  { %3560 = vmatprep.mubr.bf16.mxu1 %v3383_v10 }
0x165f   :  { %3561 = vmatmul.mubr.bf16.gmra.mxu1 %v3382_v1 }
0x1717   :  { %v4229_v11 = vpop.f32.mrf.mxu1 }
0x1719   :  { %v4230_v20 = vpop.f32.mrf.mxu1 }
0x171b   :  { %v4232_v14 = vpop.f32.mrf.mxu1 }
0x171d   :  { %v4233_v45 = vpop.f32.mrf.mxu1 }
0x171e   :  { %v4234_v43 = vadd.f32 %v4233_v45, %v4232_v14 }
0x171f   :  { %v4235_v26 = vpop.f32.mrf.mxu1 }
0x1720   :  { %v3558_v18 = vadd.f32 %v4234_v43, %v4040_v24 }
0x1721   :  { %v4236_v54 = vpop.f32.mrf.mxu1 }
0x1722   :  { %v3568_v19 = vadd.f32 %v3558_v18, %v5656_v33  ;;  %v4648_v33 = vld [vmem:[%s5856_s20 + $0x18] sm:$0xff]  }
0x1723   :  { %v4238_v2 = vpop.f32.mrf.mxu1  ;;  %4519 = vmatpush3.bf16.msra.mxu0 %v4648_v33 }
0x1724   :  { %4520 = vmatprep.subr.bf16.mxu0 %v4808_v8 }
0x1725   :  { %v4239_v17 = vpop.f32.mrf.mxu1 }
0x1726   :  { %v4240_v12 = vadd.f32 %v4239_v17, %v4238_v2 }
0x1728   :  { %v3565_v30 = vadd.f32 %v4240_v12, %v4040_v24 }
0x172a   :  { %v3569_v13 = vadd.f32 %v3565_v30, %v5658_v61  ;;  %v4649_v61 = vld [vmem:[%s5856_s20 + $0x10] sm:$0xff]  }
0x172b   :  { %4521 = vmatpush3.bf16.msra.mxu0 %v4649_v61 }
0x172c   :  { %v3574_v27 = vrot.slane %v3569_v13, 7  ;;  %4522 = vmatprep.subr.bf16.mxu0 %v4808_v8 }
0x172e   :  { %v3576_v29 = vsel %vm3575_vm12, %v3574_v27, %v3568_v19 }
0x172f   :  { %v3579_v31 = vsel %vm3578_vm13, %v3576_v29, 0.0  ;;  %4523 = vmatpush3.bf16.msra.mxu0 %v4650_v49 }
0x1730   :  { %3580 = vadd.xlane.f32.xlu0 %v3579_v31  ;;  %4524 = vmatprep.subr.bf16.mxu0 %v4808_v8 }
0x1733   :  { %4525 = vmatpush3.bf16.msra.mxu0 %v4651_v50 }
0x17b9   :  { %v3581_v32 = vpop.xlane.xlu0 %3580 }
0x17ba   :  { %v3582_v37 = vmul.f32 0.015625, %v3581_v32 }
0x17bc   :  { %v3584_v34 = vrot.slane %v3582_v37, 1  ;;  %v3587_v36 = vsub.f32 %v3568_v19, %v3582_v37 }
0x17be   :  { %v3588_v38 = vsub.f32 %v3569_v13, %v3584_v34  ;;  %v3589_v41 = vmul.f32 %v3587_v36, %v3587_v36 }
0x17c0   :  { %v3590_v40 = vmul.f32 %v3588_v38, %v3588_v38 }
0x17c2   :  { %v3593_v42 = vrot.slane %v3590_v40, 7 }
0x17c4   :  { %v3594_v44 = vsel %vm3575_vm12, %v3593_v42, %v3589_v41 }
0x17c5   :  { %v3596_v48 = vsel %vm3578_vm13, %v3594_v44, 0.0 }
0x17c6   :  { %3597 = vadd.xlane.f32.xlu1 %v3596_v48 }
0x184f   :  { %v3598_v46 = vpop.xlane.xlu1 %3597 }
0x1850   :  { %v3599_v53 = vmul.f32 0.015625, %v3598_v46 }
0x1852   :  { %v3600_v58 = vadd.f32 1e-05, %v3599_v53 }
0x1854   :  { %4780 = vrsqrt.f32 %v3600_v58 }
0x1861   :  { %v4781_v52 = vpop.eup %4780 }
0x1862   :  { %v3603_v57 = vrot.slane %v4781_v52, 1  ;;  %v3606_v55 = vmul.f32 %v4781_v52, %v3587_v36 }
0x1864   :  { %v3607_v25 = vmul.f32 %v3603_v57, %v3588_v38  ;;  %v3614_v59 = vmul.f32 %v4057_v56, %v3606_v55 }
0x1866   :  { %v3615_v62 = vmul.f32 %v4057_v56, %v3607_v25  ;;  %v3622_v8 = vadd.f32 %v4058_v47, %v3614_v59 }
0x1868   :  { %v3623_v63 = vadd.f32 %v4058_v47, %v3615_v62  ;;  %v3624_v3 = vpack.c.bf16 %v3622_v8, %v3622_v8 }
0x186a   :  { %v3625_v5 = vpack.c.bf16 %v3623_v63, %v3623_v63  ;;  %v3643_v6 = vunpack.c.l.b16 %v3624_v3 }
0x186c   :  { %v3644_v16 = vunpack.c.l.b16 %v3625_v5  ;;  %v3645_v7 = vrot.slane %v3643_v6, 4 }
0x186e   :  { %v3646_v22 = vrot.slane %v3644_v16, 3 }
0x1870   :  { %v3648_v21 = vsel %vm3647_vm14, %v3646_v22, %v3645_v7 }
0x1871   :  { %v3649_v23 = vpack.c.b16 %v3648_v21, %v3648_v21 }
0x1873   :  { %4527 = vmatmul.mubr.msk.bf16.vlgmr.msra.gmra.mxu0 %vm146_vm0, %v3649_v23 }
0x1933   :  { %v3711_v28 = vpop.f32.mrf.mxu0 }
0x1934   :  { %v3712_v4 = vadd.f32 %v4059_v35, %v3711_v28 }
0x1935   :  { %v4528_v39 = vpop.f32.mrf.mxu0 }
0x1936   :  { %3717 = vst [vmem:[#allocation2] sm:$0x3] %v3712_v4 }
0x1937   :  { %v3714_v9 = vpop.f32.mrf.mxu0 }
0x1938   :  { %4797 = shalt.err (!%p4794_p4)
}
0x1939   :  { %3727 = dma.vmem_to_hbm [thread:$0]  %s3725_s10, 32, %s5858_s22, [#allocation3]   ;;  %v4529_v15 = vpop.f32.mrf.mxu0 }
0x193a   :  { %4806 = dma.done.wait [#allocation3], 32  }
0x193b   :  { %4807 = vsyncadd [#allocation3], 4294967264 }
0x193c   :  { %3731 = vsyncpa [#allocation3], 1 }

</bundles_post_ra>
